<compile_context>
chip_gen: v6e
topology: v6e:2x2x1
jax: 0.10.0
libtpu: 0.0.40
codegen_flags: <defaults>
</compile_context>

<pallas_src>
from functools import partial

import numpy as np

import jax
import jax.numpy as jnp
from jax.experimental import pallas as pl
from jax.experimental.pallas import tpu as pltpu


# ----------------------------- helpers ------------------------------------- #

def _round_up(x, m):
    return (x + m - 1) // m * m


def _vmem_capacity_bytes():
    try:
        return int(pltpu.get_tpu_info().vmem_capacity_bytes)
    except Exception:
        return 64 * 1024 * 1024   # conservative fallback (v7x physical VMEM)


def _pick_tile_h(H, Wp, Cp, budget):
    """Largest divisor of H whose per-tile working set fits ~budget/4, with the
    row-tile flat length a multiple of 8; prefer >=2 tiles so the pipeline and
    the second TensorCore have work."""
    def ok(th):
        return th == H or (th * Wp) % 8 == 0

    def need(th):  # intermediate scratch + acc scratch + double-buffered out (f32)
        ms = _round_up((th + 2) * Wp + 2, 8)
        return 4 * Cp * (ms + 3 * th * Wp)

    cands = [d for d in range(1, H + 1) if H % d == 0 and ok(d)]
    fitting = [d for d in cands if need(d) <= budget // 4] or [cands[0]]
    th = fitting[-1]
    if th == H:
        smaller = [d for d in fitting if d < H]
        if smaller:
            th = smaller[-1]
    return th


# ------------------------------ kernel ------------------------------------- #

def _basic_block_kernel(x_ref, w1_ref, s1_ref, w2_ref, s2_ref, mask_ref,
                        out_ref, inter_ref, acc_ref, *, W):
    """One grid step = one (batch element, row tile).

    x_ref:    (1, L_in, Cp)   zero-padded input, spatially flattened (row stride W+4)
    w1_ref:   (9, Cp, Cp)     conv1 weights (BN1 folded in), tap-major
    s1_ref:   (1, Cp)         folded bias+BN1 shift
    w2_ref:   (9, Cp, Cp)     conv2 weights (BN2 folded in)
    s2_ref:   (1, Cp)         folded bias+BN2 shift
    mask_ref: (1, Ms, 1)      1.0 inside the image, 0.0 on the halo/garbage lanes
    out_ref:  (1, M2, Cp)     output row tile, flattened with the same row stride
    inter_ref:(Ms, Cp) f32    VMEM scratch: relu(bn1(conv1(x))) incl. 1-pixel halo
    acc_ref:  (M2, Cp) f32    VMEM scratch: conv2 accumulator
    """
    Wp = W + 4
    Ms = inter_ref.shape[0]
    M2 = acc_ref.shape[0]              # = TH * Wp

    t = pl.program_id(1)
    base = t * M2                      # flat offset of this row tile
    if M2 % 8 == 0:
        base = pl.multiple_of(base, 8)

    # ---- conv1 (+ folded BN1) : 9 shifted 2D GEMMs accumulated in VMEM scratch ----
    inter_ref[...] = jnp.dot(x_ref[0, pl.ds(base, Ms), :], w1_ref[0],
                             preferred_element_type=jnp.float32)
    for k in range(1, 9):
        sh = (k // 3) * Wp + (k % 3)
        inter_ref[...] += jnp.dot(x_ref[0, pl.ds(base + sh, Ms), :], w1_ref[k],
                                  preferred_element_type=jnp.float32)
    # shift + ReLU, then zero everything outside the valid image so the halo ring
    # doubles as conv2's zero padding.
    inter_ref[...] = jnp.maximum(inter_ref[...] + s1_ref[0], 0.0) * mask_ref[0]

    # ---- conv2 (+ folded BN2) + identity residual + ReLU ----
    acc_ref[...] = jnp.dot(inter_ref[0:M2, :], w2_ref[0],
                           preferred_element_type=jnp.float32)
    for k in range(1, 9):
        sh = (k // 3) * Wp + (k % 3)
        acc_ref[...] += jnp.dot(inter_ref[sh:sh + M2, :], w2_ref[k],
                                preferred_element_type=jnp.float32)

    residual = x_ref[0, pl.ds(base + 2 * Wp + 2, M2), :].astype(jnp.float32)
    out_ref[0] = jnp.maximum(acc_ref[...] + s2_ref[0] + residual, 0.0
                             ).astype(out_ref.dtype)


# ------------------------------ wrapper ------------------------------------ #

def basic_block_forward(x_nhwc, p):
    """Full BasicBlock forward. x_nhwc: (N, H, W, C). Returns (N, H, W, C)."""
    N, H, W, C = x_nhwc.shape
    dtype = x_nhwc.dtype
    Wp = W + 4
    Cp = _round_up(C, 128)             # lane-dense channel padding

    # --- fold conv bias + BatchNorm affine into the weights / a single shift ---
    w1 = p["w1"] * p["scale1"][None, None, None, :]
    s1 = p["b1"] * p["scale1"] + p["shift1"]
    w2 = p["w2"] * p["scale2"][None, None, None, :]
    s2 = p["b2"] * p["scale2"] + p["shift2"]

    def pad_ch(a, axes):
        pads = [(0, 0)] * a.ndim
        for ax in axes:
            pads[ax] = (0, Cp - a.shape[ax])
        return jnp.pad(a, pads)

    w1 = pad_ch(w1, (2, 3)).reshape(9, Cp, Cp)
    w2 = pad_ch(w2, (2, 3)).reshape(9, Cp, Cp)
    s1 = pad_ch(s1.reshape(1, C), (1,))
    s2 = pad_ch(s2.reshape(1, C), (1,))

    # --- generation-aware tiling ---
    budget = _vmem_capacity_bytes()
    TH = _pick_tile_h(H, Wp, Cp, budget)
    n_tiles = H // TH
    M2 = TH * Wp                                         # output tile, flattened
    Ms = _round_up((TH + 2) * Wp + 2, 8)                 # intermediate tile + halo
    L_in = _round_up((H - TH) * Wp + 2 * Wp + 2 + Ms, 8)  # flat padded-input length

    # --- pad + flatten activations: (N, H, W, C) -> (N, L_in, Cp) ---
    xp = pad_ch(x_nhwc, (3,))
    xp = jnp.pad(xp, ((0, 0), (2, 2), (2, 2), (0, 0)))   # 2-pixel spatial halo
    xf = xp.reshape(N, (H + 4) * Wp, Cp)
    xf = jnp.pad(xf, ((0, 0), (0, L_in - (H + 4) * Wp), (0, 0)))

    # --- per-row-tile validity mask for the intermediate activation ---
    pos = np.arange(Ms)
    col = pos % Wp
    row = pos // Wp
    tiles = np.arange(n_tiles)[:, None]
    valid = ((col[None, :] >= 1) & (col[None, :] <= W)
             & (tiles * TH + row[None, :] >= 1)
             & (tiles * TH + row[None, :] <= H))
    mask = jnp.asarray(valid[..., None], jnp.float32)     # (n_tiles, Ms, 1)

    kernel = partial(_basic_block_kernel, W=W)

    out_flat = pl.pallas_call(
        kernel,
        out_shape=jax.ShapeDtypeStruct((N, H * Wp, Cp), dtype),
        grid_spec=pltpu.PrefetchScalarGridSpec(
            num_scalar_prefetch=0,
            grid=(N, n_tiles),
            in_specs=[
                pl.BlockSpec((1, L_in, Cp), lambda n, t: (n, 0, 0)),
                pl.BlockSpec((9, Cp, Cp), lambda n, t: (0, 0, 0)),
                pl.BlockSpec((1, Cp), lambda n, t: (0, 0)),
                pl.BlockSpec((9, Cp, Cp), lambda n, t: (0, 0, 0)),
                pl.BlockSpec((1, Cp), lambda n, t: (0, 0)),
                pl.BlockSpec((1, Ms, 1), lambda n, t: (t, 0, 0)),
            ],
            out_specs=pl.BlockSpec((1, M2, Cp), lambda n, t: (n, t, 0)),
            scratch_shapes=[
                pltpu.VMEM((Ms, Cp), jnp.float32),   # intermediate activation
                pltpu.VMEM((M2, Cp), jnp.float32),   # conv2 accumulator
            ],
        ),
        compiler_params=pltpu.CompilerParams(
            dimension_semantics=("parallel", "arbitrary"),
            vmem_limit_bytes=int(min(budget * 3 // 4, 100 * 1024 * 1024)),
        ),
    )(xf, w1, s1, w2, s2, mask)

    # strip the flattening garbage columns and the channel padding
    out = out_flat.reshape(N, H, Wp, Cp)[:, :, :W, :C]
    # TODO(synk): MinkowskiDropPath is only instantiated when drop_path > 0.0;
    # with the default 0.0 it is Identity, as implemented here.
    return out


# --------------------------- reference + demo ------------------------------ #

def _fold_bn(gamma, beta, mean, var, eps=1e-5):
    scale = gamma / jnp.sqrt(var + eps)
    shift = beta - mean * scale
    return scale, shift


def _reference_forward(x_nhwc, p):
    """Pure-JAX reference for correctness checking."""
    def conv_bn(x, w, b, scale, shift):
        y = jax.lax.conv_general_dilated(
            x, w, window_strides=(1, 1), padding="SAME",
            dimension_numbers=("NHWC", "HWIO", "NHWC"))
        return (y + b) * scale + shift

    out = jax.nn.relu(conv_bn(x_nhwc, p["w1"], p["b1"], p["scale1"], p["shift1"]))
    out = conv_bn(out, p["w2"], p["b2"], p["scale2"], p["shift2"])
    return jax.nn.relu(out + x_nhwc)


if __name__ == "__main__":
    # Small shapes: batch=2, inplanes=planes=4, spatial=16x16, dimension=2.
    N, H, W, C = 2, 16, 16, 4

    key = jax.random.PRNGKey(0)
    keys = jax.random.split(key, 12)

    x_nchw = jax.random.normal(keys[0], (N, C, H, W), jnp.float32)  # PyTorch layout
    x_nhwc = jnp.transpose(x_nchw, (0, 2, 3, 1))                    # kernel layout

    # conv1 / conv2: (3,3,Cin,Cout) weights, (Cout,) bias
    w1 = 0.1 * jax.random.normal(keys[1], (3, 3, C, C), jnp.float32)
    b1 = 0.05 * jax.random.normal(keys[2], (C,), jnp.float32)
    w2 = 0.1 * jax.random.normal(keys[3], (3, 3, C, C), jnp.float32)
    b2 = 0.05 * jax.random.normal(keys[4], (C,), jnp.float32)

    # BatchNorm params (inference mode), deterministic.
    g1 = 1.0 + 0.1 * jax.random.normal(keys[5], (C,), jnp.float32)
    be1 = 0.1 * jax.random.normal(keys[6], (C,), jnp.float32)
    m1 = 0.1 * jax.random.normal(keys[7], (C,), jnp.float32)
    v1 = jnp.abs(1.0 + 0.1 * jax.random.normal(keys[8], (C,), jnp.float32))
    g2 = 1.0 + 0.1 * jax.random.normal(keys[9], (C,), jnp.float32)
    be2 = 0.1 * jax.random.normal(keys[10], (C,), jnp.float32)
    m2 = jnp.zeros((C,), jnp.float32)
    v2 = jnp.abs(1.0 + 0.1 * jax.random.normal(keys[11], (C,), jnp.float32))

    scale1, shift1 = _fold_bn(g1, be1, m1, v1)
    scale2, shift2 = _fold_bn(g2, be2, m2, v2)

    params = dict(w1=w1, b1=b1, scale1=scale1, shift1=shift1,
                  w2=w2, b2=b2, scale2=scale2, shift2=shift2)

    out = jax.block_until_ready(basic_block_forward(x_nhwc, params))
    ref = jax.block_until_ready(_reference_forward(x_nhwc, params))

    assert out.shape == (N, H, W, C)
    assert jnp.allclose(out, ref, atol=1e-4, rtol=1e-4), \
        f"max abs err = {jnp.max(jnp.abs(out - ref))}"

    print("KERNEL_OK")
</pallas_src>

<mosaic_0001>
module attributes {stable_mosaic.version = 11 : i64} {
  func.func @_basic_block_kernel(%arg0: i32, %arg1: i32, %arg2: memref<1x416x128xf32, #tpu.memory_space<vmem>>, %arg3: memref<9x128x128xf32, #tpu.memory_space<vmem>>, %arg4: memref<1x128xf32, #tpu.memory_space<vmem>>, %arg5: memref<9x128x128xf32, #tpu.memory_space<vmem>>, %arg6: memref<1x128xf32, #tpu.memory_space<vmem>>, %arg7: memref<1x208x1xf32, #tpu.memory_space<vmem>>, %arg8: memref<1x160x128xf32, #tpu.memory_space<vmem>>, %arg9: memref<208x128xf32, #tpu.memory_space<vmem>>, %arg10: memref<160x128xf32, #tpu.memory_space<vmem>>) attributes {dimension_semantics = [#tpu.dimension_semantics<parallel>, #tpu.dimension_semantics<arbitrary>], iteration_bounds = array<i64: 2, 2>, scalar_prefetch = 0 : i64, scratch_operands = 2 : i64, tpu.core_type = #tpu.core_type<tc>, window_params = [{transform_indices = @transform_0, window_bounds = array<i64: 1, 416, 128>}, {pipeline_mode = #tpu.pipeline_mode<synchronous>, transform_indices = @transform_1, window_bounds = array<i64: 9, 128, 128>}, {pipeline_mode = #tpu.pipeline_mode<synchronous>, transform_indices = @transform_2, window_bounds = array<i64: 1, 128>}, {pipeline_mode = #tpu.pipeline_mode<synchronous>, transform_indices = @transform_3, window_bounds = array<i64: 9, 128, 128>}, {pipeline_mode = #tpu.pipeline_mode<synchronous>, transform_indices = @transform_4, window_bounds = array<i64: 1, 128>}, {transform_indices = @transform_5, window_bounds = array<i64: 1, 208, 1>}, {transform_indices = @transform_6, window_bounds = array<i64: 1, 160, 128>}]} {
    %c160_i32 = arith.constant 160 : i32
    %0 = arith.muli %arg1, %c160_i32 : i32
    %1 = tpu.assume_multiple %0, 8 : i32
    %c0 = arith.constant 0 : index
    %2 = arith.index_cast %1 : i32 to index
    %c0_0 = arith.constant 0 : index
    %3 = vector.load %arg2[%c0, %2, %c0_0] : memref<1x416x128xf32, #tpu.memory_space<vmem>>, vector<1x208x128xf32>
    %4 = vector.shape_cast %3 : vector<1x208x128xf32> to vector<208x128xf32>
    %c0_1 = arith.constant 0 : index
    %c0_2 = arith.constant 0 : index
    %c0_3 = arith.constant 0 : index
    %5 = vector.load %arg3[%c0_1, %c0_2, %c0_3] : memref<9x128x128xf32, #tpu.memory_space<vmem>>, vector<1x128x128xf32>
    %6 = vector.shape_cast %5 : vector<1x128x128xf32> to vector<128x128xf32>
    %cst = arith.constant dense<0.000000e+00> : vector<208x128xf32>
    %7 = tpu.matmul %4, %6, %cst {dimension_numbers = #tpu.dot_dimension_numbers<[1], [0], [0], [1], [0, 0, 1, 1], [], []>} : vector<208x128xf32>, vector<128x128xf32>, vector<208x128xf32> -> vector<208x128xf32>
    %c0_4 = arith.constant 0 : index
    %c0_5 = arith.constant 0 : index
    %8 = vector.load %arg9[%c0_4, %c0_5] : memref<208x128xf32, #tpu.memory_space<vmem>>, vector<208x128xf32>
    tpu.vector_store %arg9[%c0_4, %c0_5], %7 {strides = array<i32>} : memref<208x128xf32, #tpu.memory_space<vmem>>, vector<208x128xf32>,
    %c0_6 = arith.constant 0 : index
    %c0_7 = arith.constant 0 : index
    %9 = vector.load %arg9[%c0_6, %c0_7] : memref<208x128xf32, #tpu.memory_space<vmem>>, vector<208x128xf32>
    %c1_i32 = arith.constant 1 : i32
    %10 = arith.addi %1, %c1_i32 : i32
    %c0_8 = arith.constant 0 : index
    %11 = arith.index_cast %10 : i32 to index
    %c0_9 = arith.constant 0 : index
    %12 = vector.load %arg2[%c0_8, %11, %c0_9] : memref<1x416x128xf32, #tpu.memory_space<vmem>>, vector<1x208x128xf32>
    %13 = vector.shape_cast %12 : vector<1x208x128xf32> to vector<208x128xf32>
    %c1 = arith.constant 1 : index
    %c0_10 = arith.constant 0 : index
    %c0_11 = arith.constant 0 : index
    %14 = vector.load %arg3[%c1, %c0_10, %c0_11] : memref<9x128x128xf32, #tpu.memory_space<vmem>>, vector<1x128x128xf32>
    %15 = vector.shape_cast %14 : vector<1x128x128xf32> to vector<128x128xf32>
    %cst_12 = arith.constant dense<0.000000e+00> : vector<208x128xf32>
    %16 = tpu.matmul %13, %15, %cst_12 {dimension_numbers = #tpu.dot_dimension_numbers<[1], [0], [0], [1], [0, 0, 1, 1], [], []>} : vector<208x128xf32>, vector<128x128xf32>, vector<208x128xf32> -> vector<208x128xf32>
    %17 = arith.addf %9, %16 : vector<208x128xf32>
    %c0_13 = arith.constant 0 : index
    %c0_14 = arith.constant 0 : index
    %18 = vector.load %arg9[%c0_13, %c0_14] : memref<208x128xf32, #tpu.memory_space<vmem>>, vector<208x128xf32>
    tpu.vector_store %arg9[%c0_13, %c0_14], %17 {strides = array<i32>} : memref<208x128xf32, #tpu.memory_space<vmem>>, vector<208x128xf32>,
    %c0_15 = arith.constant 0 : index
    %c0_16 = arith.constant 0 : index
    %19 = vector.load %arg9[%c0_15, %c0_16] : memref<208x128xf32, #tpu.memory_space<vmem>>, vector<208x128xf32>
    %c2_i32 = arith.constant 2 : i32
    %20 = arith.addi %1, %c2_i32 : i32
    %c0_17 = arith.constant 0 : index
    %21 = arith.index_cast %20 : i32 to index
    %c0_18 = arith.constant 0 : index
    %22 = vector.load %arg2[%c0_17, %21, %c0_18] : memref<1x416x128xf32, #tpu.memory_space<vmem>>, vector<1x208x128xf32>
    %23 = vector.shape_cast %22 : vector<1x208x128xf32> to vector<208x128xf32>
    %c2 = arith.constant 2 : index
    %c0_19 = arith.constant 0 : index
    %c0_20 = arith.constant 0 : index
    %24 = vector.load %arg3[%c2, %c0_19, %c0_20] : memref<9x128x128xf32, #tpu.memory_space<vmem>>, vector<1x128x128xf32>
    %25 = vector.shape_cast %24 : vector<1x128x128xf32> to vector<128x128xf32>
    %cst_21 = arith.constant dense<0.000000e+00> : vector<208x128xf32>
    %26 = tpu.matmul %23, %25, %cst_21 {dimension_numbers = #tpu.dot_dimension_numbers<[1], [0], [0], [1], [0, 0, 1, 1], [], []>} : vector<208x128xf32>, vector<128x128xf32>, vector<208x128xf32> -> vector<208x128xf32>
    %27 = arith.addf %19, %26 : vector<208x128xf32>
    %c0_22 = arith.constant 0 : index
    %c0_23 = arith.constant 0 : index
    %28 = vector.load %arg9[%c0_22, %c0_23] : memref<208x128xf32, #tpu.memory_space<vmem>>, vector<208x128xf32>
    tpu.vector_store %arg9[%c0_22, %c0_23], %27 {strides = array<i32>} : memref<208x128xf32, #tpu.memory_space<vmem>>, vector<208x128xf32>,
    %c0_24 = arith.constant 0 : index
    %c0_25 = arith.constant 0 : index
    %29 = vector.load %arg9[%c0_24, %c0_25] : memref<208x128xf32, #tpu.memory_space<vmem>>, vector<208x128xf32>
    %c20_i32 = arith.constant 20 : i32
    %30 = arith.addi %1, %c20_i32 : i32
    %c0_26 = arith.constant 0 : index
    %31 = arith.index_cast %30 : i32 to index
    %c0_27 = arith.constant 0 : index
    %32 = vector.load %arg2[%c0_26, %31, %c0_27] : memref<1x416x128xf32, #tpu.memory_space<vmem>>, vector<1x208x128xf32>
    %33 = vector.shape_cast %32 : vector<1x208x128xf32> to vector<208x128xf32>
    %c3 = arith.constant 3 : index
    %c0_28 = arith.constant 0 : index
    %c0_29 = arith.constant 0 : index
    %34 = vector.load %arg3[%c3, %c0_28, %c0_29] : memref<9x128x128xf32, #tpu.memory_space<vmem>>, vector<1x128x128xf32>
    %35 = vector.shape_cast %34 : vector<1x128x128xf32> to vector<128x128xf32>
    %cst_30 = arith.constant dense<0.000000e+00> : vector<208x128xf32>
    %36 = tpu.matmul %33, %35, %cst_30 {dimension_numbers = #tpu.dot_dimension_numbers<[1], [0], [0], [1], [0, 0, 1, 1], [], []>} : vector<208x128xf32>, vector<128x128xf32>, vector<208x128xf32> -> vector<208x128xf32>
    %37 = arith.addf %29, %36 : vector<208x128xf32>
    %c0_31 = arith.constant 0 : index
    %c0_32 = arith.constant 0 : index
    %38 = vector.load %arg9[%c0_31, %c0_32] : memref<208x128xf32, #tpu.memory_space<vmem>>, vector<208x128xf32>
    tpu.vector_store %arg9[%c0_31, %c0_32], %37 {strides = array<i32>} : memref<208x128xf32, #tpu.memory_space<vmem>>, vector<208x128xf32>,
    %c0_33 = arith.constant 0 : index
    %c0_34 = arith.constant 0 : index
    %39 = vector.load %arg9[%c0_33, %c0_34] : memref<208x128xf32, #tpu.memory_space<vmem>>, vector<208x128xf32>
    %c21_i32 = arith.constant 21 : i32
    %40 = arith.addi %1, %c21_i32 : i32
    %c0_35 = arith.constant 0 : index
    %41 = arith.index_cast %40 : i32 to index
    %c0_36 = arith.constant 0 : index
    %42 = vector.load %arg2[%c0_35, %41, %c0_36] : memref<1x416x128xf32, #tpu.memory_space<vmem>>, vector<1x208x128xf32>
    %43 = vector.shape_cast %42 : vector<1x208x128xf32> to vector<208x128xf32>
    %c4 = arith.constant 4 : index
    %c0_37 = arith.constant 0 : index
    %c0_38 = arith.constant 0 : index
    %44 = vector.load %arg3[%c4, %c0_37, %c0_38] : memref<9x128x128xf32, #tpu.memory_space<vmem>>, vector<1x128x128xf32>
    %45 = vector.shape_cast %44 : vector<1x128x128xf32> to vector<128x128xf32>
    %cst_39 = arith.constant dense<0.000000e+00> : vector<208x128xf32>
    %46 = tpu.matmul %43, %45, %cst_39 {dimension_numbers = #tpu.dot_dimension_numbers<[1], [0], [0], [1], [0, 0, 1, 1], [], []>} : vector<208x128xf32>, vector<128x128xf32>, vector<208x128xf32> -> vector<208x128xf32>
    %47 = arith.addf %39, %46 : vector<208x128xf32>
    %c0_40 = arith.constant 0 : index
    %c0_41 = arith.constant 0 : index
    %48 = vector.load %arg9[%c0_40, %c0_41] : memref<208x128xf32, #tpu.memory_space<vmem>>, vector<208x128xf32>
    tpu.vector_store %arg9[%c0_40, %c0_41], %47 {strides = array<i32>} : memref<208x128xf32, #tpu.memory_space<vmem>>, vector<208x128xf32>,
    %c0_42 = arith.constant 0 : index
    %c0_43 = arith.constant 0 : index
    %49 = vector.load %arg9[%c0_42, %c0_43] : memref<208x128xf32, #tpu.memory_space<vmem>>, vector<208x128xf32>
    %c22_i32 = arith.constant 22 : i32
    %50 = arith.addi %1, %c22_i32 : i32
    %c0_44 = arith.constant 0 : index
    %51 = arith.index_cast %50 : i32 to index
    %c0_45 = arith.constant 0 : index
    %52 = vector.load %arg2[%c0_44, %51, %c0_45] : memref<1x416x128xf32, #tpu.memory_space<vmem>>, vector<1x208x128xf32>
    %53 = vector.shape_cast %52 : vector<1x208x128xf32> to vector<208x128xf32>
    %c5 = arith.constant 5 : index
    %c0_46 = arith.constant 0 : index
    %c0_47 = arith.constant 0 : index
    %54 = vector.load %arg3[%c5, %c0_46, %c0_47] : memref<9x128x128xf32, #tpu.memory_space<vmem>>, vector<1x128x128xf32>
    %55 = vector.shape_cast %54 : vector<1x128x128xf32> to vector<128x128xf32>
    %cst_48 = arith.constant dense<0.000000e+00> : vector<208x128xf32>
    %56 = tpu.matmul %53, %55, %cst_48 {dimension_numbers = #tpu.dot_dimension_numbers<[1], [0], [0], [1], [0, 0, 1, 1], [], []>} : vector<208x128xf32>, vector<128x128xf32>, vector<208x128xf32> -> vector<208x128xf32>
    %57 = arith.addf %49, %56 : vector<208x128xf32>
    %c0_49 = arith.constant 0 : index
    %c0_50 = arith.constant 0 : index
    %58 = vector.load %arg9[%c0_49, %c0_50] : memref<208x128xf32, #tpu.memory_space<vmem>>, vector<208x128xf32>
    tpu.vector_store %arg9[%c0_49, %c0_50], %57 {strides = array<i32>} : memref<208x128xf32, #tpu.memory_space<vmem>>, vector<208x128xf32>,
    %c0_51 = arith.constant 0 : index
    %c0_52 = arith.constant 0 : index
    %59 = vector.load %arg9[%c0_51, %c0_52] : memref<208x128xf32, #tpu.memory_space<vmem>>, vector<208x128xf32>
    %c40_i32 = arith.constant 40 : i32
    %60 = arith.addi %1, %c40_i32 : i32
    %c0_53 = arith.constant 0 : index
    %61 = arith.index_cast %60 : i32 to index
    %c0_54 = arith.constant 0 : index
    %62 = vector.load %arg2[%c0_53, %61, %c0_54] : memref<1x416x128xf32, #tpu.memory_space<vmem>>, vector<1x208x128xf32>
    %63 = vector.shape_cast %62 : vector<1x208x128xf32> to vector<208x128xf32>
    %c6 = arith.constant 6 : index
    %c0_55 = arith.constant 0 : index
    %c0_56 = arith.constant 0 : index
    %64 = vector.load %arg3[%c6, %c0_55, %c0_56] : memref<9x128x128xf32, #tpu.memory_space<vmem>>, vector<1x128x128xf32>
    %65 = vector.shape_cast %64 : vector<1x128x128xf32> to vector<128x128xf32>
    %cst_57 = arith.constant dense<0.000000e+00> : vector<208x128xf32>
    %66 = tpu.matmul %63, %65, %cst_57 {dimension_numbers = #tpu.dot_dimension_numbers<[1], [0], [0], [1], [0, 0, 1, 1], [], []>} : vector<208x128xf32>, vector<128x128xf32>, vector<208x128xf32> -> vector<208x128xf32>
    %67 = arith.addf %59, %66 : vector<208x128xf32>
    %c0_58 = arith.constant 0 : index
    %c0_59 = arith.constant 0 : index
    %68 = vector.load %arg9[%c0_58, %c0_59] : memref<208x128xf32, #tpu.memory_space<vmem>>, vector<208x128xf32>
    tpu.vector_store %arg9[%c0_58, %c0_59], %67 {strides = array<i32>} : memref<208x128xf32, #tpu.memory_space<vmem>>, vector<208x128xf32>,
    %c0_60 = arith.constant 0 : index
    %c0_61 = arith.constant 0 : index
    %69 = vector.load %arg9[%c0_60, %c0_61] : memref<208x128xf32, #tpu.memory_space<vmem>>, vector<208x128xf32>
    %c41_i32 = arith.constant 41 : i32
    %70 = arith.addi %1, %c41_i32 : i32
    %c0_62 = arith.constant 0 : index
    %71 = arith.index_cast %70 : i32 to index
    %c0_63 = arith.constant 0 : index
    %72 = vector.load %arg2[%c0_62, %71, %c0_63] : memref<1x416x128xf32, #tpu.memory_space<vmem>>, vector<1x208x128xf32>
    %73 = vector.shape_cast %72 : vector<1x208x128xf32> to vector<208x128xf32>
    %c7 = arith.constant 7 : index
    %c0_64 = arith.constant 0 : index
    %c0_65 = arith.constant 0 : index
    %74 = vector.load %arg3[%c7, %c0_64, %c0_65] : memref<9x128x128xf32, #tpu.memory_space<vmem>>, vector<1x128x128xf32>
    %75 = vector.shape_cast %74 : vector<1x128x128xf32> to vector<128x128xf32>
    %cst_66 = arith.constant dense<0.000000e+00> : vector<208x128xf32>
    %76 = tpu.matmul %73, %75, %cst_66 {dimension_numbers = #tpu.dot_dimension_numbers<[1], [0], [0], [1], [0, 0, 1, 1], [], []>} : vector<208x128xf32>, vector<128x128xf32>, vector<208x128xf32> -> vector<208x128xf32>
    %77 = arith.addf %69, %76 : vector<208x128xf32>
    %c0_67 = arith.constant 0 : index
    %c0_68 = arith.constant 0 : index
    %78 = vector.load %arg9[%c0_67, %c0_68] : memref<208x128xf32, #tpu.memory_space<vmem>>, vector<208x128xf32>
    tpu.vector_store %arg9[%c0_67, %c0_68], %77 {strides = array<i32>} : memref<208x128xf32, #tpu.memory_space<vmem>>, vector<208x128xf32>,
    %c0_69 = arith.constant 0 : index
    %c0_70 = arith.constant 0 : index
    %79 = vector.load %arg9[%c0_69, %c0_70] : memref<208x128xf32, #tpu.memory_space<vmem>>, vector<208x128xf32>
    %c42_i32 = arith.constant 42 : i32
    %80 = arith.addi %1, %c42_i32 : i32
    %c0_71 = arith.constant 0 : index
    %81 = arith.index_cast %80 : i32 to index
    %c0_72 = arith.constant 0 : index
    %82 = vector.load %arg2[%c0_71, %81, %c0_72] : memref<1x416x128xf32, #tpu.memory_space<vmem>>, vector<1x208x128xf32>
    %83 = vector.shape_cast %82 : vector<1x208x128xf32> to vector<208x128xf32>
    %c8 = arith.constant 8 : index
    %c0_73 = arith.constant 0 : index
    %c0_74 = arith.constant 0 : index
    %84 = vector.load %arg3[%c8, %c0_73, %c0_74] : memref<9x128x128xf32, #tpu.memory_space<vmem>>, vector<1x128x128xf32>
    %85 = vector.shape_cast %84 : vector<1x128x128xf32> to vector<128x128xf32>
    %cst_75 = arith.constant dense<0.000000e+00> : vector<208x128xf32>
    %86 = tpu.matmul %83, %85, %cst_75 {dimension_numbers = #tpu.dot_dimension_numbers<[1], [0], [0], [1], [0, 0, 1, 1], [], []>} : vector<208x128xf32>, vector<128x128xf32>, vector<208x128xf32> -> vector<208x128xf32>
    %87 = arith.addf %79, %86 : vector<208x128xf32>
    %c0_76 = arith.constant 0 : index
    %c0_77 = arith.constant 0 : index
    %88 = vector.load %arg9[%c0_76, %c0_77] : memref<208x128xf32, #tpu.memory_space<vmem>>, vector<208x128xf32>
    tpu.vector_store %arg9[%c0_76, %c0_77], %87 {strides = array<i32>} : memref<208x128xf32, #tpu.memory_space<vmem>>, vector<208x128xf32>,
    %c0_78 = arith.constant 0 : index
    %c0_79 = arith.constant 0 : index
    %89 = vector.load %arg9[%c0_78, %c0_79] : memref<208x128xf32, #tpu.memory_space<vmem>>, vector<208x128xf32>
    %c0_80 = arith.constant 0 : index
    %c0_81 = arith.constant 0 : index
    %90 = vector.load %arg4[%c0_80, %c0_81] : memref<1x128xf32, #tpu.memory_space<vmem>>, vector<1x128xf32>
    %91 = vector.shape_cast %90 : vector<1x128xf32> to vector<128xf32>
    %92 = vector.shape_cast %91 : vector<128xf32> to vector<1x128xf32>
    %93 = vector.broadcast %92 : vector<1x128xf32> to vector<208x128xf32>
    %94 = arith.addf %89, %93 : vector<208x128xf32>
    %cst_82 = arith.constant 0.000000e+00 : f32
    %95 = vector.broadcast %cst_82 : f32 to vector<208x128xf32>
    %96 = arith.maximumf %94, %95 : vector<208x128xf32>
    %c0_83 = arith.constant 0 : index
    %c0_84 = arith.constant 0 : index
    %c0_85 = arith.constant 0 : index
    %97 = vector.load %arg7[%c0_83, %c0_84, %c0_85] : memref<1x208x1xf32, #tpu.memory_space<vmem>>, vector<1x208x1xf32>
    %98 = vector.shape_cast %97 : vector<1x208x1xf32> to vector<208x1xf32>
    %99 = vector.broadcast %98 : vector<208x1xf32> to vector<208x128xf32>
    %100 = arith.mulf %96, %99 : vector<208x128xf32>
    %c0_86 = arith.constant 0 : index
    %c0_87 = arith.constant 0 : index
    %101 = vector.load %arg9[%c0_86, %c0_87] : memref<208x128xf32, #tpu.memory_space<vmem>>, vector<208x128xf32>
    tpu.vector_store %arg9[%c0_86, %c0_87], %100 {strides = array<i32>} : memref<208x128xf32, #tpu.memory_space<vmem>>, vector<208x128xf32>,
    %c0_88 = arith.constant 0 : index
    %c0_89 = arith.constant 0 : index
    %102 = vector.load %arg9[%c0_88, %c0_89] : memref<208x128xf32, #tpu.memory_space<vmem>>, vector<160x128xf32>
    %c0_90 = arith.constant 0 : index
    %c0_91 = arith.constant 0 : index
    %c0_92 = arith.constant 0 : index
    %103 = vector.load %arg5[%c0_90, %c0_91, %c0_92] : memref<9x128x128xf32, #tpu.memory_space<vmem>>, vector<1x128x128xf32>
    %104 = vector.shape_cast %103 : vector<1x128x128xf32> to vector<128x128xf32>
    %cst_93 = arith.constant dense<0.000000e+00> : vector<160x128xf32>
    %105 = tpu.matmul %102, %104, %cst_93 {dimension_numbers = #tpu.dot_dimension_numbers<[1], [0], [0], [1], [0, 0, 1, 1], [], []>} : vector<160x128xf32>, vector<128x128xf32>, vector<160x128xf32> -> vector<160x128xf32>
    %c0_94 = arith.constant 0 : index
    %c0_95 = arith.constant 0 : index
    %106 = vector.load %arg10[%c0_94, %c0_95] : memref<160x128xf32, #tpu.memory_space<vmem>>, vector<160x128xf32>
    tpu.vector_store %arg10[%c0_94, %c0_95], %105 {strides = array<i32>} : memref<160x128xf32, #tpu.memory_space<vmem>>, vector<160x128xf32>,
    %c0_96 = arith.constant 0 : index
    %c0_97 = arith.constant 0 : index
    %107 = vector.load %arg10[%c0_96, %c0_97] : memref<160x128xf32, #tpu.memory_space<vmem>>, vector<160x128xf32>
    %c1_98 = arith.constant 1 : index
    %c0_99 = arith.constant 0 : index
    %108 = vector.load %arg9[%c1_98, %c0_99] : memref<208x128xf32, #tpu.memory_space<vmem>>, vector<160x128xf32>
    %c1_100 = arith.constant 1 : index
    %c0_101 = arith.constant 0 : index
    %c0_102 = arith.constant 0 : index
    %109 = vector.load %arg5[%c1_100, %c0_101, %c0_102] : memref<9x128x128xf32, #tpu.memory_space<vmem>>, vector<1x128x128xf32>
    %110 = vector.shape_cast %109 : vector<1x128x128xf32> to vector<128x128xf32>
    %cst_103 = arith.constant dense<0.000000e+00> : vector<160x128xf32>
    %111 = tpu.matmul %108, %110, %cst_103 {dimension_numbers = #tpu.dot_dimension_numbers<[1], [0], [0], [1], [0, 0, 1, 1], [], []>} : vector<160x128xf32>, vector<128x128xf32>, vector<160x128xf32> -> vector<160x128xf32>
    %112 = arith.addf %107, %111 : vector<160x128xf32>
    %c0_104 = arith.constant 0 : index
    %c0_105 = arith.constant 0 : index
    %113 = vector.load %arg10[%c0_104, %c0_105] : memref<160x128xf32, #tpu.memory_space<vmem>>, vector<160x128xf32>
    tpu.vector_store %arg10[%c0_104, %c0_105], %112 {strides = array<i32>} : memref<160x128xf32, #tpu.memory_space<vmem>>, vector<160x128xf32>,
    %c0_106 = arith.constant 0 : index
    %c0_107 = arith.constant 0 : index
    %114 = vector.load %arg10[%c0_106, %c0_107] : memref<160x128xf32, #tpu.memory_space<vmem>>, vector<160x128xf32>
    %c2_108 = arith.constant 2 : index
    %c0_109 = arith.constant 0 : index
    %115 = vector.load %arg9[%c2_108, %c0_109] : memref<208x128xf32, #tpu.memory_space<vmem>>, vector<160x128xf32>
    %c2_110 = arith.constant 2 : index
    %c0_111 = arith.constant 0 : index
    %c0_112 = arith.constant 0 : index
    %116 = vector.load %arg5[%c2_110, %c0_111, %c0_112] : memref<9x128x128xf32, #tpu.memory_space<vmem>>, vector<1x128x128xf32>
    %117 = vector.shape_cast %116 : vector<1x128x128xf32> to vector<128x128xf32>
    %cst_113 = arith.constant dense<0.000000e+00> : vector<160x128xf32>
    %118 = tpu.matmul %115, %117, %cst_113 {dimension_numbers = #tpu.dot_dimension_numbers<[1], [0], [0], [1], [0, 0, 1, 1], [], []>} : vector<160x128xf32>, vector<128x128xf32>, vector<160x128xf32> -> vector<160x128xf32>
    %119 = arith.addf %114, %118 : vector<160x128xf32>
    %c0_114 = arith.constant 0 : index
    %c0_115 = arith.constant 0 : index
    %120 = vector.load %arg10[%c0_114, %c0_115] : memref<160x128xf32, #tpu.memory_space<vmem>>, vector<160x128xf32>
    tpu.vector_store %arg10[%c0_114, %c0_115], %119 {strides = array<i32>} : memref<160x128xf32, #tpu.memory_space<vmem>>, vector<160x128xf32>,
    %c0_116 = arith.constant 0 : index
    %c0_117 = arith.constant 0 : index
    %121 = vector.load %arg10[%c0_116, %c0_117] : memref<160x128xf32, #tpu.memory_space<vmem>>, vector<160x128xf32>
    %c20 = arith.constant 20 : index
    %c0_118 = arith.constant 0 : index
    %122 = vector.load %arg9[%c20, %c0_118] : memref<208x128xf32, #tpu.memory_space<vmem>>, vector<160x128xf32>
    %c3_119 = arith.constant 3 : index
    %c0_120 = arith.constant 0 : index
    %c0_121 = arith.constant 0 : index
    %123 = vector.load %arg5[%c3_119, %c0_120, %c0_121] : memref<9x128x128xf32, #tpu.memory_space<vmem>>, vector<1x128x128xf32>
    %124 = vector.shape_cast %123 : vector<1x128x128xf32> to vector<128x128xf32>
    %cst_122 = arith.constant dense<0.000000e+00> : vector<160x128xf32>
    %125 = tpu.matmul %122, %124, %cst_122 {dimension_numbers = #tpu.dot_dimension_numbers<[1], [0], [0], [1], [0, 0, 1, 1], [], []>} : vector<160x128xf32>, vector<128x128xf32>, vector<160x128xf32> -> vector<160x128xf32>
    %126 = arith.addf %121, %125 : vector<160x128xf32>
    %c0_123 = arith.constant 0 : index
    %c0_124 = arith.constant 0 : index
    %127 = vector.load %arg10[%c0_123, %c0_124] : memref<160x128xf32, #tpu.memory_space<vmem>>, vector<160x128xf32>
    tpu.vector_store %arg10[%c0_123, %c0_124], %126 {strides = array<i32>} : memref<160x128xf32, #tpu.memory_space<vmem>>, vector<160x128xf32>,
    %c0_125 = arith.constant 0 : index
    %c0_126 = arith.constant 0 : index
    %128 = vector.load %arg10[%c0_125, %c0_126] : memref<160x128xf32, #tpu.memory_space<vmem>>, vector<160x128xf32>
    %c21 = arith.constant 21 : index
    %c0_127 = arith.constant 0 : index
    %129 = vector.load %arg9[%c21, %c0_127] : memref<208x128xf32, #tpu.memory_space<vmem>>, vector<160x128xf32>
    %c4_128 = arith.constant 4 : index
    %c0_129 = arith.constant 0 : index
    %c0_130 = arith.constant 0 : index
    %130 = vector.load %arg5[%c4_128, %c0_129, %c0_130] : memref<9x128x128xf32, #tpu.memory_space<vmem>>, vector<1x128x128xf32>
    %131 = vector.shape_cast %130 : vector<1x128x128xf32> to vector<128x128xf32>
    %cst_131 = arith.constant dense<0.000000e+00> : vector<160x128xf32>
    %132 = tpu.matmul %129, %131, %cst_131 {dimension_numbers = #tpu.dot_dimension_numbers<[1], [0], [0], [1], [0, 0, 1, 1], [], []>} : vector<160x128xf32>, vector<128x128xf32>, vector<160x128xf32> -> vector<160x128xf32>
    %133 = arith.addf %128, %132 : vector<160x128xf32>
    %c0_132 = arith.constant 0 : index
    %c0_133 = arith.constant 0 : index
    %134 = vector.load %arg10[%c0_132, %c0_133] : memref<160x128xf32, #tpu.memory_space<vmem>>, vector<160x128xf32>
    tpu.vector_store %arg10[%c0_132, %c0_133], %133 {strides = array<i32>} : memref<160x128xf32, #tpu.memory_space<vmem>>, vector<160x128xf32>,
    %c0_134 = arith.constant 0 : index
    %c0_135 = arith.constant 0 : index
    %135 = vector.load %arg10[%c0_134, %c0_135] : memref<160x128xf32, #tpu.memory_space<vmem>>, vector<160x128xf32>
    %c22 = arith.constant 22 : index
    %c0_136 = arith.constant 0 : index
    %136 = vector.load %arg9[%c22, %c0_136] : memref<208x128xf32, #tpu.memory_space<vmem>>, vector<160x128xf32>
    %c5_137 = arith.constant 5 : index
    %c0_138 = arith.constant 0 : index
    %c0_139 = arith.constant 0 : index
    %137 = vector.load %arg5[%c5_137, %c0_138, %c0_139] : memref<9x128x128xf32, #tpu.memory_space<vmem>>, vector<1x128x128xf32>
    %138 = vector.shape_cast %137 : vector<1x128x128xf32> to vector<128x128xf32>
    %cst_140 = arith.constant dense<0.000000e+00> : vector<160x128xf32>
    %139 = tpu.matmul %136, %138, %cst_140 {dimension_numbers = #tpu.dot_dimension_numbers<[1], [0], [0], [1], [0, 0, 1, 1], [], []>} : vector<160x128xf32>, vector<128x128xf32>, vector<160x128xf32> -> vector<160x128xf32>
    %140 = arith.addf %135, %139 : vector<160x128xf32>
    %c0_141 = arith.constant 0 : index
    %c0_142 = arith.constant 0 : index
    %141 = vector.load %arg10[%c0_141, %c0_142] : memref<160x128xf32, #tpu.memory_space<vmem>>, vector<160x128xf32>
    tpu.vector_store %arg10[%c0_141, %c0_142], %140 {strides = array<i32>} : memref<160x128xf32, #tpu.memory_space<vmem>>, vector<160x128xf32>,
    %c0_143 = arith.constant 0 : index
    %c0_144 = arith.constant 0 : index
    %142 = vector.load %arg10[%c0_143, %c0_144] : memref<160x128xf32, #tpu.memory_space<vmem>>, vector<160x128xf32>
    %c40 = arith.constant 40 : index
    %c0_145 = arith.constant 0 : index
    %143 = vector.load %arg9[%c40, %c0_145] : memref<208x128xf32, #tpu.memory_space<vmem>>, vector<160x128xf32>
    %c6_146 = arith.constant 6 : index
    %c0_147 = arith.constant 0 : index
    %c0_148 = arith.constant 0 : index
    %144 = vector.load %arg5[%c6_146, %c0_147, %c0_148] : memref<9x128x128xf32, #tpu.memory_space<vmem>>, vector<1x128x128xf32>
    %145 = vector.shape_cast %144 : vector<1x128x128xf32> to vector<128x128xf32>
    %cst_149 = arith.constant dense<0.000000e+00> : vector<160x128xf32>
    %146 = tpu.matmul %143, %145, %cst_149 {dimension_numbers = #tpu.dot_dimension_numbers<[1], [0], [0], [1], [0, 0, 1, 1], [], []>} : vector<160x128xf32>, vector<128x128xf32>, vector<160x128xf32> -> vector<160x128xf32>
    %147 = arith.addf %142, %146 : vector<160x128xf32>
    %c0_150 = arith.constant 0 : index
    %c0_151 = arith.constant 0 : index
    %148 = vector.load %arg10[%c0_150, %c0_151] : memref<160x128xf32, #tpu.memory_space<vmem>>, vector<160x128xf32>
    tpu.vector_store %arg10[%c0_150, %c0_151], %147 {strides = array<i32>} : memref<160x128xf32, #tpu.memory_space<vmem>>, vector<160x128xf32>,
    %c0_152 = arith.constant 0 : index
    %c0_153 = arith.constant 0 : index
    %149 = vector.load %arg10[%c0_152, %c0_153] : memref<160x128xf32, #tpu.memory_space<vmem>>, vector<160x128xf32>
    %c41 = arith.constant 41 : index
    %c0_154 = arith.constant 0 : index
    %150 = vector.load %arg9[%c41, %c0_154] : memref<208x128xf32, #tpu.memory_space<vmem>>, vector<160x128xf32>
    %c7_155 = arith.constant 7 : index
    %c0_156 = arith.constant 0 : index
    %c0_157 = arith.constant 0 : index
    %151 = vector.load %arg5[%c7_155, %c0_156, %c0_157] : memref<9x128x128xf32, #tpu.memory_space<vmem>>, vector<1x128x128xf32>
    %152 = vector.shape_cast %151 : vector<1x128x128xf32> to vector<128x128xf32>
    %cst_158 = arith.constant dense<0.000000e+00> : vector<160x128xf32>
    %153 = tpu.matmul %150, %152, %cst_158 {dimension_numbers = #tpu.dot_dimension_numbers<[1], [0], [0], [1], [0, 0, 1, 1], [], []>} : vector<160x128xf32>, vector<128x128xf32>, vector<160x128xf32> -> vector<160x128xf32>
    %154 = arith.addf %149, %153 : vector<160x128xf32>
    %c0_159 = arith.constant 0 : index
    %c0_160 = arith.constant 0 : index
    %155 = vector.load %arg10[%c0_159, %c0_160] : memref<160x128xf32, #tpu.memory_space<vmem>>, vector<160x128xf32>
    tpu.vector_store %arg10[%c0_159, %c0_160], %154 {strides = array<i32>} : memref<160x128xf32, #tpu.memory_space<vmem>>, vector<160x128xf32>,
    %c0_161 = arith.constant 0 : index
    %c0_162 = arith.constant 0 : index
    %156 = vector.load %arg10[%c0_161, %c0_162] : memref<160x128xf32, #tpu.memory_space<vmem>>, vector<160x128xf32>
    %c42 = arith.constant 42 : index
    %c0_163 = arith.constant 0 : index
    %157 = vector.load %arg9[%c42, %c0_163] : memref<208x128xf32, #tpu.memory_space<vmem>>, vector<160x128xf32>
    %c8_164 = arith.constant 8 : index
    %c0_165 = arith.constant 0 : index
    %c0_166 = arith.constant 0 : index
    %158 = vector.load %arg5[%c8_164, %c0_165, %c0_166] : memref<9x128x128xf32, #tpu.memory_space<vmem>>, vector<1x128x128xf32>
    %159 = vector.shape_cast %158 : vector<1x128x128xf32> to vector<128x128xf32>
    %cst_167 = arith.constant dense<0.000000e+00> : vector<160x128xf32>
    %160 = tpu.matmul %157, %159, %cst_167 {dimension_numbers = #tpu.dot_dimension_numbers<[1], [0], [0], [1], [0, 0, 1, 1], [], []>} : vector<160x128xf32>, vector<128x128xf32>, vector<160x128xf32> -> vector<160x128xf32>
    %161 = arith.addf %156, %160 : vector<160x128xf32>
    %c0_168 = arith.constant 0 : index
    %c0_169 = arith.constant 0 : index
    %162 = vector.load %arg10[%c0_168, %c0_169] : memref<160x128xf32, #tpu.memory_space<vmem>>, vector<160x128xf32>
    tpu.vector_store %arg10[%c0_168, %c0_169], %161 {strides = array<i32>} : memref<160x128xf32, #tpu.memory_space<vmem>>, vector<160x128xf32>,
    %c40_i32_170 = arith.constant 40 : i32
    %163 = arith.addi %1, %c40_i32_170 : i32
    %c2_i32_171 = arith.constant 2 : i32
    %164 = arith.addi %163, %c2_i32_171 : i32
    %c0_172 = arith.constant 0 : index
    %165 = arith.index_cast %164 : i32 to index
    %c0_173 = arith.constant 0 : index
    %166 = vector.load %arg2[%c0_172, %165, %c0_173] : memref<1x416x128xf32, #tpu.memory_space<vmem>>, vector<1x160x128xf32>
    %167 = vector.shape_cast %166 : vector<1x160x128xf32> to vector<160x128xf32>
    %c0_174 = arith.constant 0 : index
    %c0_175 = arith.constant 0 : index
    %168 = vector.load %arg10[%c0_174, %c0_175] : memref<160x128xf32, #tpu.memory_space<vmem>>, vector<160x128xf32>
    %c0_176 = arith.constant 0 : index
    %c0_177 = arith.constant 0 : index
    %169 = vector.load %arg6[%c0_176, %c0_177] : memref<1x128xf32, #tpu.memory_space<vmem>>, vector<1x128xf32>
    %170 = vector.shape_cast %169 : vector<1x128xf32> to vector<128xf32>
    %171 = vector.shape_cast %170 : vector<128xf32> to vector<1x128xf32>
    %172 = vector.broadcast %171 : vector<1x128xf32> to vector<160x128xf32>
    %173 = arith.addf %168, %172 : vector<160x128xf32>
    %174 = arith.addf %173, %167 : vector<160x128xf32>
    %cst_178 = arith.constant 0.000000e+00 : f32
    %175 = vector.broadcast %cst_178 : f32 to vector<160x128xf32>
    %176 = arith.maximumf %174, %175 : vector<160x128xf32>
    %c0_179 = arith.constant 0 : index
    %c0_180 = arith.constant 0 : index
    %c0_181 = arith.constant 0 : index
    %177 = vector.load %arg8[%c0_179, %c0_180, %c0_181] : memref<1x160x128xf32, #tpu.memory_space<vmem>>, vector<1x160x128xf32>
    %178 = vector.shape_cast %177 : vector<1x160x128xf32> to vector<160x128xf32>
    %179 = vector.shape_cast %176 : vector<160x128xf32> to vector<1x160x128xf32>
    tpu.vector_store %arg8[%c0_179, %c0_180, %c0_181], %179 {strides = array<i32>} : memref<1x160x128xf32, #tpu.memory_space<vmem>>, vector<1x160x128xf32>,
    return
  }
  func.func @transform_0(%arg0: i32, %arg1: i32) -> (i32, i32, i32) {
    %c0_i32 = arith.constant 0 : i32
    %c0_i32_0 = arith.constant 0 : i32
    %c0_i32_1 = arith.constant 0 : i32
    return %arg0, %c0_i32, %c0_i32_0 : i32, i32, i32
  }
  func.func @transform_1(%arg0: i32, %arg1: i32) -> (i32, i32, i32) {
    %c0_i32 = arith.constant 0 : i32
    %c0_i32_0 = arith.constant 0 : i32
    %c0_i32_1 = arith.constant 0 : i32
    %c0_i32_2 = arith.constant 0 : i32
    return %c0_i32, %c0_i32_0, %c0_i32_1 : i32, i32, i32
  }
  func.func @transform_2(%arg0: i32, %arg1: i32) -> (i32, i32) {
    %c0_i32 = arith.constant 0 : i32
    %c0_i32_0 = arith.constant 0 : i32
    %c0_i32_1 = arith.constant 0 : i32
    return %c0_i32, %c0_i32_0 : i32, i32
  }
  func.func @transform_3(%arg0: i32, %arg1: i32) -> (i32, i32, i32) {
    %c0_i32 = arith.constant 0 : i32
    %c0_i32_0 = arith.constant 0 : i32
    %c0_i32_1 = arith.constant 0 : i32
    %c0_i32_2 = arith.constant 0 : i32
    return %c0_i32, %c0_i32_0, %c0_i32_1 : i32, i32, i32
  }
  func.func @transform_4(%arg0: i32, %arg1: i32) -> (i32, i32) {
    %c0_i32 = arith.constant 0 : i32
    %c0_i32_0 = arith.constant 0 : i32
    %c0_i32_1 = arith.constant 0 : i32
    return %c0_i32, %c0_i32_0 : i32, i32
  }
  func.func @transform_5(%arg0: i32, %arg1: i32) -> (i32, i32, i32) {
    %c0_i32 = arith.constant 0 : i32
    %c0_i32_0 = arith.constant 0 : i32
    %c0_i32_1 = arith.constant 0 : i32
    return %arg1, %c0_i32, %c0_i32_0 : i32, i32, i32
  }
  func.func @transform_6(%arg0: i32, %arg1: i32) -> (i32, i32, i32) {
    %c0_i32 = arith.constant 0 : i32
    %c0_i32_0 = arith.constant 0 : i32
    return %arg0, %arg1, %c0_i32 : i32, i32, i32
  }
}

</mosaic_0001>

<bundles_post_ra>
// kernel: tpu_custom_call.1
= control target key start
LH: loop header
LB: loop body
LE: loop exit
PB: predicated region body
PF: predicated region fallthrough
CT: control target
= control target key end

     0   :  { %s10535_s0 = inlined_call_operand.hbm [shape: f32[2,416,128], index: 0, kind: input, shape index: {}]   ;;  %s10536_s1 = inlined_call_operand.hbm [shape: f32[9,128,128], index: 1, kind: input, shape index: {}]   ;;  %s10537_s2 = inlined_call_operand.vmem [shape: f32[1,128], index: 2, kind: input, shape index: {}]   ;;  %s10538_s3 = inlined_call_operand.hbm [shape: f32[9,128,128], index: 3, kind: input, shape index: {}]   ;;  %s10539_s4 = inlined_call_operand.vmem [shape: f32[1,128], index: 4, kind: input, shape index: {}]   ;;  %s10540_s5 = inlined_call_operand.vmem [shape: f32[2,208,1], index: 5, kind: input, shape index: {}]   ;;  %s10541_s6 = inlined_call_operand.hbm [shape: f32[2,320,128], index: 6, kind: output, shape index: {}]  }
   0x1   :  { %10553 = sst [smem:[#allocation103_spill]] %s10536_s1 }
   0x2   :  { %10554 = sst [smem:[#allocation104_spill]] %s10538_s3 }
   0x3   :  { %10555 = sst [smem:[#allocation105_spill]] %s10539_s4 }
   0x4   :  { %10556 = sst [smem:[#allocation106_spill]] %s10541_s6 }
   0x5   :  { %11 = vsyncpa [#allocation5], 0 }
   0x6   :  { %13 = vsyncpa [#allocation5 + $0x1], 0 }
   0x7   :  { %14 = vsyncpa [#allocation8], 0 }
   0x8   :  { %15 = vsyncpa [#allocation6], 0 }
   0x9   :  { %17 = vsyncpa [#allocation6 + $0x1], 0  ;;  %s8604_s21 = smov 0   ;;  %s8606_s22 = smov 0  }
   0xa   :  { %s8608_s23 = smov 0   ;;  %s8610_s24 = smov 0  }
   0xb   :  { %s8612_s25 = smov 0   ;;  %s8614_s26 = smov 0  }
   0xc   :  { %s8616_s27 = smov 0   ;;  %s8618_s28 = smov 0  }
   0xd   :  { %s8620_s29 = smov 0   ;;  %s8622_s30 = smov 0  }
   0xe   :  { %s8624_s7 = smov 0  }
   0xf LB: > { %10557 = sst [smem:[#allocation14_spill]] %s8518_s21  ;;  %s6040_s8 = sadd.s32 4294967295, %s8558_s7   ;;  %s8558_s7 = sphi %s8624_s7, %s23_s7   ;;  %s8554_s30 = sphi %s8622_s30, %s10785_s30   ;;  %s8550_s29 = sphi %s8620_s29, %s10777_s29   ;;  %s8546_s28 = sphi %s8618_s28, %s10784_s28   ;;  %s8542_s27 = sphi %s8616_s27, %s10776_s27   ;;  %s8538_s26 = sphi %s8614_s26, %s10783_s26   ;;  %s8534_s25 = sphi %s8612_s25, %s10782_s25   ;;  %s8530_s24 = sphi %s8610_s24, %s10781_s24   ;;  %s8526_s23 = sphi %s8608_s23, %s10780_s23   ;;  %s8522_s22 = sphi %s8606_s22, %s10779_s22   ;;  %s8518_s21 = sphi %s8604_s21, %s10778_s21  }
  0x10   : > { %10558 = sst [smem:[#allocation15_spill]] %s8546_s28  ;;  %s6041_s9 = sadd.s32 4294967294, %s8558_s7  }
  0x11   : > { %10559 = sst [smem:[#allocation16_spill]] %s8550_s29  ;;  %p55_p0 = scmp.ne.s32.totalorder %s8534_s25, %s8530_s24 }
  0x12   : > { %p8660_p1 = scmp.eq.s32.totalorder %s6040_s8, 0  ;;  %p190_p2 = scmp.ne.s32.totalorder %s8526_s23, %s8522_s22 }
  0x13   : > { %p191_p4 = scmp.eq.s32.totalorder %s6040_s8, 3  ;;  %p196_p5 = scmp.ne.s32.totalorder %s8522_s22, %s8518_s21 }
  0x14   : > { %p8669_p3 = por %p8660_p1, %p55_p0  ;;  %p197_p6 = scmp.eq.s32.totalorder %s6041_s9, 3 }
  0x15   : > { %p8675_p7 = por %p191_p4, %p190_p2  ;;  %p6042_p8 = scmp.ge.s32.totalorder %s8558_s7, 1 }
  0x16   : > { %p8680_p9 = por %p197_p6, %p196_p5  ;;  %p204_p10 = scmp.lt.s32.totalorder %s8558_s7, 5 }
  0x17   : > { %s10562_s13 = scalar_select %p8675_p7, 1, 0 }
  0x18   : > { %s10564_s14 = scalar_select %p8680_p9, 1, 0 }
  0x19   : > { %10563 = sst [smem:[#allocation17_spill]] %s10562_s13  ;;  %p8685_p11 = pnand %p6042_p8, %p204_p10 }
  0x1a   : > { %10565 = sst [smem:[#allocation18_spill]] %s10564_s14  ;;  %s8560_s16 = smov [#allocation7]  }
  0x1b   : > { %s216_s17 = sshll.u32 %s8560_s16, 4  ;;  %p8233_p12 = pneg %p8685_p11  ;;  %s217_s17 = int_to_ptr.vmem [resolvable:$true] %s216_s17 }
  0x1c   : > { %s8561_s19 = smov [#allocation9]   ;;  %s8365_s24 = scalar_lea.vmem %s217_s17, 18432 }
  0x1d   : > { %p8693_p13 = pnand %p8233_p12, %p8660_p1  ;;  %s232_s20 = sshll.u32 %s8561_s19, 4  ;;  %s233_s20 = int_to_ptr.vmem [resolvable:$true] %s232_s20 }
  0x1e   : > { %p8366_p2 = scmp.ne.s32.totalorder %s217_s17, %s8365_s24  ;;  %p8373_p6 = scmp.lt.s32.totalorder %s217_s17, %s217_s17 }
  0x1f   : > { %p8356_p0 = pneg %p8693_p13  ;;  %p8374_p8 = scmp.lt.s32.totalorder %s8365_s24, %s8365_s24 }
  0x21   : > { %p8368_p4 = pnand %p8366_p2, %p8356_p0  ;;  %p8375_p10 = por %p8374_p8, %p8373_p6 }
  0x23   : > { %p8369_p5 = pneg %p8368_p4 }
  0x25   : > { %p8376_p12 = pnand %p8375_p10, %p8369_p5 }
  0x27   : > { %8379 = shalt.err (!%p8376_p12)
}
  0x28   : > { %s10543_s8 = smov 128   ;;  %s10544_s9 = smov 8  }
  0x29   : > { %s10568_s1 = sld [smem:[#allocation103_spill]]  ;;  %s8391_s11 = scalar_lea.vmem %s233_s20, 18432 }
  0x2a   : > { %p8392_p2 = scmp.ne.s32.totalorder %s233_s20, %s8391_s11  ;;  %p8399_p5 = scmp.lt.s32.totalorder %s233_s20, %s233_s20 }
  0x2b   : > { %p8400_p8 = scmp.lt.s32.totalorder %s8391_s11, %s8391_s11 }
  0x2c   : > { %p8394_p4 = pnand %p8392_p2, %p8356_p0 }
  0x2d   : > { %p8401_p10 = por %p8400_p8, %p8399_p5 }
  0x2e   : > { %p8395_p6 = pneg %p8394_p4 }
  0x2f   : > { %8236 = dma.hbm_to_vmem [thread:$0]  (!%p8693_p13), %s10568_s1, 18432, %s217_s17, [#allocation8], %s10543_s8, %s10543_s8, %s10544_s9  }
  0x30   : > { %p8402_p12 = pnand %p8401_p10, %p8395_p6 }
  0x32   : > { %8405 = shalt.err (!%p8402_p12)
}
  0x33   : > { %s10569_s3 = sld [smem:[#allocation104_spill]]  ;;  %s32_s11 = sadd.s32 1, %s8550_s29 }
  0x34   : > { %s35_s17 = sadd.s32 1, %s8554_s30  ;;  %p33_p0 = scmp.ge.s32.totalorder %s32_s11, 2 }
  0x35   : > { %s42_s18 = sadd.s32 1, %s8538_s26  ;;  %p49_p2 = scmp.ne.s32.totalorder %s8538_s26, %s8534_s25 }
  0x36   : > { %p50_p4 = scmp.eq.s32.totalorder %s8558_s7, 0  ;;  %s10787_s11 = smov (%p33_p0, %s32_s11), 0 }
  0x37   : > { %10570 = sst [smem:[#allocation19_spill]] %s10787_s11  ;;  %s10789_s17 = smov (!%p33_p0, %s35_s17), %s8554_s30 }
  0x38   : > { %p8730_p6 = por %p50_p4, %p49_p2  ;;  %s176_s16 = ssub.s32 %s8550_s29, %s10787_s11 }
  0x39   : > { %8239 = dma.hbm_to_vmem [thread:$0]  (!%p8693_p13), %s10569_s3, 18432, %s233_s20, [#allocation8], %s10543_s8, %s10543_s8, %s10544_s9  }
  0x3a   : > { %p37_p13 = scmp.ge.s32.totalorder %s10789_s17, 2  ;;  %p8250_p5 = scmp.lt.s32.totalorder %s8558_s7, 4 }
  0x3b   : > { %s249_s20 = sand.u32 1, %s8538_s26   ;;  %s8216_s19 = smul.u32 6656, %s8554_s30 }
  0x3c   : > { %s10791_s17 = smov (%p37_p13, %s10789_s17), 0  ;;  %s8215_s24 = smul.u32 416, %s249_s20 }
  0x3d   : > { %s39_s8 = ssub.s32 %s8554_s30, %s10791_s17  ;;  %s8746_s3 = scalar_lea.hbm %s10535_s0, %s8216_s19 }
  0x3e   : > { %p40_p8 = scmp.eq.s32.totalorder %s39_s8, 0  ;;  %s177_s21 = sor.u32 %s176_s16, %s39_s8 }
  0x3f   : > { %p178_p10 = scmp.eq.s32.totalorder %s177_s21, 0  ;;  %s10572_s29 = sadd.s32 1, %s8526_s23 }
  0x40   : > { %s8749_s11 = scalar_select %p40_p8, %s8538_s26, %s42_s18  }
  0x41   : > { %s8754_s6 = scalar_select %p178_p10, %s8526_s23, %s10572_s29  }
  0x42   : > { %s253_s13 = scalar_lea.vmem [#allocation4], %s8215_s24  ;;  %p8760_p12 = pnand %p8250_p5, %p8730_p6 }
  0x43   : > { %s260_s28 = sshll.u32 %s253_s13, 4  ;;  %s250_s1 = scalar_lea.sflag [#allocation5], %s249_s20  ;;  %s261_s28 = int_to_ptr.vmem [resolvable:$true] %s260_s28 }
  0x44   : > { %p8408_p0 = pneg %p8760_p12  ;;  %s8419_s8 = scalar_lea.vmem %s261_s28, 6656 }
  0x45   : > { %p8420_p2 = scmp.ne.s32.totalorder %s261_s28, %s8419_s8  ;;  %s8564_s21 = smov [#allocation4]  }
  0x46   : > { %s8424_s29 = sshll.u32 %s8564_s21, 4  ;;  %s8425_s29 = int_to_ptr.vmem [resolvable:$false] %s8424_s29 }
  0x47   : > { %p8422_p4 = pnand %p8420_p2, %p8408_p0  ;;  %s8426_s9 = scalar_lea.vmem %s8425_s29, 13312 }
  0x48   : > { %p8427_p8 = scmp.lt.s32.totalorder %s261_s28, %s8425_s29  ;;  %p8428_p10 = scmp.lt.s32.totalorder %s8426_s9, %s8419_s8 }
  0x49   : > { %p8423_p13 = pneg %p8422_p4 }
  0x4a   : > { %p8429_p9 = por %p8428_p10, %p8427_p8 }
  0x4c   : > { %p8430_p6 = pnand %p8429_p9, %p8423_p13 }
  0x4e   : > { %8433 = shalt.err (!%p8430_p6)
}
  0x4f   : > { %s10574_s13 = smov 8   ;;  %s10575_s18 = smov 128  }
  0x50   : > { %8243 = dma.hbm_to_vmem [thread:$0]  (!%p8760_p12), %s8746_s3, 6656, %s261_s28, %s250_s1, %s10575_s18, %s10575_s18, %s10574_s13  }
  0x51   : > { %280 = sbr.rel (%p8685_p11) target bundleno = 1013 (0x3f5), region = 44 }
  0x56   : > { %s282_s14 = sand.u32 1, %s8534_s25  }
  0x57   : > { %s8775_s16 = smul.u32 416, %s282_s14  ;;  %s283_s20 = scalar_lea.sflag [#allocation5], %s282_s14 }
  0x59   : > { %s286_s19 = scalar_lea.vmem [#allocation4], %s8775_s16 }
  0x5a   : > { %8505 = dma.done.wait (%p8669_p3), %s283_s20, 6656  }
  0x5b   : > { %8507 = vsyncadd (%p8669_p3), %s283_s20, 4294960640 }
  0x5c   : > { %8509 = dma.done.wait (%p8660_p1), [#allocation8], 36864  }
  0x5d   : > { %8511 = vsyncadd (%p8660_p1), [#allocation8], 4294930432  ;;  %v377_v0 = vld [vmem:[#allocation7 + $0x78] sm:$0xff]  ;;  %v376_v1 = vld [vmem:[#allocation7 + $0x70] sm:$0xff]  ;;  %s334_s3 = smul.u32 160, %s8542_s27  ;;  %p328_p1 = scmp.lt.s32.totalorder %s8542_s27, 1 }
  0x5e   : > { %6986 = vmatprep.subr.mxu0 %v377_v0  ;;  %v669_v2 = vld [vmem:[#allocation7 + $0xf8] sm:$0xff]  ;;  %v375_v3 = vld [vmem:[#allocation7 + $0x68] sm:$0xff]  ;;  %v668_v4 = vld [vmem:[#allocation7 + $0xf0] sm:$0xff]  ;;  %s325_s21 = sand.u32 1, %s8522_s22   ;;  %s10755_s13 = sld [smem:[#allocation105_spill]] }
  0x5f   : > { %6987 = vmatpush3.msra.mxu0 %v377_v0  ;;  %7057 = vmatprep.subr.mxu1 %v669_v2  ;;  %v667_v5 = vld [vmem:[#allocation7 + $0xe8] sm:$0xff]  ;;  %v374_v6 = vld [vmem:[#allocation7 + $0x60] sm:$0xff]  ;;  %v373_v8 = vld [vmem:[#allocation7 + $0x58] sm:$0xff]  ;;  %s8789_s4 = scalar_lea.vmem %s286_s19, %s334_s3 [#allocation4]  ;;  %s8218_s18 = smul.u32 160, %s325_s21 }
  0x60   : > { %6988 = vmatprep.subr.mxu0 %v376_v1  ;;  %7058 = vmatpush3.msra.mxu1 %v669_v2  ;;  %v666_v7 = vld [vmem:[#allocation7 + $0xe0] sm:$0xff]  ;;  %v665_v9 = vld [vmem:[#allocation7 + $0xd8] sm:$0xff]  ;;  %v372_v10 = vld [vmem:[#allocation7 + $0x50] sm:$0xff]  ;;  %s8980_s28 = scalar_select %p328_p1, %s8542_s27, 1 }
  0x61   : > { %6989 = vmatpush3.msra.mxu0 %v376_v1  ;;  %7059 = vmatprep.subr.mxu1 %v668_v4  ;;  %v664_v11 = vld [vmem:[#allocation7 + $0xd0] sm:$0xff]  ;;  %v371_v12 = vld [vmem:[#allocation7 + $0x48] sm:$0xff]  ;;  %v370_v14 = vld [vmem:[#allocation7 + $0x40] sm:$0xff]  ;;  %s10363_s14 = scalar_lea.vmem [#allocation10], %s8218_s18  ;;  %s10767_s16 = sld [smem:[#allocation15_spill]] }
  0x62   : > { %6990 = vmatprep.subr.mxu0 %v375_v3  ;;  %7060 = vmatpush3.msra.mxu1 %v668_v4  ;;  %v663_v13 = vld [vmem:[#allocation7 + $0xc8] sm:$0xff]  ;;  %v662_v15 = vld [vmem:[#allocation7 + $0xc0] sm:$0xff]  ;;  %v369_v16 = vld [vmem:[#allocation7 + $0x38] sm:$0xff]  ;;  %s8219_s10 = smul.u32 208, %s8980_s28  ;;  %s8566_s9 = smov [#allocation10]  }
  0x63   : > { %6991 = vmatpush3.msra.mxu0 %v375_v3  ;;  %7061 = vmatprep.subr.mxu1 %v667_v5  ;;  %v661_v17 = vld [vmem:[#allocation7 + $0xb8] sm:$0xff]  ;;  %v368_v18 = vld [vmem:[#allocation7 + $0x30] sm:$0xff]  ;;  %v367_v20 = vld [vmem:[#allocation7 + $0x28] sm:$0xff]  ;;  %s5888_s20 = smul.u32 20, %s8542_s27 }
  0x64   : > { %6992 = vmatprep.subr.mxu0 %v374_v6  ;;  %7062 = vmatpush3.msra.mxu1 %v667_v5  ;;  %v660_v19 = vld [vmem:[#allocation7 + $0xb0] sm:$0xff]  ;;  %v659_v21 = vld [vmem:[#allocation7 + $0xa8] sm:$0xff]  ;;  %v366_v22 = vld [vmem:[#allocation7 + $0x20] sm:$0xff]  ;;  %s9004_s24 = scalar_lea.vmem %s10540_s5, %s8219_s10  ;;  %s5896_s10 = sshll.u32 %s10363_s14, 4  ;;  %s10469_s10 = int_to_ptr.vmem [resolvable:$true] %s5896_s10 }
  0x65   : > { %6993 = vmatpush3.msra.mxu0 %v374_v6  ;;  %7063 = vmatprep.subr.mxu1 %v666_v7  ;;  %v658_v23 = vld [vmem:[#allocation7 + $0xa0] sm:$0xff]  ;;  %v365_v24 = vld [vmem:[#allocation7 + $0x18] sm:$0xff]  ;;  %v336_v25 = vld [vmem:[%s8789_s4] sm:$0xff]  ;;  %s8434_s29 = scalar_lea.vmem %s10469_s10, 2560 }
  0x66   : > { %6994 = vmatprep.subr.mxu0 %v373_v8  ;;  %7064 = vmatpush3.msra.mxu1 %v666_v7  ;;  %v364_v26 = vld [vmem:[#allocation7 + $0x10] sm:$0xff]  ;;  %v657_v27 = vld [vmem:[#allocation7 + $0x98] sm:$0xff]  ;;  %v363_v28 = vld [vmem:[#allocation7 + $0x8] sm:$0xff]  ;;  %p8435_p3 = scmp.ne.s32.totalorder %s10469_s10, %s8434_s29 }
  0x67   : > { %6995 = vmatpush3.msra.mxu0 %v373_v8  ;;  %7065 = vmatprep.subr.mxu1 %v665_v9  ;;  %v656_v29 = vld [vmem:[#allocation7 + $0x90] sm:$0xff]  ;;  %v362_v30 = vld [vmem:[#allocation7] sm:$0xff]  ;;  %v655_v31 = vld [vmem:[#allocation7 + $0x88] sm:$0xff]  ;;  %s8220_s19 = smul.u32 40, %s10767_s16 }
  0x68   : > { %6996 = vmatprep.subr.mxu0 %v372_v10  ;;  %7066 = vmatpush3.msra.mxu1 %v665_v9  ;;  %v337_v32 = vld [vmem:[%s8789_s4 + $0x8] sm:$0xff]  ;;  %v338_v34 = vld [vmem:[%s8789_s4 + $0x10] sm:$0xff]  ;;  %v986_v35 = vld [vmem:[#allocation7 + $0x170] sm:$0xff]  ;;  %p8436_p9 = pnand %p8435_p3, %p8675_p7 }
  0x69   : > { %6997 = vmatpush3.msra.mxu0 %v372_v10  ;;  %7067 = vmatprep.subr.mxu1 %v664_v11  ;;  %v987_v33 = vld [vmem:[#allocation7 + $0x178] sm:$0xff]  ;;  %v654_v36 = vld [vmem:[#allocation7 + $0x80] sm:$0xff]  ;;  %v339_v37 = vld [vmem:[%s8789_s4 + $0x18] sm:$0xff]  ;;  %s5893_s27 = sadd.s32 %s8220_s19, %s5888_s20 }
  0x6a   : > { %6998 = vmatprep.subr.mxu0 %v371_v12  ;;  %7068 = vmatpush3.msra.mxu1 %v664_v11  ;;  %v6051_v38 = vld [vmem:[%s8789_s4 + $0x1] sm:$0xff]  ;;  %v985_v40 = vld [vmem:[#allocation7 + $0x168] sm:$0xff]  ;;  %v6052_v41 = vld [vmem:[%s8789_s4 + $0x9] sm:$0xff]  ;;  %s6281_s28 = sshll.u32 %s5893_s27, 7  ;;  %p8437_p11 = pneg %p8436_p9 }
  0x6b   : > { %6999 = vmatpush3.msra.mxu0 %v371_v12  ;;  %7069 = vmatprep.subr.mxu1 %v663_v13  ;;  %v340_v39 = vld [vmem:[%s8789_s4 + $0x20] sm:$0xff]  ;;  %v984_v42 = vld [vmem:[#allocation7 + $0x160] sm:$0xff]  ;;  %v341_v44 = vld [vmem:[%s8789_s4 + $0x28] sm:$0xff] }
  0x6c   : > { %7000 = vmatprep.subr.mxu0 %v370_v14  ;;  %7070 = vmatpush3.msra.mxu1 %v663_v13  ;;  %v6053_v43 = vld [vmem:[%s8789_s4 + $0x11] sm:$0xff]  ;;  %v1305_v45 = vld [vmem:[#allocation7 + $0x1f8] sm:$0xff]  ;;  %v6054_v47 = vld [vmem:[%s8789_s4 + $0x19] sm:$0xff] }
  0x6d   : > { %7001 = vmatpush3.msra.mxu0 %v370_v14  ;;  %7071 = vmatprep.subr.mxu1 %v662_v15  ;;  %v342_v46 = vld [vmem:[%s8789_s4 + $0x30] sm:$0xff]  ;;  %v983_v48 = vld [vmem:[#allocation7 + $0x158] sm:$0xff]  ;;  %v343_v50 = vld [vmem:[%s8789_s4 + $0x38] sm:$0xff] }
  0x6e   : > { %7002 = vmatprep.subr.mxu0 %v369_v16  ;;  %7072 = vmatpush3.msra.mxu1 %v662_v15  ;;  %v6055_v49 = vld [vmem:[%s8789_s4 + $0x21] sm:$0xff]  ;;  %v6056_v53 = vld [vmem:[%s8789_s4 + $0x29] sm:$0xff]  ;;  %v981_v54 = vld [vmem:[#allocation7 + $0x148] sm:$0xff] }
  0x6f   : > { %7003 = vmatpush3.msra.mxu0 %v369_v16  ;;  %7073 = vmatprep.subr.mxu1 %v661_v17  ;;  %v982_v51 = vld [vmem:[#allocation7 + $0x150] sm:$0xff]  ;;  %v6057_v55 = vld [vmem:[%s8789_s4 + $0x31] sm:$0xff]  ;;  %v345_v56 = vld [vmem:[%s8789_s4 + $0x48] sm:$0xff] }
  0x70   : > { %7004 = vmatprep.subr.mxu0 %v368_v18  ;;  %7074 = vmatpush3.msra.mxu1 %v661_v17  ;;  %v344_v52 = vld [vmem:[%s8789_s4 + $0x40] sm:$0xff]  ;;  %v980_v57 = vld [vmem:[#allocation7 + $0x140] sm:$0xff]  ;;  %v979_v60 = vld [vmem:[#allocation7 + $0x138] sm:$0xff] }
  0x71   : > { %7005 = vmatpush3.msra.mxu0 %v368_v18  ;;  %7075 = vmatprep.subr.mxu1 %v660_v19  ;;  %v346_v58 = vld [vmem:[%s8789_s4 + $0x50] sm:$0xff]  ;;  %v6058_v59 = vld [vmem:[%s8789_s4 + $0x39] sm:$0xff]  ;;  %v6059_v61 = vld [vmem:[%s8789_s4 + $0x41] sm:$0xff] }
  0x72   : > { %7006 = vmatprep.subr.mxu0 %v367_v20  ;;  %7076 = vmatpush3.msra.mxu1 %v660_v19  ;;  %v347_v62 = vld [vmem:[%s8789_s4 + $0x58] sm:$0xff]  ;;  %v978_v63 = vld [vmem:[#allocation7 + $0x130] sm:$0xff]  ;;  %v6060_v1 = vld [vmem:[%s8789_s4 + $0x49] sm:$0xff] }
  0x73   : > { %7007 = vmatpush3.msra.mxu0 %v367_v20  ;;  %7077 = vmatprep.subr.mxu1 %v659_v21  ;;  %v348_v0 = vld [vmem:[%s8789_s4 + $0x60] sm:$0xff]  ;;  %v977_v2 = vld [vmem:[#allocation7 + $0x128] sm:$0xff]  ;;  %v349_v4 = vld [vmem:[%s8789_s4 + $0x68] sm:$0xff] }
  0x74   : > { %7008 = vmatprep.subr.mxu0 %v366_v22  ;;  %7078 = vmatpush3.msra.mxu1 %v659_v21  ;;  %v6061_v3 = vld [vmem:[%s8789_s4 + $0x51] sm:$0xff]  ;;  %v1304_v5 = vld [vmem:[#allocation7 + $0x1f0] sm:$0xff]  ;;  %v6064_v13 = vld [vmem:[%s8789_s4 + $0x69] sm:$0xff] }
  0x75   : > { %7009 = vmatpush3.msra.mxu0 %v366_v22  ;;  %7079 = vmatprep.subr.mxu1 %v658_v23  ;;  %v350_v6 = vld [vmem:[%s8789_s4 + $0x70] sm:$0xff]  ;;  %v6062_v7 = vld [vmem:[%s8789_s4 + $0x59] sm:$0xff]  ;;  %v6063_v8 = vld [vmem:[%s8789_s4 + $0x61] sm:$0xff] }
  0x76   : > { %7010 = vmatprep.subr.mxu0 %v365_v24  ;;  %7018 = vmatprep.mubr.f32.mxu0 %v336_v25  ;;  %v1303_v9 = vld [vmem:[#allocation7 + $0x1e8] sm:$0xff]  ;;  %v352_v11 = vld [vmem:[%s8789_s4 + $0x80] sm:$0xff]  ;;  %v976_v12 = vld [vmem:[#allocation7 + $0x120] sm:$0xff] }
  0x77   : > { %7011 = vmatpush3.msra.mxu0 %v365_v24  ;;  %7080 = vmatpush3.msra.mxu1 %v658_v23  ;;  %v351_v10 = vld [vmem:[%s8789_s4 + $0x78] sm:$0xff]  ;;  %v1302_v14 = vld [vmem:[#allocation7 + $0x1e0] sm:$0xff]  ;;  %v353_v16 = vld [vmem:[%s8789_s4 + $0x88] sm:$0xff] }
  0x78   : > { %7012 = vmatprep.subr.mxu0 %v364_v26  ;;  %7081 = vmatprep.subr.mxu1 %v657_v27  ;;  %v6065_v15 = vld [vmem:[%s8789_s4 + $0x71] sm:$0xff]  ;;  %v1301_v18 = vld [vmem:[#allocation7 + $0x1d8] sm:$0xff]  ;;  %v6066_v19 = vld [vmem:[%s8789_s4 + $0x79] sm:$0xff] }
  0x79   : > { %7013 = vmatpush3.msra.mxu0 %v364_v26  ;;  %7082 = vmatpush3.msra.mxu1 %v657_v27  ;;  %v354_v17 = vld [vmem:[%s8789_s4 + $0x90] sm:$0xff]  ;;  %v975_v20 = vld [vmem:[#allocation7 + $0x118] sm:$0xff]  ;;  %v355_v22 = vld [vmem:[%s8789_s4 + $0x98] sm:$0xff] }
  0x7a   : > { %7014 = vmatprep.subr.mxu0 %v363_v28  ;;  %7083 = vmatprep.subr.mxu1 %v656_v29  ;;  %v6067_v21 = vld [vmem:[%s8789_s4 + $0x81] sm:$0xff]  ;;  %v6068_v25 = vld [vmem:[%s8789_s4 + $0x89] sm:$0xff]  ;;  %v6069_v27 = vld [vmem:[%s8789_s4 + $0x91] sm:$0xff] }
  0x7b   : > { %7015 = vmatpush3.msra.mxu0 %v363_v28  ;;  %7084 = vmatpush3.msra.mxu1 %v656_v29  ;;  %v1300_v23 = vld [vmem:[#allocation7 + $0x1d0] sm:$0xff]  ;;  %v357_v28 = vld [vmem:[%s8789_s4 + $0xa8] sm:$0xff]  ;;  %v1299_v29 = vld [vmem:[#allocation7 + $0x1c8] sm:$0xff] }
  0x7c   : > { %7016 = vmatprep.subr.mxu0 %v362_v30  ;;  %7085 = vmatprep.subr.mxu1 %v655_v31  ;;  %v356_v24 = vld [vmem:[%s8789_s4 + $0xa0] sm:$0xff] }
  0x7d   : > { %7017 = vmatpush3.msra.mxu0 %v362_v30  ;;  %7086 = vmatpush3.msra.mxu1 %v655_v31  ;;  %v974_v26 = vld [vmem:[#allocation7 + $0x110] sm:$0xff]  ;;  %v358_v30 = vld [vmem:[%s8789_s4 + $0xb0] sm:$0xff] }
  0x7e   : > { %7019 = vmatmul.mubr.f32.vlgmr.msra.gmra.mxu0 %v337_v32  ;;  %7128 = vmatprep.subr.mxu0 %v987_v33  ;;  %v6070_v31 = vld [vmem:[%s8789_s4 + $0x99] sm:$0xff]  ;;  %v1298_v32 = vld [vmem:[#allocation7 + $0x1c0] sm:$0xff] }
  0x7f   : > { %7129 = vmatpush3.msra.mxu0 %v987_v33  ;;  %7021 = vmatprep.mubr.f32.mxu0 %v338_v34  ;;  %v973_v33 = vld [vmem:[#allocation7 + $0x108] sm:$0xff] }
  0x80   : > { %7130 = vmatprep.subr.mxu0 %v986_v35  ;;  %7087 = vmatprep.subr.mxu1 %v654_v36  ;;  %v359_v34 = vld [vmem:[%s8789_s4 + $0xb8] sm:$0xff] }
  0x81   : > { %7131 = vmatpush3.msra.mxu0 %v986_v35  ;;  %7088 = vmatpush3.msra.mxu1 %v654_v36  ;;  %v1297_v35 = vld [vmem:[#allocation7 + $0x1b8] sm:$0xff]  ;;  %v360_v36 = vld [vmem:[%s8789_s4 + $0xc0] sm:$0xff] }
  0x82   : > { %7022 = vmatmul.mubr.f32.gmra.mxu0 %v339_v37  ;;  %7089 = vmatprep.mubr.f32.mxu1 %v6051_v38  ;;  %v6071_v37 = vld [vmem:[%s8789_s4 + $0xa1] sm:$0xff]  ;;  %v972_v38 = vld [vmem:[#allocation7 + $0x100] sm:$0xff] }
  0x83   : > { %7024 = vmatprep.mubr.f32.mxu0 %v340_v39  ;;  %7132 = vmatprep.subr.mxu0 %v985_v40  ;;  %v361_v39 = vld [vmem:[%s8789_s4 + $0xc8] sm:$0xff] }
  0x84   : > { %7090 = vmatmul.mubr.f32.vlgmr.msra.gmra.mxu1 %v6052_v41  ;;  %7133 = vmatpush3.msra.mxu0 %v985_v40  ;;  %v6072_v40 = vld [vmem:[%s8789_s4 + $0xa9] sm:$0xff]  ;;  %v1296_v41 = vld [vmem:[#allocation7 + $0x1b0] sm:$0xff] }
  0x85   : > { %7134 = vmatprep.subr.mxu0 %v984_v42  ;;  %7092 = vmatprep.mubr.f32.mxu1 %v6053_v43  ;;  %v1295_v43 = vld [vmem:[#allocation7 + $0x1a8] sm:$0xff] }
  0x86   : > { %7025 = vmatmul.mubr.f32.gmra.mxu0 %v341_v44  ;;  %7199 = vmatprep.subr.mxu1 %v1305_v45  ;;  %v6077_v44 = vld [vmem:[%s8789_s4 + $0x2] sm:$0xff] }
  0x87   : > { %7027 = vmatprep.mubr.f32.mxu0 %v342_v46  ;;  %7135 = vmatpush3.msra.mxu0 %v984_v42  ;;  %v6073_v42 = vld [vmem:[%s8789_s4 + $0xb1] sm:$0xff]  ;;  %v6074_v46 = vld [vmem:[%s8789_s4 + $0xb9] sm:$0xff] }
  0x88   : > { %7093 = vmatmul.mubr.f32.gmra.mxu1 %v6054_v47  ;;  %7136 = vmatprep.subr.mxu0 %v983_v48  ;;  %v1294_v47 = vld [vmem:[#allocation7 + $0x1a0] sm:$0xff] }
  0x89   : > { %7137 = vmatpush3.msra.mxu0 %v983_v48  ;;  %7095 = vmatprep.mubr.f32.mxu1 %v6055_v49  ;;  %v1623_v48 = vld [vmem:[#allocation7 + $0x278] sm:$0xff] }
  0x8a   : > { %7028 = vmatmul.mubr.f32.gmra.mxu0 %v343_v50  ;;  %7138 = vmatprep.subr.mxu0 %v982_v51  ;;  %v1293_v49 = vld [vmem:[#allocation7 + $0x198] sm:$0xff] }
  0x8b   : > { %7030 = vmatprep.mubr.f32.mxu0 %v344_v52  ;;  %7139 = vmatpush3.msra.mxu0 %v982_v51  ;;  %v6075_v50 = vld [vmem:[%s8789_s4 + $0xc1] sm:$0xff]  ;;  %v6079_v51 = vld [vmem:[%s8789_s4 + $0x12] sm:$0xff] }
  0x8c   : > { %7096 = vmatmul.mubr.f32.gmra.mxu1 %v6056_v53  ;;  %7140 = vmatprep.subr.mxu0 %v981_v54  ;;  %v6080_v52 = vld [vmem:[%s8789_s4 + $0x1a] sm:$0xff]  ;;  %v6076_v53 = vld [vmem:[%s8789_s4 + $0xc9] sm:$0xff] }
  0x8d   : > { %7098 = vmatprep.mubr.f32.mxu1 %v6057_v55  ;;  %7141 = vmatpush3.msra.mxu0 %v981_v54  ;;  %v1292_v54 = vld [vmem:[#allocation7 + $0x190] sm:$0xff] }
  0x8e   : > { %7031 = vmatmul.mubr.f32.gmra.mxu0 %v345_v56  ;;  %7142 = vmatprep.subr.mxu0 %v980_v57  ;;  %v1622_v55 = vld [vmem:[#allocation7 + $0x270] sm:$0xff]  ;;  %v1291_v56 = vld [vmem:[#allocation7 + $0x188] sm:$0xff] }
  0x8f   : > { %7033 = vmatprep.mubr.f32.mxu0 %v346_v58  ;;  %7143 = vmatpush3.msra.mxu0 %v980_v57  ;;  %v6081_v57 = vld [vmem:[%s8789_s4 + $0x22] sm:$0xff]  ;;  %v1621_v58 = vld [vmem:[#allocation7 + $0x268] sm:$0xff] }
  0x90   : > { %7099 = vmatmul.mubr.f32.gmra.mxu1 %v6058_v59  ;;  %7144 = vmatprep.subr.mxu0 %v979_v60  ;;  %v6082_v59 = vld [vmem:[%s8789_s4 + $0x2a] sm:$0xff] }
  0x91   : > { %7101 = vmatprep.mubr.f32.mxu1 %v6059_v61  ;;  %7145 = vmatpush3.msra.mxu0 %v979_v60  ;;  %v1290_v60 = vld [vmem:[#allocation7 + $0x180] sm:$0xff] }
  0x92   : > { %7034 = vmatmul.mubr.f32.gmra.mxu0 %v347_v62  ;;  %7146 = vmatprep.subr.mxu0 %v978_v63  ;;  %v6103_v61 = vld [vmem:[%s8789_s4 + $0x14] sm:$0xff]  ;;  %v6104_v62 = vld [vmem:[%s8789_s4 + $0x1c] sm:$0xff] }
  0x93   : > { %7036 = vmatprep.mubr.f32.mxu0 %v348_v0  ;;  %7147 = vmatpush3.msra.mxu0 %v978_v63  ;;  %v1620_v63 = vld [vmem:[#allocation7 + $0x260] sm:$0xff] }
  0x94   : > { %7102 = vmatmul.mubr.f32.gmra.mxu1 %v6060_v1  ;;  %7148 = vmatprep.subr.mxu0 %v977_v2  ;;  %v6083_v0 = vld [vmem:[%s8789_s4 + $0x32] sm:$0xff]  ;;  %v6084_v1 = vld [vmem:[%s8789_s4 + $0x3a] sm:$0xff] }
  0x95   : > { %7104 = vmatprep.mubr.f32.mxu1 %v6061_v3  ;;  %7200 = vmatpush3.msra.mxu1 %v1305_v45  ;;  %v6078_v45 = vld [vmem:[%s8789_s4 + $0xa] sm:$0xff] }
  0x96   : > { %7037 = vmatmul.mubr.f32.gmra.mxu0 %v349_v4  ;;  %7201 = vmatprep.subr.mxu1 %v1304_v5  ;;  %v1619_v3 = vld [vmem:[#allocation7 + $0x258] sm:$0xff] }
  0x97   : > { %7039 = vmatprep.mubr.f32.mxu0 %v350_v6  ;;  %7202 = vmatpush3.msra.mxu1 %v1304_v5  ;;  %v6085_v4 = vld [vmem:[%s8789_s4 + $0x42] sm:$0xff]  ;;  %v6106_v5 = vld [vmem:[%s8789_s4 + $0x2c] sm:$0xff]  ;;  %v6107_v6 = vld [vmem:[%s8789_s4 + $0x34] sm:$0xff] }
  0x98   : > { %7105 = vmatmul.mubr.f32.gmra.mxu1 %v6062_v7  ;;  %7149 = vmatpush3.msra.mxu0 %v977_v2  ;;  %v6105_v2 = vld [vmem:[%s8789_s4 + $0x24] sm:$0xff] }
  0x99   : > { %7107 = vmatprep.mubr.f32.mxu1 %v6063_v8  ;;  %7203 = vmatprep.subr.mxu1 %v1303_v9  ;;  %v1618_v7 = vld [vmem:[#allocation7 + $0x250] sm:$0xff]  ;;  %v6086_v8 = vld [vmem:[%s8789_s4 + $0x4a] sm:$0xff] }
  0x9a   : > { %7040 = vmatmul.mubr.f32.gmra.mxu0 %v351_v10  ;;  %7204 = vmatpush3.msra.mxu1 %v1303_v9  ;;  %v1941_v9 = vld [vmem:[#allocation7 + $0x2f8] sm:$0xff]  ;;  %v6087_v10 = vld [vmem:[%s8789_s4 + $0x52] sm:$0xff] }
  0x9b   : > { %7042 = vmatprep.mubr.f32.mxu0 %v352_v11  ;;  %7150 = vmatprep.subr.mxu0 %v976_v12  ;;  %v6108_v11 = vld [vmem:[%s8789_s4 + $0x3c] sm:$0xff] }
  0x9c   : > { %7108 = vmatmul.mubr.f32.gmra.mxu1 %v6064_v13  ;;  %7205 = vmatprep.subr.mxu1 %v1302_v14  ;;  %v6109_v13 = vld [vmem:[%s8789_s4 + $0x44] sm:$0xff] }
  0x9d   : > { %7110 = vmatprep.mubr.f32.mxu1 %v6065_v15  ;;  %7151 = vmatpush3.msra.mxu0 %v976_v12  ;;  %v1617_v12 = vld [vmem:[#allocation7 + $0x248] sm:$0xff]  ;;  %v1616_v15 = vld [vmem:[#allocation7 + $0x240] sm:$0xff] }
  0x9e   : > { %7043 = vmatmul.mubr.f32.gmra.mxu0 %v353_v16  ;;  %7206 = vmatpush3.msra.mxu1 %v1302_v14  ;;  %v6088_v14 = vld [vmem:[%s8789_s4 + $0x5a] sm:$0xff]  ;;  %v6089_v16 = vld [vmem:[%s8789_s4 + $0x62] sm:$0xff] }
  0x9f   : > { %7045 = vmatprep.mubr.f32.mxu0 %v354_v17  ;;  %7207 = vmatprep.subr.mxu1 %v1301_v18  ;;  %v6110_v17 = vld [vmem:[%s8789_s4 + $0x4c] sm:$0xff] }
  0xa0   : > { %7111 = vmatmul.mubr.f32.gmra.mxu1 %v6066_v19  ;;  %7152 = vmatprep.subr.mxu0 %v975_v20  ;;  %v6111_v19 = vld [vmem:[%s8789_s4 + $0x54] sm:$0xff] }
  0xa1   : > { %7113 = vmatprep.mubr.f32.mxu1 %v6067_v21  ;;  %7208 = vmatpush3.msra.mxu1 %v1301_v18  ;;  %v1615_v18 = vld [vmem:[#allocation7 + $0x238] sm:$0xff]  ;;  %v1614_v21 = vld [vmem:[#allocation7 + $0x230] sm:$0xff] }
  0xa2   : > { %7046 = vmatmul.mubr.f32.gmra.mxu0 %v355_v22  ;;  %7209 = vmatprep.subr.mxu1 %v1300_v23  ;;  %v6091_v22 = vld [vmem:[%s8789_s4 + $0x72] sm:$0xff] }
  0xa3   : > { %7048 = vmatprep.mubr.f32.mxu0 %v356_v24  ;;  %7153 = vmatpush3.msra.mxu0 %v975_v20  ;;  %v6090_v20 = vld [vmem:[%s8789_s4 + $0x6a] sm:$0xff]  ;;  %v1613_v24 = vld [vmem:[#allocation7 + $0x228] sm:$0xff] }
  0xa4   : > { %7114 = vmatmul.mubr.f32.gmra.mxu1 %v6068_v25  ;;  %7154 = vmatprep.subr.mxu0 %v974_v26  ;;  %v6113_v25 = vld [vmem:[%s8789_s4 + $0x64] sm:$0xff] }
  0xa5   : > { %7210 = vmatpush3.msra.mxu1 %v1300_v23  ;;  %7116 = vmatprep.mubr.f32.mxu1 %v6069_v27  ;;  %v6112_v23 = vld [vmem:[%s8789_s4 + $0x5c] sm:$0xff] }
  0xa6   : > { %7049 = vmatmul.mubr.f32.gmra.mxu0 %v357_v28  ;;  %7211 = vmatprep.subr.mxu1 %v1299_v29  ;;  %v1940_v27 = vld [vmem:[#allocation7 + $0x2f0] sm:$0xff] }
  0xa7   : > { %7051 = vmatprep.mubr.f32.mxu0 %v358_v30  ;;  %7212 = vmatpush3.msra.mxu1 %v1299_v29  ;;  %v6093_v28 = vld [vmem:[%s8789_s4 + $0x82] sm:$0xff]  ;;  %v6114_v29 = vld [vmem:[%s8789_s4 + $0x6c] sm:$0xff]  ;;  %v6115_v30 = vld [vmem:[%s8789_s4 + $0x74] sm:$0xff] }
  0xa8   : > { %7117 = vmatmul.mubr.f32.gmra.mxu1 %v6070_v31  ;;  %7155 = vmatpush3.msra.mxu0 %v974_v26  ;;  %v6092_v26 = vld [vmem:[%s8789_s4 + $0x7a] sm:$0xff] }
  0xa9   : > { %7213 = vmatprep.subr.mxu1 %v1298_v32  ;;  %7156 = vmatprep.subr.mxu0 %v973_v33  ;;  %v1939_v31 = vld [vmem:[#allocation7 + $0x2e8] sm:$0xff] }
  0xaa   : > { %7052 = vmatmul.mubr.f32.gmra.mxu0 %v359_v34  ;;  %7214 = vmatpush3.msra.mxu1 %v1298_v32  ;;  %v6094_v32 = vld [vmem:[%s8789_s4 + $0x8a] sm:$0xff] }
  0xab   : > { %7215 = vmatprep.subr.mxu1 %v1297_v35  ;;  %7054 = vmatprep.mubr.f32.mxu0 %v360_v36  ;;  %v1612_v34 = vld [vmem:[#allocation7 + $0x220] sm:$0xff] }
  0xac   : > { %7119 = vmatprep.mubr.f32.mxu1 %v6071_v37  ;;  %7157 = vmatpush3.msra.mxu0 %v973_v33  ;;  %v6095_v33 = vld [vmem:[%s8789_s4 + $0x92] sm:$0xff]  ;;  %v6117_v37 = vld [vmem:[%s8789_s4 + $0x84] sm:$0xff] }
  0xad   : > { %7216 = vmatpush3.msra.mxu1 %v1297_v35  ;;  %7158 = vmatprep.subr.mxu0 %v972_v38  ;;  %v6116_v35 = vld [vmem:[%s8789_s4 + $0x7c] sm:$0xff]  ;;  %v1938_v36 = vld [vmem:[#allocation7 + $0x2e0] sm:$0xff] }
  0xae   : > { %7055 = vmatmul.mubr.f32.gmra.mxu0 %v361_v39  ;;  %7120 = vmatmul.mubr.f32.gmra.mxu1 %v6072_v40  ;;  %v1937_v39 = vld [vmem:[#allocation7 + $0x2d8] sm:$0xff] }
  0xaf   : > { %7217 = vmatprep.subr.mxu1 %v1296_v41  ;;  %7159 = vmatpush3.msra.mxu0 %v972_v38  ;;  %v6096_v38 = vld [vmem:[%s8789_s4 + $0x9a] sm:$0xff]  ;;  %v6097_v40 = vld [vmem:[%s8789_s4 + $0xa2] sm:$0xff] }
  0xb0   : > { %7218 = vmatpush3.msra.mxu1 %v1296_v41  ;;  %7122 = vmatprep.mubr.f32.mxu1 %v6073_v42  ;;  %v6118_v41 = vld [vmem:[%s8789_s4 + $0x8c] sm:$0xff] }
  0xb1   : > { %7219 = vmatprep.subr.mxu1 %v1295_v43  ;;  %7160 = vmatprep.mubr.f32.mxu0 %v6077_v44  ;;  %v1611_v42 = vld [vmem:[#allocation7 + $0x218] sm:$0xff]  ;;  %v1936_v44 = vld [vmem:[#allocation7 + $0x2d0] sm:$0xff] }
  0xb2   : > { %7220 = vmatpush3.msra.mxu1 %v1295_v43  ;;  %7161 = vmatmul.mubr.f32.vlgmr.msra.gmra.mxu0 %v6078_v45  ;;  %v6098_v43 = vld [vmem:[%s8789_s4 + $0xaa] sm:$0xff]  ;;  %v6119_v45 = vld [vmem:[%s8789_s4 + $0x94] sm:$0xff] }
  0xb3   : > { %7123 = vmatmul.mubr.f32.gmra.mxu1 %v6074_v46  ;;  %7221 = vmatprep.subr.mxu1 %v1294_v47  ;;  %v6120_v46 = vld [vmem:[%s8789_s4 + $0x9c] sm:$0xff] }
  0xb4   : > { %7270 = vmatprep.subr.mxu0 %v1623_v48  ;;  %7222 = vmatpush3.msra.mxu1 %v1294_v47  ;;  %v1935_v47 = vld [vmem:[#allocation7 + $0x2c8] sm:$0xff] }
  0xb5   : > { %7271 = vmatpush3.msra.mxu0 %v1623_v48  ;;  %7223 = vmatprep.subr.mxu1 %v1293_v49  ;;  %v6099_v48 = vld [vmem:[%s8789_s4 + $0xb2] sm:$0xff] }
  0xb6   : > { %7125 = vmatprep.mubr.f32.mxu1 %v6075_v50  ;;  %7163 = vmatprep.mubr.f32.mxu0 %v6079_v51  ;;  %v6100_v50 = vld [vmem:[%s8789_s4 + $0xba] sm:$0xff]  ;;  %v1934_v51 = vld [vmem:[#allocation7 + $0x2c0] sm:$0xff] }
  0xb7   : > { %7224 = vmatpush3.msra.mxu1 %v1293_v49  ;;  %7164 = vmatmul.mubr.f32.gmra.mxu0 %v6080_v52  ;;  %v1610_v49 = vld [vmem:[#allocation7 + $0x210] sm:$0xff] }
  0xb8   : > { %7126 = vmatmul.mubr.f32.gmra.mxu1 %v6076_v53  ;;  %7225 = vmatprep.subr.mxu1 %v1292_v54  ;;  %v6121_v52 = vld [vmem:[%s8789_s4 + $0xa4] sm:$0xff]  ;;  %v6122_v53 = vld [vmem:[%s8789_s4 + $0xac] sm:$0xff] }
  0xb9   : > { %7272 = vmatprep.subr.mxu0 %v1622_v55  ;;  %7226 = vmatpush3.msra.mxu1 %v1292_v54  ;;  %v1609_v54 = vld [vmem:[#allocation7 + $0x208] sm:$0xff] }
  0xba   : > { %7273 = vmatpush3.msra.mxu0 %v1622_v55  ;;  %7227 = vmatprep.subr.mxu1 %v1291_v56  ;;  %v1933_v55 = vld [vmem:[#allocation7 + $0x2b8] sm:$0xff] }
  0xbb   : > { %7166 = vmatprep.mubr.f32.mxu0 %v6081_v57  ;;  %7228 = vmatpush3.msra.mxu1 %v1291_v56  ;;  %v6101_v56 = vld [vmem:[%s8789_s4 + $0xc2] sm:$0xff]  ;;  %v6102_v57 = vld [vmem:[%s8789_s4 + $0xca] sm:$0xff] }
  0xbc   : > { %7274 = vmatprep.subr.mxu0 %v1621_v58  ;;  %7167 = vmatmul.mubr.f32.gmra.mxu0 %v6082_v59  ;;  %v6123_v59 = vld [vmem:[%s8789_s4 + $0xb4] sm:$0xff] }
  0xbd   : > { %7229 = vmatprep.subr.mxu1 %v1290_v60  ;;  %7275 = vmatpush3.msra.mxu0 %v1621_v58  ;;  %v1932_v58 = vld [vmem:[#allocation7 + $0x2b0] sm:$0xff] }
  0xbe   : > { %7230 = vmatpush3.msra.mxu1 %v1290_v60  ;;  %7231 = vmatprep.mubr.f32.mxu1 %v6103_v61  ;;  %v1608_v60 = vld [vmem:[#allocation7 + $0x200] sm:$0xff]  ;;  %v6124_v61 = vld [vmem:[%s8789_s4 + $0xbc] sm:$0xff] }
  0xbf   : > { %7232 = vmatmul.mubr.f32.vlgmr.msra.gmra.mxu1 %v6104_v62  ;;  %7276 = vmatprep.subr.mxu0 %v1620_v63  ;;  %v1931_v62 = vld [vmem:[#allocation7 + $0x2a8] sm:$0xff] }
  0xc0   : > { %7169 = vmatprep.mubr.f32.mxu0 %v6083_v0  ;;  %7277 = vmatpush3.msra.mxu0 %v1620_v63  ;;  %v6129_v63 = vld [vmem:[%s8789_s4 + $0x15] sm:$0xff]  ;;  %v6130_v0 = vld [vmem:[%s8789_s4 + $0x1d] sm:$0xff] }
  0xc1   : > { %7170 = vmatmul.mubr.f32.gmra.mxu0 %v6084_v1  ;;  %7234 = vmatprep.mubr.f32.mxu1 %v6105_v2  ;;  %v1930_v1 = vld [vmem:[#allocation7 + $0x2a0] sm:$0xff]  ;;  %v2259_v2 = vld [vmem:[#allocation7 + $0x378] sm:$0xff] }
  0xc2   : > { %7278 = vmatprep.subr.mxu0 %v1619_v3  ;;  %7172 = vmatprep.mubr.f32.mxu0 %v6085_v4  ;;  %v6126_v4 = vld [vmem:[%s8789_s4 + $0xcc] sm:$0xff] }
  0xc3   : > { %7235 = vmatmul.mubr.f32.gmra.mxu1 %v6106_v5  ;;  %7279 = vmatpush3.msra.mxu0 %v1619_v3  ;;  %v6125_v3 = vld [vmem:[%s8789_s4 + $0xc4] sm:$0xff] }
  0xc4   : > { %7237 = vmatprep.mubr.f32.mxu1 %v6107_v6  ;;  %7280 = vmatprep.subr.mxu0 %v1618_v7  ;;  %v1929_v5 = vld [vmem:[#allocation7 + $0x298] sm:$0xff] }
  0xc5   : > { %7173 = vmatmul.mubr.f32.gmra.mxu0 %v6086_v8  ;;  %7341 = vmatprep.subr.mxu1 %v1941_v9  ;;  %v6131_v6 = vld [vmem:[%s8789_s4 + $0x25] sm:$0xff] }
  0xc6   : > { %7281 = vmatpush3.msra.mxu0 %v1618_v7  ;;  %7175 = vmatprep.mubr.f32.mxu0 %v6087_v10  ;;  %v6132_v7 = vld [vmem:[%s8789_s4 + $0x2d] sm:$0xff]  ;;  %v1928_v8 = vld [vmem:[#allocation7 + $0x290] sm:$0xff] }
  0xc7   : > { %7238 = vmatmul.mubr.f32.gmra.mxu1 %v6108_v11  ;;  %7282 = vmatprep.subr.mxu0 %v1617_v12  ;;  %v6127_v10 = vld [vmem:[%s8789_s4 + $0xd4] sm:$0xff]  ;;  %v6128_v11 = vld [vmem:[%s8789_s4 + $0xdc] sm:$0xff] }
  0xc8   : > { %7240 = vmatprep.mubr.f32.mxu1 %v6109_v13  ;;  %7283 = vmatpush3.msra.mxu0 %v1617_v12  ;;  %v1927_v12 = vld [vmem:[#allocation7 + $0x288] sm:$0xff] }
  0xc9   : > { %7176 = vmatmul.mubr.f32.gmra.mxu0 %v6088_v14  ;;  %7284 = vmatprep.subr.mxu0 %v1616_v15  ;;  %v6133_v13 = vld [vmem:[%s8789_s4 + $0x35] sm:$0xff] }
  0xca   : > { %7178 = vmatprep.mubr.f32.mxu0 %v6089_v16  ;;  %7285 = vmatpush3.msra.mxu0 %v1616_v15  ;;  %v2257_v14 = vld [vmem:[#allocation7 + $0x368] sm:$0xff]  ;;  %v1926_v16 = vld [vmem:[#allocation7 + $0x280] sm:$0xff] }
  0xcb   : > { %7241 = vmatmul.mubr.f32.gmra.mxu1 %v6110_v17  ;;  %7286 = vmatprep.subr.mxu0 %v1615_v18  ;;  %v6134_v15 = vld [vmem:[%s8789_s4 + $0x3d] sm:$0xff] }
  0xcc   : > { %7243 = vmatprep.mubr.f32.mxu1 %v6111_v19  ;;  %7287 = vmatpush3.msra.mxu0 %v1615_v18  ;;  %v6155_v17 = vld [vmem:[%s8789_s4 + $0x16] sm:$0xff]  ;;  %v6156_v18 = vld [vmem:[%s8789_s4 + $0x1e] sm:$0xff] }
  0xcd   : > { %7179 = vmatmul.mubr.f32.gmra.mxu0 %v6090_v20  ;;  %7288 = vmatprep.subr.mxu0 %v1614_v21  ;;  %v2256_v19 = vld [vmem:[#allocation7 + $0x360] sm:$0xff]  ;;  %v6135_v20 = vld [vmem:[%s8789_s4 + $0x45] sm:$0xff] }
  0xce   : > { %7181 = vmatprep.mubr.f32.mxu0 %v6091_v22  ;;  %7289 = vmatpush3.msra.mxu0 %v1614_v21  ;;  %v6136_v21 = vld [vmem:[%s8789_s4 + $0x4d] sm:$0xff] }
  0xcf   : > { %7244 = vmatmul.mubr.f32.gmra.mxu1 %v6112_v23  ;;  %7290 = vmatprep.subr.mxu0 %v1613_v24  ;;  %v6157_v22 = vld [vmem:[%s8789_s4 + $0x26] sm:$0xff] }
  0xd0   : > { %7246 = vmatprep.mubr.f32.mxu1 %v6113_v25  ;;  %7342 = vmatpush3.msra.mxu1 %v1941_v9  ;;  %v2258_v9 = vld [vmem:[#allocation7 + $0x370] sm:$0xff]  ;;  %v2255_v23 = vld [vmem:[#allocation7 + $0x358] sm:$0xff] }
  0xd1   : > { %7182 = vmatmul.mubr.f32.gmra.mxu0 %v6092_v26  ;;  %7343 = vmatprep.subr.mxu1 %v1940_v27  ;;  %v6158_v25 = vld [vmem:[%s8789_s4 + $0x2e] sm:$0xff]  ;;  %v6159_v26 = vld [vmem:[%s8789_s4 + $0x36] sm:$0xff] }
  0xd2   : > { %7184 = vmatprep.mubr.f32.mxu0 %v6093_v28  ;;  %7344 = vmatpush3.msra.mxu1 %v1940_v27  ;;  %v2254_v27 = vld [vmem:[#allocation7 + $0x350] sm:$0xff] }
  0xd3   : > { %7247 = vmatmul.mubr.f32.gmra.mxu1 %v6114_v29  ;;  %7291 = vmatpush3.msra.mxu0 %v1613_v24  ;;  %v6137_v24 = vld [vmem:[%s8789_s4 + $0x55] sm:$0xff]  ;;  %v6138_v28 = vld [vmem:[%s8789_s4 + $0x5d] sm:$0xff]  ;;  %v2577_v29 = vld [vmem:[#allocation7 + $0x3f8] sm:$0xff] }
  0xd4   : > { %7249 = vmatprep.mubr.f32.mxu1 %v6115_v30  ;;  %7345 = vmatprep.subr.mxu1 %v1939_v31  ;;  %v6139_v30 = vld [vmem:[%s8789_s4 + $0x65] sm:$0xff] }
  0xd5   : > { %7185 = vmatmul.mubr.f32.gmra.mxu0 %v6094_v32  ;;  %7346 = vmatpush3.msra.mxu1 %v1939_v31  ;;  %v6160_v31 = vld [vmem:[%s8789_s4 + $0x3e] sm:$0xff] }
  0xd6   : > { %7187 = vmatprep.mubr.f32.mxu0 %v6095_v33  ;;  %7292 = vmatprep.subr.mxu0 %v1612_v34  ;;  %v2253_v32 = vld [vmem:[#allocation7 + $0x348] sm:$0xff]  ;;  %v6161_v33 = vld [vmem:[%s8789_s4 + $0x46] sm:$0xff] }
  0xd7   : > { %7250 = vmatmul.mubr.f32.gmra.mxu1 %v6116_v35  ;;  %7347 = vmatprep.subr.mxu1 %v1938_v36  ;;  %v2252_v35 = vld [vmem:[#allocation7 + $0x340] sm:$0xff] }
  0xd8   : > { %7252 = vmatprep.mubr.f32.mxu1 %v6117_v37  ;;  %7293 = vmatpush3.msra.mxu0 %v1612_v34  ;;  %v6140_v34 = vld [vmem:[%s8789_s4 + $0x6d] sm:$0xff] }
  0xd9   : > { %7188 = vmatmul.mubr.f32.gmra.mxu0 %v6096_v38  ;;  %7348 = vmatpush3.msra.mxu1 %v1938_v36  ;;  %v6141_v36 = vld [vmem:[%s8789_s4 + $0x75] sm:$0xff]  ;;  %v2251_v38 = vld [vmem:[#allocation7 + $0x338] sm:$0xff] }
  0xda   : > { %7349 = vmatprep.subr.mxu1 %v1937_v39  ;;  %7190 = vmatprep.mubr.f32.mxu0 %v6097_v40  ;;  %v6162_v37 = vld [vmem:[%s8789_s4 + $0x4e] sm:$0xff]  ;;  %v6142_v40 = vld [vmem:[%s8789_s4 + $0x7d] sm:$0xff] }
  0xdb   : > { %7253 = vmatmul.mubr.f32.gmra.mxu1 %v6118_v41  ;;  %7294 = vmatprep.subr.mxu0 %v1611_v42  ;;  %v2250_v41 = vld [vmem:[#allocation7 + $0x330] sm:$0xff] }
  0xdc   : > { %7350 = vmatpush3.msra.mxu1 %v1937_v39  ;;  %7295 = vmatpush3.msra.mxu0 %v1611_v42  ;;  %v6163_v39 = vld [vmem:[%s8789_s4 + $0x56] sm:$0xff]  ;;  %v6143_v42 = vld [vmem:[%s8789_s4 + $0x85] sm:$0xff] }
  0xdd   : > { %7191 = vmatmul.mubr.f32.gmra.mxu0 %v6098_v43  ;;  %7351 = vmatprep.subr.mxu1 %v1936_v44  ;;  %v6164_v43 = vld [vmem:[%s8789_s4 + $0x5e] sm:$0xff] }
  0xde   : > { %7255 = vmatprep.mubr.f32.mxu1 %v6119_v45  ;;  %7352 = vmatpush3.msra.mxu1 %v1936_v44  ;;  %v2249_v44 = vld [vmem:[#allocation7 + $0x328] sm:$0xff]  ;;  %v6165_v45 = vld [vmem:[%s8789_s4 + $0x66] sm:$0xff] }
  0xdf   : > { %7256 = vmatmul.mubr.f32.gmra.mxu1 %v6120_v46  ;;  %7353 = vmatprep.subr.mxu1 %v1935_v47  ;;  %v6144_v46 = vld [vmem:[%s8789_s4 + $0x8d] sm:$0xff] }
  0xe0   : > { %7193 = vmatprep.mubr.f32.mxu0 %v6099_v48  ;;  %7296 = vmatprep.subr.mxu0 %v1610_v49  ;;  %v6145_v48 = vld [vmem:[%s8789_s4 + $0x95] sm:$0xff] }
  0xe1   : > { %7354 = vmatpush3.msra.mxu1 %v1935_v47  ;;  %7194 = vmatmul.mubr.f32.gmra.mxu0 %v6100_v50  ;;  %v2576_v47 = vld [vmem:[#allocation7 + $0x3f0] sm:$0xff]  ;;  %v6167_v50 = vld [vmem:[%s8789_s4 + $0x76] sm:$0xff] }
  0xe2   : > { %7297 = vmatpush3.msra.mxu0 %v1610_v49  ;;  %7355 = vmatprep.subr.mxu1 %v1934_v51  ;;  %v6166_v49 = vld [vmem:[%s8789_s4 + $0x6e] sm:$0xff] }
  0xe3   : > { %7258 = vmatprep.mubr.f32.mxu1 %v6121_v52  ;;  %7356 = vmatpush3.msra.mxu1 %v1934_v51  ;;  %v2575_v51 = vld [vmem:[#allocation7 + $0x3e8] sm:$0xff] }
  0xe4   : > { %7259 = vmatmul.mubr.f32.gmra.mxu1 %v6122_v53  ;;  %7298 = vmatprep.subr.mxu0 %v1609_v54  ;;  %v6146_v52 = vld [vmem:[%s8789_s4 + $0x9d] sm:$0xff]  ;;  %v6147_v53 = vld [vmem:[%s8789_s4 + $0xa5] sm:$0xff] }
  0xe5   : > { %7357 = vmatprep.subr.mxu1 %v1933_v55  ;;  %7196 = vmatprep.mubr.f32.mxu0 %v6101_v56  ;;  %v2574_v56 = vld [vmem:[#allocation7 + $0x3e0] sm:$0xff] }
  0xe6   : > { %7299 = vmatpush3.msra.mxu0 %v1609_v54  ;;  %7358 = vmatpush3.msra.mxu1 %v1933_v55  ;;  %v2248_v54 = vld [vmem:[#allocation7 + $0x320] sm:$0xff]  ;;  %v6168_v55 = vld [vmem:[%s8789_s4 + $0x7e] sm:$0xff] }
  0xe7   : > { %7197 = vmatmul.mubr.f32.gmra.mxu0 %v6102_v57  ;;  %7359 = vmatprep.subr.mxu1 %v1932_v58  ;;  %v6169_v57 = vld [vmem:[%s8789_s4 + $0x86] sm:$0xff] }
  0xe8   : > { %7261 = vmatprep.mubr.f32.mxu1 %v6123_v59  ;;  %7300 = vmatprep.subr.mxu0 %v1608_v60  ;;  %v2573_v59 = vld [vmem:[#allocation7 + $0x3d8] sm:$0xff] }
  0xe9   : > { %7360 = vmatpush3.msra.mxu1 %v1932_v58  ;;  %7301 = vmatpush3.msra.mxu0 %v1608_v60  ;;  %v6148_v58 = vld [vmem:[%s8789_s4 + $0xad] sm:$0xff]  ;;  %v6149_v60 = vld [vmem:[%s8789_s4 + $0xb5] sm:$0xff] }
  0xea   : > { %7262 = vmatmul.mubr.f32.gmra.mxu1 %v6124_v61  ;;  %7361 = vmatprep.subr.mxu1 %v1931_v62  ;;  %v6170_v61 = vld [vmem:[%s8789_s4 + $0x8e] sm:$0xff] }
  0xeb   : > { %7302 = vmatprep.mubr.f32.mxu0 %v6129_v63  ;;  %7362 = vmatpush3.msra.mxu1 %v1931_v62  ;;  %v2247_v62 = vld [vmem:[#allocation7 + $0x318] sm:$0xff]  ;;  %v6150_v63 = vld [vmem:[%s8789_s4 + $0xbd] sm:$0xff] }
  0xec   : > { %7303 = vmatmul.mubr.f32.vlgmr.msra.gmra.mxu0 %v6130_v0  ;;  %7363 = vmatprep.subr.mxu1 %v1930_v1  ;;  %v2572_v0 = vld [vmem:[#allocation7 + $0x3d0] sm:$0xff] }
  0xed   : > { %7412 = vmatprep.subr.mxu0 %v2259_v2  ;;  %7264 = vmatprep.mubr.f32.mxu1 %v6125_v3  ;;  %v2571_v3 = vld [vmem:[#allocation7 + $0x3c8] sm:$0xff] }
  0xee   : > { %7364 = vmatpush3.msra.mxu1 %v1930_v1  ;;  %7413 = vmatpush3.msra.mxu0 %v2259_v2  ;;  %v6171_v1 = vld [vmem:[%s8789_s4 + $0x96] sm:$0xff]  ;;  %v6172_v2 = vld [vmem:[%s8789_s4 + $0x9e] sm:$0xff] }
  0xef   : > { %7265 = vmatmul.mubr.f32.gmra.mxu1 %v6126_v4  ;;  %7365 = vmatprep.subr.mxu1 %v1929_v5  ;;  %v6151_v4 = vld [vmem:[%s8789_s4 + $0xc5] sm:$0xff] }
  0xf0   : > { %7305 = vmatprep.mubr.f32.mxu0 %v6131_v6  ;;  %7366 = vmatpush3.msra.mxu1 %v1929_v5  ;;  %v2246_v5 = vld [vmem:[#allocation7 + $0x310] sm:$0xff]  ;;  %v6152_v6 = vld [vmem:[%s8789_s4 + $0xcd] sm:$0xff] }
  0xf1   : > { %7306 = vmatmul.mubr.f32.gmra.mxu0 %v6132_v7  ;;  %7367 = vmatprep.subr.mxu1 %v1928_v8  ;;  %v2570_v7 = vld [vmem:[#allocation7 + $0x3c0] sm:$0xff] }
  0xf2   : > { %7414 = vmatprep.subr.mxu0 %v2258_v9  ;;  %7267 = vmatprep.mubr.f32.mxu1 %v6127_v10  ;;  %v2245_v10 = vld [vmem:[#allocation7 + $0x308] sm:$0xff] }
  0xf3   : > { %7368 = vmatpush3.msra.mxu1 %v1928_v8  ;;  %7415 = vmatpush3.msra.mxu0 %v2258_v9  ;;  %v6173_v8 = vld [vmem:[%s8789_s4 + $0xa6] sm:$0xff]  ;;  %v6174_v9 = vld [vmem:[%s8789_s4 + $0xae] sm:$0xff] }
  0xf4   : > { %7268 = vmatmul.mubr.f32.gmra.mxu1 %v6128_v11  ;;  %7369 = vmatprep.subr.mxu1 %v1927_v12  ;;  %v2569_v11 = vld [vmem:[#allocation7 + $0x3b8] sm:$0xff] }
  0xf5   : > { %7308 = vmatprep.mubr.f32.mxu0 %v6133_v13  ;;  %7370 = vmatpush3.msra.mxu1 %v1927_v12  ;;  %v6153_v12 = vld [vmem:[%s8789_s4 + $0xd5] sm:$0xff]  ;;  %v6154_v13 = vld [vmem:[%s8789_s4 + $0xdd] sm:$0xff] }
  0xf6   : > { %7416 = vmatprep.subr.mxu0 %v2257_v14  ;;  %7309 = vmatmul.mubr.f32.gmra.mxu0 %v6134_v15  ;;  %v6175_v15 = vld [vmem:[%s8789_s4 + $0xb6] sm:$0xff] }
  0xf7   : > { %7371 = vmatprep.subr.mxu1 %v1926_v16  ;;  %7417 = vmatpush3.msra.mxu0 %v2257_v14  ;;  %v2568_v14 = vld [vmem:[#allocation7 + $0x3b0] sm:$0xff] }
  0xf8   : > { %7372 = vmatpush3.msra.mxu1 %v1926_v16  ;;  %7373 = vmatprep.mubr.f32.mxu1 %v6155_v17  ;;  %v2244_v16 = vld [vmem:[#allocation7 + $0x300] sm:$0xff]  ;;  %v6176_v17 = vld [vmem:[%s8789_s4 + $0xbe] sm:$0xff] }
  0xf9   : > { %7374 = vmatmul.mubr.f32.vlgmr.msra.gmra.mxu1 %v6156_v18  ;;  %7418 = vmatprep.subr.mxu0 %v2256_v19  ;;  %v2567_v18 = vld [vmem:[#allocation7 + $0x3a8] sm:$0xff] }
  0xfa   : > { %7311 = vmatprep.mubr.f32.mxu0 %v6135_v20  ;;  %7419 = vmatpush3.msra.mxu0 %v2256_v19  ;;  %v6181_v19 = vld [vmem:[%s8789_s4 + $0x28] sm:$0xff]  ;;  %v6182_v20 = vld [vmem:[%s8789_s4 + $0x30] sm:$0xff] }
  0xfb   : > { %7312 = vmatmul.mubr.f32.gmra.mxu0 %v6136_v21  ;;  %7376 = vmatprep.mubr.f32.mxu1 %v6157_v22  ;;  %v2566_v21 = vld [vmem:[#allocation7 + $0x3a0] sm:$0xff]  ;;  %v2895_v22 = vld [vmem:[#allocation7 + $0x478] sm:$0xff] }
  0xfc   : > { %7420 = vmatprep.subr.mxu0 %v2255_v23  ;;  %7314 = vmatprep.mubr.f32.mxu0 %v6137_v24  ;;  %v6178_v24 = vld [vmem:[%s8789_s4 + $0xce] sm:$0xff] }
  0xfd   : > { %7377 = vmatmul.mubr.f32.gmra.mxu1 %v6158_v25  ;;  %7421 = vmatpush3.msra.mxu0 %v2255_v23  ;;  %v6177_v23 = vld [vmem:[%s8789_s4 + $0xc6] sm:$0xff] }
  0xfe   : > { %7379 = vmatprep.mubr.f32.mxu1 %v6159_v26  ;;  %7422 = vmatprep.subr.mxu0 %v2254_v27  ;;  %v2565_v25 = vld [vmem:[#allocation7 + $0x398] sm:$0xff]  ;;  %v6183_v26 = vld [vmem:[%s8789_s4 + $0x38] sm:$0xff] }
  0xff   : > { %7315 = vmatmul.mubr.f32.gmra.mxu0 %v6138_v28  ;;  %7483 = vmatprep.subr.mxu1 %v2577_v29  ;;  %v2564_v28 = vld [vmem:[#allocation7 + $0x390] sm:$0xff] }
 0x100   : > { %7423 = vmatpush3.msra.mxu0 %v2254_v27  ;;  %7317 = vmatprep.mubr.f32.mxu0 %v6139_v30  ;;  %v6184_v27 = vld [vmem:[%s8789_s4 + $0x40] sm:$0xff]  ;;  %v6179_v30 = vld [vmem:[%s8789_s4 + $0xd6] sm:$0xff] }
 0x101   : > { %7380 = vmatmul.mubr.f32.gmra.mxu1 %v6160_v31  ;;  %7424 = vmatprep.subr.mxu0 %v2253_v32  ;;  %v6180_v31 = vld [vmem:[%s8789_s4 + $0xde] sm:$0xff] }
 0x102   : > { %7382 = vmatprep.mubr.f32.mxu1 %v6161_v33  ;;  %7425 = vmatpush3.msra.mxu0 %v2253_v32  ;;  %v2563_v32 = vld [vmem:[#allocation7 + $0x388] sm:$0xff]  ;;  %v6185_v33 = vld [vmem:[%s8789_s4 + $0x48] sm:$0xff] }
 0x103   : > { %7318 = vmatmul.mubr.f32.gmra.mxu0 %v6140_v34  ;;  %7426 = vmatprep.subr.mxu0 %v2252_v35  ;;  %v2893_v34 = vld [vmem:[#allocation7 + $0x468] sm:$0xff] }
 0x104   : > { %7320 = vmatprep.mubr.f32.mxu0 %v6141_v36  ;;  %7427 = vmatpush3.msra.mxu0 %v2252_v35  ;;  %v6186_v35 = vld [vmem:[%s8789_s4 + $0x50] sm:$0xff] }
 0x105   : > { %7383 = vmatmul.mubr.f32.gmra.mxu1 %v6162_v37  ;;  %7428 = vmatprep.subr.mxu0 %v2251_v38  ;;  %v2562_v36 = vld [vmem:[#allocation7 + $0x380] sm:$0xff] }
 0x106   : > { %7385 = vmatprep.mubr.f32.mxu1 %v6163_v39  ;;  %7429 = vmatpush3.msra.mxu0 %v2251_v38  ;;  %v6207_v37 = vld [vmem:[%s8789_s4 + $0x29] sm:$0xff]  ;;  %v6208_v38 = vld [vmem:[%s8789_s4 + $0x31] sm:$0xff] }
 0x107   : > { %7321 = vmatmul.mubr.f32.gmra.mxu0 %v6142_v40  ;;  %7430 = vmatprep.subr.mxu0 %v2250_v41  ;;  %v2892_v39 = vld [vmem:[#allocation7 + $0x460] sm:$0xff]  ;;  %v6187_v40 = vld [vmem:[%s8789_s4 + $0x58] sm:$0xff] }
 0x108   : > { %7323 = vmatprep.mubr.f32.mxu0 %v6143_v42  ;;  %7431 = vmatpush3.msra.mxu0 %v2250_v41  ;;  %v6188_v41 = vld [vmem:[%s8789_s4 + $0x60] sm:$0xff] }
 0x109   : > { %7386 = vmatmul.mubr.f32.gmra.mxu1 %v6164_v43  ;;  %7432 = vmatprep.subr.mxu0 %v2249_v44  ;;  %v6209_v42 = vld [vmem:[%s8789_s4 + $0x39] sm:$0xff]  ;;  %v2891_v43 = vld [vmem:[#allocation7 + $0x458] sm:$0xff] }
 0x10a   : > { %7388 = vmatprep.mubr.f32.mxu1 %v6165_v45  ;;  %7484 = vmatpush3.msra.mxu1 %v2577_v29  ;;  %v2894_v29 = vld [vmem:[#allocation7 + $0x470] sm:$0xff] }
 0x10b   : > { %7324 = vmatmul.mubr.f32.gmra.mxu0 %v6144_v46  ;;  %7485 = vmatprep.subr.mxu1 %v2576_v47  ;;  %v6210_v45 = vld [vmem:[%s8789_s4 + $0x41] sm:$0xff]  ;;  %v6211_v46 = vld [vmem:[%s8789_s4 + $0x49] sm:$0xff] }
 0x10c   : > { %7326 = vmatprep.mubr.f32.mxu0 %v6145_v48  ;;  %7486 = vmatpush3.msra.mxu1 %v2576_v47  ;;  %v2890_v47 = vld [vmem:[#allocation7 + $0x450] sm:$0xff]  ;;  %v6190_v48 = vld [vmem:[%s8789_s4 + $0x70] sm:$0xff] }
 0x10d   : > { %7389 = vmatmul.mubr.f32.gmra.mxu1 %v6166_v49  ;;  %7433 = vmatpush3.msra.mxu0 %v2249_v44  ;;  %v6189_v44 = vld [vmem:[%s8789_s4 + $0x68] sm:$0xff]  ;;  %v6191_v49 = vld [vmem:[%s8789_s4 + $0x78] sm:$0xff] }
 0x10e   : > { %7391 = vmatprep.mubr.f32.mxu1 %v6167_v50  ;;  %7487 = vmatprep.subr.mxu1 %v2575_v51  ;;  %v6212_v50 = vld [vmem:[%s8789_s4 + $0x51] sm:$0xff] }
 0x10f   : > { %7327 = vmatmul.mubr.f32.gmra.mxu0 %v6146_v52  ;;  %7488 = vmatpush3.msra.mxu1 %v2575_v51  ;;  %v2889_v51 = vld [vmem:[#allocation7 + $0x448] sm:$0xff] }
 0x110   : > { %7329 = vmatprep.mubr.f32.mxu0 %v6147_v53  ;;  %7434 = vmatprep.subr.mxu0 %v2248_v54  ;;  %v6213_v52 = vld [vmem:[%s8789_s4 + $0x59] sm:$0xff]  ;;  %v8565_v53 = vmov 0  }
 0x111   : > { %7392 = vmatmul.mubr.f32.gmra.mxu1 %v6168_v55  ;;  %7489 = vmatprep.subr.mxu1 %v2574_v56  ;;  %v2888_v55 = vld [vmem:[#allocation7 + $0x440] sm:$0xff] }
 0x112   : > { %7394 = vmatprep.mubr.f32.mxu1 %v6169_v57  ;;  %7435 = vmatpush3.msra.mxu0 %v2248_v54  ;;  %v6192_v54 = vld [vmem:[%s8789_s4 + $0x80] sm:$0xff] }
 0x113   : > { %7330 = vmatmul.mubr.f32.gmra.mxu0 %v6148_v58  ;;  %7490 = vmatpush3.msra.mxu1 %v2574_v56  ;;  %v6193_v56 = vld [vmem:[%s8789_s4 + $0x88] sm:$0xff] }
 0x114   : > { %7491 = vmatprep.subr.mxu1 %v2573_v59  ;;  %7332 = vmatprep.mubr.f32.mxu0 %v6149_v60  ;;  %v6214_v57 = vld [vmem:[%s8789_s4 + $0x61] sm:$0xff]  ;;  %v6194_v60 = vld [vmem:[%s8789_s4 + $0x90] sm:$0xff] }
 0x115   : > { %7395 = vmatmul.mubr.f32.gmra.mxu1 %v6170_v61  ;;  %7436 = vmatprep.subr.mxu0 %v2247_v62  ;;  %v2887_v58 = vld [vmem:[#allocation7 + $0x438] sm:$0xff]  ;;  %v2886_v61 = vld [vmem:[#allocation7 + $0x430] sm:$0xff] }
 0x116   : > { %7492 = vmatpush3.msra.mxu1 %v2573_v59  ;;  %7437 = vmatpush3.msra.mxu0 %v2247_v62  ;;  %v6215_v59 = vld [vmem:[%s8789_s4 + $0x69] sm:$0xff] }
 0x117   : > { %7333 = vmatmul.mubr.f32.gmra.mxu0 %v6150_v63  ;;  %7493 = vmatprep.subr.mxu1 %v2572_v0  ;;  %v6195_v63 = vld [vmem:[%s8789_s4 + $0x98] sm:$0xff] }
 0x118   : > { %7397 = vmatprep.mubr.f32.mxu1 %v6171_v1  ;;  %7494 = vmatpush3.msra.mxu1 %v2572_v0  ;;  %v6216_v0 = vld [vmem:[%s8789_s4 + $0x71] sm:$0xff] }
 0x119   : > { %7398 = vmatmul.mubr.f32.gmra.mxu1 %v6172_v2  ;;  %7495 = vmatprep.subr.mxu1 %v2571_v3  ;;  %v2885_v1 = vld [vmem:[#allocation7 + $0x428] sm:$0xff] }
 0x11a   : > { %7335 = vmatprep.mubr.f32.mxu0 %v6151_v4  ;;  %7438 = vmatprep.subr.mxu0 %v2246_v5  ;;  %v6196_v4 = vld [vmem:[%s8789_s4 + $0xa0] sm:$0xff] }
 0x11b   : > { %7496 = vmatpush3.msra.mxu1 %v2571_v3  ;;  %7336 = vmatmul.mubr.f32.gmra.mxu0 %v6152_v6  ;;  %v6217_v3 = vld [vmem:[%s8789_s4 + $0x79] sm:$0xff] }
 0x11c   : > { %7439 = vmatpush3.msra.mxu0 %v2246_v5  ;;  %7497 = vmatprep.subr.mxu1 %v2570_v7  ;;  %v2884_v5 = vld [vmem:[#allocation7 + $0x420] sm:$0xff] }
 0x11d   : > { %7400 = vmatprep.mubr.f32.mxu1 %v6173_v8  ;;  %7498 = vmatpush3.msra.mxu1 %v2570_v7  ;;  %v6197_v7 = vld [vmem:[%s8789_s4 + $0xa8] sm:$0xff] }
 0x11e   : > { %7401 = vmatmul.mubr.f32.gmra.mxu1 %v6174_v9  ;;  %7440 = vmatprep.subr.mxu0 %v2245_v10  ;;  %v6218_v8 = vld [vmem:[%s8789_s4 + $0x81] sm:$0xff] }
 0x11f   : > { %7499 = vmatprep.subr.mxu1 %v2569_v11  ;;  %7338 = vmatprep.mubr.f32.mxu0 %v6153_v12  ;;  %v2883_v9 = vld [vmem:[#allocation7 + $0x418] sm:$0xff] }
 0x120   : > { %7441 = vmatpush3.msra.mxu0 %v2245_v10  ;;  %7500 = vmatpush3.msra.mxu1 %v2569_v11  ;;  %v6219_v12 = vld [vmem:[%s8789_s4 + $0x89] sm:$0xff] }
 0x121   : > { %7339 = vmatmul.mubr.f32.gmra.mxu0 %v6154_v13  ;;  %7501 = vmatprep.subr.mxu1 %v2568_v14 }
 0x122   : > { %7403 = vmatprep.mubr.f32.mxu1 %v6175_v15  ;;  %7442 = vmatprep.subr.mxu0 %v2244_v16  ;;  %v2882_v15 = vld [vmem:[#allocation7 + $0x410] sm:$0xff] }
 0x123   : > { %7502 = vmatpush3.msra.mxu1 %v2568_v14  ;;  %7443 = vmatpush3.msra.mxu0 %v2244_v16  ;;  %v6198_v14 = vld [vmem:[%s8789_s4 + $0xb0] sm:$0xff] }
 0x124   : > { %7404 = vmatmul.mubr.f32.gmra.mxu1 %v6176_v17  ;;  %7503 = vmatprep.subr.mxu1 %v2567_v18 }
 0x125   : > { %7444 = vmatprep.mubr.f32.mxu0 %v6181_v19  ;;  %7504 = vmatpush3.msra.mxu1 %v2567_v18  ;;  %v6199_v18 = vld [vmem:[%s8789_s4 + $0xb8] sm:$0xff] }
 0x126   : > { %7445 = vmatmul.mubr.f32.vlgmr.msra.gmra.mxu0 %v6182_v20  ;;  %7505 = vmatprep.subr.mxu1 %v2566_v21  ;;  %v6220_v19 = vld [vmem:[%s8789_s4 + $0x91] sm:$0xff] }
 0x127   : > { %7554 = vmatprep.subr.mxu0 %v2895_v22  ;;  %7406 = vmatprep.mubr.f32.mxu1 %v6177_v23  ;;  %v6221_v23 = vld [vmem:[%s8789_s4 + $0x99] sm:$0xff] }
 0x128   : > { %7506 = vmatpush3.msra.mxu1 %v2566_v21  ;;  %7555 = vmatpush3.msra.mxu0 %v2895_v22  ;;  %v2881_v21 = vld [vmem:[#allocation7 + $0x408] sm:$0xff] }
 0x129   : > { %7407 = vmatmul.mubr.f32.gmra.mxu1 %v6178_v24  ;;  %7507 = vmatprep.subr.mxu1 %v2565_v25 }
 0x12a   : > { %7447 = vmatprep.mubr.f32.mxu0 %v6183_v26  ;;  %7508 = vmatpush3.msra.mxu1 %v2565_v25  ;;  %v6200_v25 = vld [vmem:[%s8789_s4 + $0xc0] sm:$0xff] }
 0x12b   : > { %7448 = vmatmul.mubr.f32.gmra.mxu0 %v6184_v27  ;;  %7509 = vmatprep.subr.mxu1 %v2564_v28  ;;  %v2880_v27 = vld [vmem:[#allocation7 + $0x400] sm:$0xff] }
 0x12c   : > { %7556 = vmatprep.subr.mxu0 %v2894_v29  ;;  %7409 = vmatprep.mubr.f32.mxu1 %v6179_v30  ;;  %v6222_v30 = vld [vmem:[%s8789_s4 + $0xa1] sm:$0xff] }
 0x12d   : > { %7510 = vmatpush3.msra.mxu1 %v2564_v28  ;;  %7557 = vmatpush3.msra.mxu0 %v2894_v29  ;;  %v6201_v29 = vld [vmem:[%s8789_s4 + $0xc8] sm:$0xff] }
 0x12e   : > { %7410 = vmatmul.mubr.f32.gmra.mxu1 %v6180_v31  ;;  %7511 = vmatprep.subr.mxu1 %v2563_v32 }
 0x12f   : > { %7450 = vmatprep.mubr.f32.mxu0 %v6185_v33  ;;  %7512 = vmatpush3.msra.mxu1 %v2563_v32  ;;  %v3228_v33 = vld [vmem:[%s9004_s24] sm:$0xff] }
 0x130   : > { %7558 = vmatprep.subr.mxu0 %v2893_v34  ;;  %7451 = vmatmul.mubr.f32.gmra.mxu0 %v6186_v35 }
 0x131   : > { %7513 = vmatprep.subr.mxu1 %v2562_v36  ;;  %7559 = vmatpush3.msra.mxu0 %v2893_v34  ;;  %v6223_v34 = vld [vmem:[%s8789_s4 + $0xa9] sm:$0xff] }
 0x132   : > { %7514 = vmatpush3.msra.mxu1 %v2562_v36  ;;  %7515 = vmatprep.mubr.f32.mxu1 %v6207_v37  ;;  %v6202_v36 = vld [vmem:[%s8789_s4 + $0xd0] sm:$0xff] }
 0x133   : > { %7516 = vmatmul.mubr.f32.vlgmr.msra.gmra.mxu1 %v6208_v38  ;;  %7560 = vmatprep.subr.mxu0 %v2892_v39 }
 0x134   : > { %7453 = vmatprep.mubr.f32.mxu0 %v6187_v40  ;;  %7561 = vmatpush3.msra.mxu0 %v2892_v39  ;;  %v3230_v39 = vld [vmem:[%s9004_s24 + $0x10] sm:$0xff]  ;;  %v6203_v40 = vld [vmem:[%s8789_s4 + $0xd8] sm:$0xff] }
 0x135   : > { %7454 = vmatmul.mubr.f32.gmra.mxu0 %v6188_v41  ;;  %7518 = vmatprep.mubr.f32.mxu1 %v6209_v42  ;;  %v6224_v41 = vld [vmem:[%s8789_s4 + $0xb1] sm:$0xff] }
 0x136   : > { %7562 = vmatprep.subr.mxu0 %v2891_v43  ;;  %7456 = vmatprep.mubr.f32.mxu0 %v6189_v44  ;;  %v3229_v44 = vld [vmem:[%s9004_s24 + $0x8] sm:$0xff] }
 0x137   : > { %7519 = vmatmul.mubr.f32.gmra.mxu1 %v6210_v45  ;;  %7563 = vmatpush3.msra.mxu0 %v2891_v43  ;;  %v6225_v45 = vld [vmem:[%s8789_s4 + $0xb9] sm:$0xff] }
 0x138   : > { %7521 = vmatprep.mubr.f32.mxu1 %v6211_v46  ;;  %7564 = vmatprep.subr.mxu0 %v2890_v47 }
 0x139   : > { %7457 = vmatmul.mubr.f32.gmra.mxu0 %v6190_v48  ;;  %8349 = vset.pattern.permute.xlu0 %v8565_v53 }
 0x13a   : > { %7565 = vmatpush3.msra.mxu0 %v2890_v47  ;;  %7459 = vmatprep.mubr.f32.mxu0 %v6191_v49  ;;  %v6204_v47 = vld [vmem:[%s8789_s4 + $0xe0] sm:$0xff] }
 0x13b   : > { %7522 = vmatmul.mubr.f32.gmra.mxu1 %v6212_v50  ;;  %7566 = vmatprep.subr.mxu0 %v2889_v51  ;;  %v3231_v50 = vld [vmem:[%s9004_s24 + $0x18] sm:$0xff] }
 0x13c   : > { %7524 = vmatprep.mubr.f32.mxu1 %v6213_v52  ;;  %7567 = vmatpush3.msra.mxu0 %v2889_v51  ;;  %v6205_v51 = vld [vmem:[%s8789_s4 + $0xe8] sm:$0xff] }
 0x13d   : > { %7460 = vmatmul.mubr.f32.gmra.mxu0 %v6192_v54  ;;  %7568 = vmatprep.subr.mxu0 %v2888_v55  ;;  %v6226_v52 = vld [vmem:[%s8789_s4 + $0xc1] sm:$0xff] }
 0x13e   : > { %7462 = vmatprep.mubr.f32.mxu0 %v6193_v56  ;;  %7569 = vmatpush3.msra.mxu0 %v2888_v55  ;;  %v7020_v62 = vpop.f32.mrf.mxu0  ;;  %v3232_v55 = vld [vmem:[%s9004_s24 + $0x20] sm:$0xff]  ;;  %v6227_v56 = vld [vmem:[%s8789_s4 + $0xc9] sm:$0xff] }
 0x13f   : > { %7525 = vmatmul.mubr.f32.gmra.mxu1 %v6214_v57  ;;  %7570 = vmatprep.subr.mxu0 %v2887_v58 }
 0x140   : > { %7527 = vmatprep.mubr.f32.mxu1 %v6215_v59  ;;  %7571 = vmatpush3.msra.mxu0 %v2887_v58  ;;  %v8974_v2 = vpop.f32.mrf.mxu0  ;;  %v6206_v58 = vld [vmem:[%s8789_s4 + $0xf0] sm:$0xff] }
 0x141   : > { %7463 = vmatmul.mubr.f32.gmra.mxu0 %v6194_v60  ;;  %7572 = vmatprep.subr.mxu0 %v2886_v61 }
 0x142   : > { %7465 = vmatprep.mubr.f32.mxu0 %v6195_v63  ;;  %7573 = vmatpush3.msra.mxu0 %v2886_v61  ;;  %v7023_v6 = vpop.f32.mrf.mxu0  ;;  %v3233_v61 = vld [vmem:[%s9004_s24 + $0x28] sm:$0xff]  ;;  %v6228_v63 = vld [vmem:[%s8789_s4 + $0xd1] sm:$0xff] }
 0x143   : > { %7528 = vmatmul.mubr.f32.gmra.mxu1 %v6216_v0  ;;  %7574 = vmatprep.subr.mxu0 %v2885_v1 }
 0x144   : > { %7530 = vmatprep.mubr.f32.mxu1 %v6217_v3  ;;  %7575 = vmatpush3.msra.mxu0 %v2885_v1  ;;  %v8985_v10 = vpop.f32.mrf.mxu0  ;;  %v7091_v11 = vpop.f32.mrf.mxu1  ;;  %v3234_v3 = vld [vmem:[%s9004_s24 + $0x30] sm:$0xff] }
 0x145   : > { %7466 = vmatmul.mubr.f32.gmra.mxu0 %v6196_v4  ;;  %7576 = vmatprep.subr.mxu0 %v2884_v5  ;;  %v8988_v13 = vadd.f32 %v7091_v11, %v7020_v62  ;;  %v6233_v62 = vld [vmem:[%s8789_s4 + $0x2a] sm:$0xff]  ;;  %v6229_v4 = vld [vmem:[%s8789_s4 + $0xd9] sm:$0xff] }
 0x146   : > { %7468 = vmatprep.mubr.f32.mxu0 %v6197_v7  ;;  %7577 = vmatpush3.msra.mxu0 %v2884_v5  ;;  %v7026_v16 = vpop.f32.mrf.mxu0  ;;  %v8992_v17 = vpop.f32.mrf.mxu1  ;;  %v6235_v11 = vld [vmem:[%s8789_s4 + $0x3a] sm:$0xff] }
 0x147   : > { %7531 = vmatmul.mubr.f32.gmra.mxu1 %v6218_v8  ;;  %7578 = vmatprep.subr.mxu0 %v2883_v9 }
 0x148   : > { %7533 = vmatprep.mubr.f32.mxu1 %v6219_v12  ;;  %7579 = vmatpush3.msra.mxu0 %v2883_v9  ;;  %v8996_v20 = vpop.f32.mrf.mxu0  ;;  %v7094_v22 = vpop.f32.mrf.mxu1  ;;  %v3235_v9 = vld [vmem:[%s9004_s24 + $0x38] sm:$0xff]  ;;  %v6230_v12 = vld [vmem:[%s8789_s4 + $0xe1] sm:$0xff] }
 0x149   : > { %7469 = vmatmul.mubr.f32.gmra.mxu0 %v6198_v14  ;;  %7580 = vmatprep.subr.mxu0 %v2882_v15  ;;  %v8999_v24 = vadd.f32 %v7094_v22, %v7023_v6  ;;  %v6234_v6 = vld [vmem:[%s8789_s4 + $0x32] sm:$0xff] }
 0x14a   : > { %7471 = vmatprep.mubr.f32.mxu0 %v6199_v18  ;;  %7581 = vmatpush3.msra.mxu0 %v2882_v15  ;;  %v7029_v26 = vpop.f32.mrf.mxu0  ;;  %v9007_v28 = vpop.f32.mrf.mxu1  ;;  %v6231_v18 = vld [vmem:[%s8789_s4 + $0xe9] sm:$0xff] }
 0x14b   : > { %7534 = vmatmul.mubr.f32.gmra.mxu1 %v6220_v19  ;;  %7582 = vmatprep.subr.mxu0 %v2881_v21 }
 0x14c   : > { %7536 = vmatprep.mubr.f32.mxu1 %v6221_v23  ;;  %7583 = vmatpush3.msra.mxu0 %v2881_v21  ;;  %v9011_v31 = vpop.f32.mrf.mxu0  ;;  %v7097_v32 = vpop.f32.mrf.mxu1  ;;  %v6236_v21 = vld [vmem:[%s8789_s4 + $0x42] sm:$0xff] }
 0x14d   : > { %7472 = vmatmul.mubr.f32.gmra.mxu0 %v6200_v25  ;;  %7584 = vmatprep.subr.mxu0 %v2880_v27  ;;  %v9015_v35 = vadd.f32 %v7097_v32, %v7026_v16  ;;  %v3236_v16 = vld [vmem:[%s9004_s24 + $0x40] sm:$0xff]  ;;  %v3237_v25 = vld [vmem:[%s9004_s24 + $0x48] sm:$0xff]  ;;  %v3238_v32 = vld [vmem:[%s9004_s24 + $0x50] sm:$0xff] }
 0x14e   : > { %7474 = vmatprep.mubr.f32.mxu0 %v6201_v29  ;;  %7585 = vmatpush3.msra.mxu0 %v2880_v27  ;;  %v7032_v37 = vpop.f32.mrf.mxu0  ;;  %v9018_v38 = vpop.f32.mrf.mxu1  ;;  %v6232_v27 = vld [vmem:[%s8789_s4 + $0xf1] sm:$0xff] }
 0x14f   : > { %7537 = vmatmul.mubr.f32.gmra.mxu1 %v6222_v30  ;;  %3256 = vperm.xlu0 %8349, %v3228_v33  }
 0x150   : > { %7539 = vmatprep.mubr.f32.mxu1 %v6223_v34  ;;  %v9023_v42 = vpop.f32.mrf.mxu0  ;;  %v7100_v43 = vpop.f32.mrf.mxu1  ;;  %8350 = vset.pattern.permute.xlu1 %v8565_v53  ;;  %v6238_v34 = vld [vmem:[%s8789_s4 + $0x52] sm:$0xff] }
 0x151   : > { %7475 = vmatmul.mubr.f32.gmra.mxu0 %v6202_v36  ;;  %v9028_v46 = vadd.f32 %v7100_v43, %v7029_v26  ;;  %3266 = vperm.xlu1 %8350, %v3230_v39   ;;  %v6237_v26 = vld [vmem:[%s8789_s4 + $0x4a] sm:$0xff]  ;;  %v3239_v39 = vld [vmem:[%s9004_s24 + $0x58] sm:$0xff] }
 0x152   : > { %7477 = vmatprep.mubr.f32.mxu0 %v6203_v40  ;;  %v7035_v48 = vpop.f32.mrf.mxu0  ;;  %v9031_v49 = vpop.f32.mrf.mxu1  ;;  %v6239_v40 = vld [vmem:[%s8789_s4 + $0x5a] sm:$0xff] }
 0x153   : > { %7540 = vmatmul.mubr.f32.gmra.mxu1 %v6224_v41  ;;  %3261 = vperm.xlu0 %8349, %v3229_v44   ;;  %v3240_v44 = vld [vmem:[%s9004_s24 + $0x60] sm:$0xff] }
 0x154   : > { %7542 = vmatprep.mubr.f32.mxu1 %v6225_v45  ;;  %v9036_v53 = vpop.f32.mrf.mxu0  ;;  %v7103_v54 = vpop.f32.mrf.mxu1 }
 0x155   : > { %7478 = vmatmul.mubr.f32.gmra.mxu0 %v6204_v47  ;;  %v9040_v57 = vadd.f32 %v7103_v54, %v7032_v37  ;;  %3271 = vperm.xlu1 %8350, %v3231_v50   ;;  %v6240_v47 = vld [vmem:[%s8789_s4 + $0x62] sm:$0xff] }
 0x156   : > { %7480 = vmatprep.mubr.f32.mxu0 %v6205_v51  ;;  %v7038_v59 = vpop.f32.mrf.mxu0  ;;  %v9043_v60 = vpop.f32.mrf.mxu1  ;;  %v3241_v51 = vld [vmem:[%s9004_s24 + $0x68] sm:$0xff] }
 0x157   : > { %7543 = vmatmul.mubr.f32.gmra.mxu1 %v6226_v52  ;;  %3276 = vperm.xlu0 %8349, %v3232_v55   ;;  %v6241_v52 = vld [vmem:[%s8789_s4 + $0x6a] sm:$0xff] }
 0x158   : > { %7545 = vmatprep.mubr.f32.mxu1 %v6227_v56  ;;  %v9048_v0 = vpop.f32.mrf.mxu0  ;;  %v7106_v1 = vpop.f32.mrf.mxu1  ;;  %v3242_v56 = vld [vmem:[%s9004_s24 + $0x70] sm:$0xff] }
 0x159   : > { %7481 = vmatmul.mubr.f32.gmra.mxu0 %v6206_v58  ;;  %v9052_v5 = vadd.f32 %v7106_v1, %v7035_v48  ;;  %3281 = vperm.xlu1 %8350, %v3233_v61   ;;  %v6243_v1 = vld [vmem:[%s8789_s4 + $0x7a] sm:$0xff] }
 0x15a   : > { %7586 = vmatprep.mubr.f32.mxu0 %v6233_v62  ;;  %v7041_v7 = vpop.f32.mrf.mxu0  ;;  %v9055_v8 = vpop.f32.mrf.mxu1 }
 0x15b   : > { %7546 = vmatmul.mubr.f32.gmra.mxu1 %v6228_v63  ;;  %3286 = vperm.xlu0 %8349, %v3234_v3   ;;  %v3243_v63 = vld [vmem:[%s9004_s24 + $0x78] sm:$0xff] }
 0x15c   : > { %7548 = vmatprep.mubr.f32.mxu1 %v6229_v4  ;;  %v9060_v14 = vpop.f32.mrf.mxu0  ;;  %v7109_v15 = vpop.f32.mrf.mxu1  ;;  %v3244_v4 = vld [vmem:[%s9004_s24 + $0x80] sm:$0xff] }
 0x15d   : > { %7587 = vmatmul.mubr.f32.vlgmr.msra.gmra.mxu0 %v6234_v6  ;;  %v9064_v19 = vadd.f32 %v7109_v15, %v7038_v59  ;;  %3291 = vperm.xlu1 %8350, %v3235_v9   ;;  %v6242_v59 = vld [vmem:[%s8789_s4 + $0x72] sm:$0xff]  ;;  %v6244_v6 = vld [vmem:[%s8789_s4 + $0x82] sm:$0xff] }
 0x15e   : > { %7589 = vmatprep.mubr.f32.mxu0 %v6235_v11  ;;  %v7044_v22 = vpop.f32.mrf.mxu0  ;;  %v9067_v23 = vpop.f32.mrf.mxu1  ;;  %v3245_v11 = vld [vmem:[%s9004_s24 + $0x88] sm:$0xff] }
 0x15f   : > { %7549 = vmatmul.mubr.f32.gmra.mxu1 %v6230_v12  ;;  %3296 = vperm.xlu0 %8349, %v3236_v16   ;;  %v6245_v12 = vld [vmem:[%s8789_s4 + $0x8a] sm:$0xff] }
 0x160   : > { %7551 = vmatprep.mubr.f32.mxu1 %v6231_v18  ;;  %v9072_v29 = vpop.f32.mrf.mxu0  ;;  %v7112_v30 = vpop.f32.mrf.mxu1 }
 0x161   : > { %7590 = vmatmul.mubr.f32.gmra.mxu0 %v6236_v21  ;;  %v9075_v33 = vadd.f32 %v7112_v30, %v7041_v7  ;;  %3301 = vperm.xlu1 %8350, %v3237_v25   ;;  %v3246_v21 = vld [vmem:[%s9004_s24 + $0x90] sm:$0xff] }
 0x162   : > { %7592 = vmatprep.mubr.f32.mxu0 %v6237_v26  ;;  %v7047_v36 = vpop.f32.mrf.mxu0  ;;  %v9078_v37 = vpop.f32.mrf.mxu1  ;;  %v3247_v26 = vld [vmem:[%s9004_s24 + $0x98] sm:$0xff] }
 0x163   : > { %7552 = vmatmul.mubr.f32.gmra.mxu1 %v6232_v27  ;;  %3306 = vperm.xlu0 %8349, %v3238_v32   ;;  %v6247_v27 = vld [vmem:[%s8789_s4 + $0x9a] sm:$0xff] }
 0x164   : > { %v9082_v41 = vpop.f32.mrf.mxu0  ;;  %v7115_v43 = vpop.f32.mrf.mxu1 }
 0x165   : > { %7593 = vmatmul.mubr.f32.gmra.mxu0 %v6238_v34  ;;  %v9085_v45 = vadd.f32 %v7115_v43, %v7044_v22  ;;  %3311 = vperm.xlu1 %8350, %v3239_v39   ;;  %v6246_v22 = vld [vmem:[%s8789_s4 + $0x92] sm:$0xff]  ;;  %v3248_v39 = vld [vmem:[%s9004_s24 + $0xa0] sm:$0xff] }
 0x166   : > { %7595 = vmatprep.mubr.f32.mxu0 %v6239_v40  ;;  %v7050_v48 = vpop.f32.mrf.mxu0  ;;  %v9088_v50 = vpop.f32.mrf.mxu1  ;;  %v6248_v43 = vld [vmem:[%s8789_s4 + $0xa2] sm:$0xff] }
 0x167   : > { %3316 = vperm.xlu0 %8349, %v3240_v44   ;;  %v3249_v44 = vld [vmem:[%s9004_s24 + $0xa8] sm:$0xff] }
 0x168   : > { %v9092_v54 = vpop.f32.mrf.mxu0  ;;  %v7118_v55 = vpop.f32.mrf.mxu1 }
 0x169   : > { %7596 = vmatmul.mubr.f32.gmra.mxu0 %v6240_v47  ;;  %v9095_v58 = vadd.f32 %v7118_v55, %v7047_v36  ;;  %3321 = vperm.xlu1 %8350, %v3241_v51   ;;  %v6249_v47 = vld [vmem:[%s8789_s4 + $0xaa] sm:$0xff] }
 0x16a   : > { %7598 = vmatprep.mubr.f32.mxu0 %v6241_v52  ;;  %v7053_v61 = vpop.f32.mrf.mxu0  ;;  %v9098_v62 = vpop.f32.mrf.mxu1  ;;  %v3250_v52 = vld [vmem:[%s9004_s24 + $0xb0] sm:$0xff] }
 0x16b   : > { %3326 = vperm.xlu0 %8349, %v3242_v56  }
 0x16c   : > { %v9102_v3 = vpop.f32.mrf.mxu0 }
 0x16d   : > { %7599 = vmatmul.mubr.f32.gmra.mxu0 %v6242_v59  ;;  %3331 = vperm.xlu1 %8350, %v3243_v63   ;;  %v6250_v59 = vld [vmem:[%s8789_s4 + $0xb2] sm:$0xff]  ;;  %v6251_v63 = vld [vmem:[%s8789_s4 + $0xba] sm:$0xff] }
 0x16e   : > { %7601 = vmatprep.mubr.f32.mxu0 %v6243_v1  ;;  %v7056_v7 = vpop.f32.mrf.mxu0  ;;  %v7121_v9 = vpop.f32.mrf.mxu1 }
 0x16f   : > { %v9108_v15 = vadd.f32 %v7121_v9, %v7050_v48  ;;  %3336 = vperm.xlu0 %8349, %v3244_v4   ;;  %v3252_v4 = vld [vmem:[%s9004_s24 + $0xc0] sm:$0xff] }
 0x170   : > { %v9110_v16 = vpop.f32.mrf.mxu0  ;;  %v9112_v18 = vpop.f32.mrf.mxu1 }
 0x171   : > { %7602 = vmatmul.mubr.f32.gmra.mxu0 %v6244_v6  ;;  %3341 = vperm.xlu1 %8350, %v3245_v11   ;;  %v3253_v11 = vld [vmem:[%s9004_s24 + $0xc8] sm:$0xff] }
 0x172   : > { %7604 = vmatprep.mubr.f32.mxu0 %v6245_v12  ;;  %v7162_v25 = vpop.f32.mrf.mxu0  ;;  %v6253_v12 = vld [vmem:[%s8789_s4 + $0xca] sm:$0xff] }
 0x173   : > { %v7124_v30 = vpop.f32.mrf.mxu1  ;;  %v1184_v32 = vadd.f32 %v7162_v25, %v8988_v13  ;;  %3346 = vperm.xlu0 %8349, %v3246_v21  }
 0x174   : > { %v9119_v34 = vadd.f32 %v7124_v30, %v7053_v61  ;;  %v9121_v36 = vpop.f32.mrf.mxu0  ;;  %v3251_v61 = vld [vmem:[%s9004_s24 + $0xb8] sm:$0xff]  ;;  %s10771_s24 = sld [smem:[#allocation106_spill]] }
 0x175   : > { %7605 = vmatmul.mubr.f32.gmra.mxu0 %v6246_v22  ;;  %v9124_v40 = vpop.f32.mrf.mxu1  ;;  %3351 = vperm.xlu1 %8350, %v3247_v26   ;;  %v6255_v30 = vld [vmem:[%s8789_s4 + $0xda] sm:$0xff] }
 0x176   : > { %7607 = vmatprep.mubr.f32.mxu0 %v6247_v27 }
 0x177   : > { %v7165_v13 = vpop.f32.mrf.mxu0  ;;  %3356 = vperm.xlu0 %8349, %v3248_v39  }
 0x178   : > { %v7127_v48 = vpop.f32.mrf.mxu1  ;;  %v1186_v51 = vadd.f32 %v7165_v13, %v8999_v24  ;;  %v6256_v13 = vld [vmem:[%s8789_s4 + $0xe2] sm:$0xff] }
 0x179   : > { %7608 = vmatmul.mubr.f32.gmra.mxu0 %v6248_v43  ;;  %v9131_v55 = vadd.f32 %v7127_v48, %v7056_v7  ;;  %v9133_v56 = vpop.f32.mrf.mxu0  ;;  %3361 = vperm.xlu1 %8350, %v3249_v44   ;;  %v6252_v7 = vld [vmem:[%s8789_s4 + $0xc2] sm:$0xff] }
 0x17a   : > { %7610 = vmatprep.mubr.f32.mxu0 %v6249_v47  ;;  %v9139_v6 = vpop.f32.mrf.mxu1  ;;  %s10772_s1 = smov %s10771_s24  ;;  %s10467_s8 = scalar_lea.hbm %s10771_s24, %s6281_s28 }
 0x17b   : > { %3366 = vperm.xlu0 %8349, %v3250_v52   ;;  %v3471_v52 = vld [vmem:[#allocation9 + $0x78] sm:$0xff] }
 0x17c   : > { %v7168_v1 = vpop.f32.mrf.mxu0  ;;  %7625 = vmatprep.subr.mxu1 %v3471_v52 }
 0x17d   : > { %7611 = vmatmul.mubr.f32.gmra.mxu0 %v6250_v59  ;;  %v1188_v24 = vadd.f32 %v7168_v1, %v9015_v35  ;;  %3371 = vperm.xlu1 %8350, %v3251_v61   ;;  %v6254_v35 = vld [vmem:[%s8789_s4 + $0xd2] sm:$0xff]  ;;  %v6257_v59 = vld [vmem:[%s8789_s4 + $0xea] sm:$0xff] }
 0x17e   : > { %7613 = vmatprep.mubr.f32.mxu0 %v6251_v63  ;;  %v9143_v9 = vpop.f32.mrf.mxu0  ;;  %7626 = vmatpush3.msra.mxu1 %v3471_v52 }
 0x17f   : > { %v7233_v21 = vpop.f32.mrf.mxu1  ;;  %3376 = vperm.xlu0 %8349, %v3252_v4   ;;  %v6258_v4 = vld [vmem:[%s8789_s4 + $0xf2] sm:$0xff] }
 0x180   : > { %v9147_v22 = vadd.f32 %v7233_v21, %v1184_v32 }
 0x181   : > { %7614 = vmatmul.mubr.f32.gmra.mxu0 %v6252_v7  ;;  %v7171_v25 = vpop.f32.mrf.mxu0  ;;  %v9149_v26 = vpop.f32.mrf.mxu1  ;;  %3381 = vperm.xlu1 %8350, %v3253_v11   ;;  %v3470_v11 = vld [vmem:[#allocation9 + $0x70] sm:$0xff] }
 0x182   : > { %7616 = vmatprep.mubr.f32.mxu0 %v6253_v12  ;;  %v1190_v27 = vadd.f32 %v7171_v25, %v9028_v46  ;;  %7627 = vmatprep.subr.mxu1 %v3470_v11  ;;  %v3469_v25 = vld [vmem:[#allocation9 + $0x68] sm:$0xff] }
 0x183   : > { %v9154_v39 = vpop.f32.mrf.mxu0  ;;  %v7236_v43 = vpop.f32.mrf.mxu1  ;;  %7628 = vmatpush3.msra.mxu1 %v3470_v11 }
 0x184   : > { %v9156_v44 = vadd.f32 %v7236_v43, %v1186_v51  ;;  %7629 = vmatprep.subr.mxu1 %v3469_v25 }
 0x185   : > { %7617 = vmatmul.mubr.f32.gmra.mxu0 %v6254_v35  ;;  %v7174_v32 = vpop.f32.mrf.mxu0  ;;  %v9158_v47 = vpop.f32.mrf.mxu1  ;;  %7630 = vmatpush3.msra.mxu1 %v3469_v25  ;;  %v3466_v25 = vld [vmem:[#allocation9 + $0x50] sm:$0xff] }
 0x186   : > { %7619 = vmatprep.mubr.f32.mxu0 %v6255_v30  ;;  %v1192_v48 = vadd.f32 %v7174_v32, %v9040_v57 }
 0x187   : > { %v9163_v61 = vpop.f32.mrf.mxu0  ;;  %v7239_v46 = vpop.f32.mrf.mxu1 }
 0x188   : > { %v9165_v63 = vadd.f32 %v7239_v46, %v1188_v24  ;;  %v3467_v46 = vld [vmem:[#allocation9 + $0x58] sm:$0xff] }
 0x189   : > { %7620 = vmatmul.mubr.f32.gmra.mxu0 %v6256_v13  ;;  %v7177_v51 = vpop.f32.mrf.mxu0  ;;  %v9167_v1 = vpop.f32.mrf.mxu1  ;;  %v3468_v13 = vld [vmem:[#allocation9 + $0x60] sm:$0xff] }
 0x18a   : > { %7622 = vmatprep.mubr.f32.mxu0 %v6257_v59  ;;  %v1194_v7 = vadd.f32 %v7177_v51, %v9052_v5  ;;  %7631 = vmatprep.subr.mxu1 %v3468_v13 }
 0x18b   : > { %v9171_v12 = vpop.f32.mrf.mxu0  ;;  %v7242_v57 = vpop.f32.mrf.mxu1  ;;  %7632 = vmatpush3.msra.mxu1 %v3468_v13 }
 0x18c   : > { %v9173_v21 = vadd.f32 %v7242_v57, %v1190_v27  ;;  %7633 = vmatprep.subr.mxu1 %v3467_v46 }
 0x18d   : > { %7623 = vmatmul.mubr.f32.gmra.mxu0 %v6258_v4  ;;  %v7180_v24 = vpop.f32.mrf.mxu0  ;;  %v9175_v35 = vpop.f32.mrf.mxu1  ;;  %7634 = vmatpush3.msra.mxu1 %v3467_v46 }
 0x18e   : > { %10576 = vst [vmem:[#allocation20_spill] sm:$0xff] %v9175_v35  ;;  %v1196_v30 = vadd.f32 %v7180_v24, %v9064_v19  ;;  %7635 = vmatprep.subr.mxu1 %v3466_v25 }
 0x18f   : > { %v9178_v43 = vpop.f32.mrf.mxu0  ;;  %v7245_v5 = vpop.f32.mrf.mxu1  ;;  %7636 = vmatpush3.msra.mxu1 %v3466_v25  ;;  %v3974_v25 = vld [vmem:[#allocation9 + $0x170] sm:$0xff] }
 0x190   : > { %v9180_v32 = vadd.f32 %v7245_v5, %v1192_v48 }
 0x191   : > { %v7183_v52 = vpop.f32.mrf.mxu0  ;;  %v9182_v59 = vpop.f32.mrf.mxu1 }
 0x192   : > { %10577 = vst [vmem:[#allocation21_spill] sm:$0xff] %v9182_v59  ;;  %v1198_v27 = vadd.f32 %v7183_v52, %v9075_v33 }
 0x193   : > { %v9185_v51 = vpop.f32.mrf.mxu0  ;;  %v7248_v4 = vpop.f32.mrf.mxu1 }
 0x194   : > { %v9187_v19 = vadd.f32 %v7248_v4, %v1194_v7  ;;  %v3465_v4 = vld [vmem:[#allocation9 + $0x48] sm:$0xff] }
 0x195   : > { %v7186_v11 = vpop.f32.mrf.mxu0  ;;  %v9189_v57 = vpop.f32.mrf.mxu1  ;;  %7637 = vmatprep.subr.mxu1 %v3465_v4 }
 0x196   : > { %10578 = vst [vmem:[#allocation22_spill] sm:$0xff] %v9189_v57  ;;  %v1200_v48 = vadd.f32 %v7186_v11, %v9085_v45  ;;  %v3975_v57 = vld [vmem:[#allocation9 + $0x178] sm:$0xff]  ;;  %7638 = vmatpush3.msra.mxu1 %v3465_v4  ;;  %v3464_v11 = vld [vmem:[#allocation9 + $0x40] sm:$0xff] }
 0x197   : > { %v9192_v24 = vpop.f32.mrf.mxu0  ;;  %v7251_v5 = vpop.f32.mrf.mxu1  ;;  %7749 = vmatprep.subr.mxu0 %v3975_v57  ;;  %7639 = vmatprep.subr.mxu1 %v3464_v11 }
 0x198   : > { %v9194_v33 = vadd.f32 %v7251_v5, %v1196_v30  ;;  %7750 = vmatpush3.msra.mxu0 %v3975_v57  ;;  %7640 = vmatpush3.msra.mxu1 %v3464_v11  ;;  %v3972_v57 = vld [vmem:[#allocation9 + $0x160] sm:$0xff]  ;;  %v3971_v11 = vld [vmem:[#allocation9 + $0x158] sm:$0xff] }
 0x199   : > { %v7189_v13 = vpop.f32.mrf.mxu0  ;;  %v9196_v52 = vpop.f32.mrf.mxu1  ;;  %7751 = vmatprep.subr.mxu0 %v3974_v25 }
 0x19a   : > { %10579 = vst [vmem:[#allocation23_spill] sm:$0xff] %v9196_v52  ;;  %v1202_v7 = vadd.f32 %v7189_v13, %v9095_v58  ;;  %7752 = vmatpush3.msra.mxu0 %v3974_v25  ;;  %v3973_v52 = vld [vmem:[#allocation9 + $0x168] sm:$0xff] }
 0x19b   : > { %v9199_v46 = vpop.f32.mrf.mxu0  ;;  %v7254_v59 = vpop.f32.mrf.mxu1  ;;  %7753 = vmatprep.subr.mxu0 %v3973_v52  ;;  %v3461_v25 = vld [vmem:[#allocation9 + $0x28] sm:$0xff] }
 0x19c   : > { %10580 = vst [vmem:[#allocation24_spill] sm:$0xff] %v9199_v46  ;;  %v9201_v45 = vadd.f32 %v7254_v59, %v1198_v27  ;;  %v3463_v27 = vld [vmem:[#allocation9 + $0x38] sm:$0xff]  ;;  %7754 = vmatpush3.msra.mxu0 %v3973_v52  ;;  %v3970_v52 = vld [vmem:[#allocation9 + $0x150] sm:$0xff] }
 0x19d   : > { %v7192_v35 = vpop.f32.mrf.mxu0  ;;  %v9203_v30 = vpop.f32.mrf.mxu1  ;;  %7641 = vmatprep.subr.mxu1 %v3463_v27  ;;  %7755 = vmatprep.subr.mxu0 %v3972_v57 }
 0x19e   : > { %10581 = vst [vmem:[#allocation25_spill] sm:$0xff] %v9203_v30  ;;  %v1204_v5 = vadd.f32 %v7192_v35, %v9108_v15  ;;  %7642 = vmatpush3.msra.mxu1 %v3463_v27  ;;  %v3462_v15 = vld [vmem:[#allocation9 + $0x30] sm:$0xff]  ;;  %7756 = vmatpush3.msra.mxu0 %v3972_v57 }
 0x19f   : > { %v9206_v58 = vpop.f32.mrf.mxu0  ;;  %v7257_v13 = vpop.f32.mrf.mxu1  ;;  %7643 = vmatprep.subr.mxu1 %v3462_v15  ;;  %7757 = vmatprep.subr.mxu0 %v3971_v11 }
 0x1a0   : > { %10582 = vst [vmem:[#allocation26_spill] sm:$0xff] %v9206_v58  ;;  %v9208_v59 = vadd.f32 %v7257_v13, %v1200_v48  ;;  %7644 = vmatpush3.msra.mxu1 %v3462_v15  ;;  %7758 = vmatpush3.msra.mxu0 %v3971_v11  ;;  %v3459_v15 = vld [vmem:[#allocation9 + $0x18] sm:$0xff] }
 0x1a1   : > { %v7195_v4 = vpop.f32.mrf.mxu0  ;;  %v9210_v46 = vpop.f32.mrf.mxu1  ;;  %7645 = vmatprep.subr.mxu1 %v3461_v25  ;;  %7759 = vmatprep.subr.mxu0 %v3970_v52 }
 0x1a2   : > { %10583 = vst [vmem:[#allocation27_spill] sm:$0xff] %v9210_v46  ;;  %v1206_v30 = vadd.f32 %v7195_v4, %v9119_v34  ;;  %7646 = vmatpush3.msra.mxu1 %v3461_v25  ;;  %v3460_v34 = vld [vmem:[#allocation9 + $0x20] sm:$0xff]  ;;  %7760 = vmatpush3.msra.mxu0 %v3970_v52  ;;  %v3969_v4 = vld [vmem:[#allocation9 + $0x148] sm:$0xff]  ;;  %v3967_v52 = vld [vmem:[#allocation9 + $0x138] sm:$0xff] }
 0x1a3   : > { %v9213_v35 = vpop.f32.mrf.mxu0  ;;  %7647 = vmatprep.subr.mxu1 %v3460_v34  ;;  %7761 = vmatprep.subr.mxu0 %v3969_v4 }
 0x1a4   : > { %10584 = vst [vmem:[#allocation28_spill] sm:$0xff] %v9213_v35  ;;  %v7260_v48 = vpop.f32.mrf.mxu1  ;;  %7648 = vmatpush3.msra.mxu1 %v3460_v34  ;;  %7762 = vmatpush3.msra.mxu0 %v3969_v4  ;;  %v3457_v34 = vld [vmem:[#allocation9 + $0x8] sm:$0xff]  ;;  %v3966_v4 = vld [vmem:[#allocation9 + $0x130] sm:$0xff] }
 0x1a5   : > { %v9215_v13 = vadd.f32 %v7260_v48, %v1202_v7  ;;  %v3968_v7 = vld [vmem:[#allocation9 + $0x140] sm:$0xff]  ;;  %7649 = vmatprep.subr.mxu1 %v3459_v15  ;;  %v3458_v48 = vld [vmem:[#allocation9 + $0x10] sm:$0xff] }
 0x1a6   : > { %v9217_v46 = vpop.f32.mrf.mxu1  ;;  %7763 = vmatprep.subr.mxu0 %v3968_v7  ;;  %7650 = vmatpush3.msra.mxu1 %v3459_v15 }
 0x1a7   : > { %10585 = vst [vmem:[#allocation29_spill] sm:$0xff] %v9217_v46  ;;  %v7198_v27 = vpop.f32.mrf.mxu0  ;;  %7764 = vmatpush3.msra.mxu0 %v3968_v7  ;;  %7651 = vmatprep.subr.mxu1 %v3458_v48  ;;  %v3965_v7 = vld [vmem:[#allocation9 + $0x128] sm:$0xff] }
 0x1a8   : > { %v1208_v57 = vadd.f32 %v7198_v27, %v9131_v55  ;;  %7765 = vmatprep.subr.mxu0 %v3967_v52  ;;  %7652 = vmatpush3.msra.mxu1 %v3458_v48 }
 0x1a9   : > { %v9220_v35 = vpop.f32.mrf.mxu0  ;;  %7766 = vmatpush3.msra.mxu0 %v3967_v52  ;;  %7653 = vmatprep.subr.mxu1 %v3457_v34  ;;  %v3964_v52 = vld [vmem:[#allocation9 + $0x120] sm:$0xff] }
 0x1aa   : > { %10586 = vst [vmem:[#allocation30_spill] sm:$0xff] %v9220_v35  ;;  %v7263_v11 = vpop.f32.mrf.mxu1  ;;  %7767 = vmatprep.subr.mxu0 %v3966_v4  ;;  %7654 = vmatpush3.msra.mxu1 %v3457_v34  ;;  %v3963_v34 = vld [vmem:[#allocation9 + $0x118] sm:$0xff] }
 0x1ab   : > { %v9222_v25 = vadd.f32 %v7263_v11, %v1204_v5  ;;  %v3456_v5 = vld [vmem:[#allocation9] sm:$0xff]  ;;  %7768 = vmatpush3.msra.mxu0 %v3966_v4 }
 0x1ac   : > { %v9224_v46 = vpop.f32.mrf.mxu1  ;;  %v7304_v55 = vpop.f32.mrf.mxu0  ;;  %7655 = vmatprep.subr.mxu1 %v3456_v5  ;;  %7769 = vmatprep.subr.mxu0 %v3965_v7 }
 0x1ad   : > { %10587 = vst [vmem:[#allocation31_spill] sm:$0xff] %v9224_v46  ;;  %v9227_v27 = vadd.f32 %v7304_v55, %v9147_v22  ;;  %7656 = vmatpush3.msra.mxu1 %v3456_v5  ;;  %7770 = vmatpush3.msra.mxu0 %v3965_v7 }
 0x1ae   : > { %v9229_v35 = vpop.f32.mrf.mxu0  ;;  %7771 = vmatprep.subr.mxu0 %v3964_v52 }
 0x1af   : > { %v7266_v15 = vpop.f32.mrf.mxu1  ;;  %7772 = vmatpush3.msra.mxu0 %v3964_v52  ;;  %v9249_v52 = vld [vmem:[#allocation9 + $0xf8] sm:$0xff] }
 0x1b0   : > { %v9231_v11 = vadd.f32 %v7266_v15, %v1206_v30  ;;  %7773 = vmatprep.subr.mxu0 %v3963_v34  ;;  %v3962_v30 = vld [vmem:[#allocation9 + $0x110] sm:$0xff]  ;;  %10594 = vst [vmem:[#allocation38_spill] sm:$0xff] %v9249_v52  ;;  %7687 = vmatprep.subr.mxu1 %v9249_v52 }
 0x1b1   : > { %v9233_v48 = vpop.f32.mrf.mxu1  ;;  %v7307_v22 = vpop.f32.mrf.mxu0  ;;  %7774 = vmatpush3.msra.mxu0 %v3963_v34 }
 0x1b2   : > { %10588 = vst [vmem:[#allocation32_spill] sm:$0xff] %v9233_v48  ;;  %v9236_v55 = vadd.f32 %v7307_v22, %v9156_v44  ;;  %7775 = vmatprep.subr.mxu0 %v3962_v30  ;;  %v3961_v44 = vld [vmem:[#allocation9 + $0x108] sm:$0xff] }
 0x1b3   : > { %v9238_v46 = vpop.f32.mrf.mxu0  ;;  %7776 = vmatpush3.msra.mxu0 %v3962_v30 }
 0x1b4   : > { %10589 = vst [vmem:[#allocation33_spill] sm:$0xff] %v9236_v55  ;;  %10590 = vst [vmem:[#allocation34_spill] sm:$0xff] %v9238_v46  ;;  %v7269_v4 = vpop.f32.mrf.mxu1  ;;  %7777 = vmatprep.subr.mxu0 %v3961_v44 }
 0x1b5   : > { %v9240_v58 = vadd.f32 %v7269_v4, %v1208_v57  ;;  %7778 = vmatpush3.msra.mxu0 %v3961_v44  ;;  %v3960_v57 = vld [vmem:[#allocation9 + $0x100] sm:$0xff] }
 0x1b6   : > { %v9242_v5 = vpop.f32.mrf.mxu1  ;;  %v7310_v15 = vpop.f32.mrf.mxu0  ;;  %7779 = vmatprep.subr.mxu0 %v3960_v57 }
 0x1b7   : > { %10591 = vst [vmem:[#allocation35_spill] sm:$0xff] %v9242_v5  ;;  %v9245_v7 = vadd.f32 %v7310_v15, %v9165_v63  ;;  %7780 = vmatpush3.msra.mxu0 %v3960_v57  ;;  %v9274_v57 = vld [vmem:[#allocation9 + $0x278] sm:$0xff] }
 0x1b8   : > { %v9247_v22 = vpop.f32.mrf.mxu0  ;;  %10601 = vst [vmem:[#allocation45_spill] sm:$0xff] %v9274_v57  ;;  %7873 = vmatprep.subr.mxu0 %v9274_v57 }
 0x1b9   : > { %10592 = vst [vmem:[#allocation36_spill] sm:$0xff] %v9245_v7  ;;  %10593 = vst [vmem:[#allocation37_spill] sm:$0xff] %v9247_v22  ;;  %v9251_v48 = vpop.f32.mrf.mxu1 }
 0x1bb   : > { %v7313_v34 = vpop.f32.mrf.mxu0  ;;  %v9254_v4 = vpop.f32.mrf.mxu1 }
 0x1bc   : > { %v9257_v63 = vadd.f32 %v7313_v34, %v9173_v21 }
 0x1bd   : > { %v9259_v30 = vpop.f32.mrf.mxu0  ;;  %v9261_v15 = vpop.f32.mrf.mxu1 }
 0x1be   : > { %10595 = vst [vmem:[#allocation39_spill] sm:$0xff] %v9257_v63  ;;  %10596 = vst [vmem:[#allocation40_spill] sm:$0xff] %v9259_v30 }
 0x1bf   : > { %v7316_v5 = vpop.f32.mrf.mxu0  ;;  %v9263_v7 = vpop.f32.mrf.mxu1 }
 0x1c0   : > { %v9266_v22 = vadd.f32 %v7316_v5, %v9180_v32 }
 0x1c1   : > { %v9268_v44 = vpop.f32.mrf.mxu0  ;;  %v9270_v52 = vpop.f32.mrf.mxu1 }
 0x1c2   : > { %10597 = vst [vmem:[#allocation41_spill] sm:$0xff] %v9266_v22  ;;  %10598 = vst [vmem:[#allocation42_spill] sm:$0xff] %v9268_v44 }
 0x1c3   : > { %10599 = vst [vmem:[#allocation43_spill] sm:$0xff] %v9270_v52  ;;  %v7319_v55 = vpop.f32.mrf.mxu0  ;;  %v9272_v46 = vpop.f32.mrf.mxu1 }
 0x1c4   : > { %10600 = vst [vmem:[#allocation44_spill] sm:$0xff] %v9272_v46  ;;  %v9277_v21 = vadd.f32 %v7319_v55, %v9187_v19 }
 0x1c5   : > { %v9280_v34 = vpop.f32.mrf.mxu0  ;;  %v9282_v63 = vpop.f32.mrf.mxu1 }
 0x1c6   : > { %10602 = vst [vmem:[#allocation46_spill] sm:$0xff] %v9277_v21  ;;  %10603 = vst [vmem:[#allocation47_spill] sm:$0xff] %v9282_v63 }
 0x1c7   : > { %v7322_v32 = vpop.f32.mrf.mxu0  ;;  %v9284_v5 = vpop.f32.mrf.mxu1 }
 0x1c8   : > { %10604 = vst [vmem:[#allocation48_spill] sm:$0xff] %v9284_v5  ;;  %v9287_v22 = vadd.f32 %v7322_v32, %v9194_v33 }
 0x1c9   : > { %v9289_v44 = vpop.f32.mrf.mxu0  ;;  %v9291_v46 = vpop.f32.mrf.mxu1 }
 0x1ca   : > { %10605 = vst [vmem:[#allocation49_spill] sm:$0xff] %v9287_v22  ;;  %10606 = vst [vmem:[#allocation50_spill] sm:$0xff] %v9289_v44 }
 0x1cb   : > { %10607 = vst [vmem:[#allocation51_spill] sm:$0xff] %v9291_v46  ;;  %v7325_v30 = vpop.f32.mrf.mxu0  ;;  %v9293_v52 = vpop.f32.mrf.mxu1 }
 0x1cc   : > { %10608 = vst [vmem:[#allocation52_spill] sm:$0xff] %v9293_v52  ;;  %v9296_v19 = vadd.f32 %v7325_v30, %v9201_v45 }
 0x1cd   : > { %v9298_v55 = vpop.f32.mrf.mxu0  ;;  %v9300_v57 = vpop.f32.mrf.mxu1 }
 0x1ce   : > { %10609 = vst [vmem:[#allocation53_spill] sm:$0xff] %v9296_v19  ;;  %10610 = vst [vmem:[#allocation54_spill] sm:$0xff] %v9298_v55 }
 0x1cf   : > { %10611 = vst [vmem:[#allocation55_spill] sm:$0xff] %v9300_v57  ;;  %v7328_v21 = vpop.f32.mrf.mxu0  ;;  %v9302_v63 = vpop.f32.mrf.mxu1 }
 0x1d0   : > { %10612 = vst [vmem:[#allocation56_spill] sm:$0xff] %v9302_v63  ;;  %v9305_v33 = vadd.f32 %v7328_v21, %v9208_v59 }
 0x1d1   : > { %v9307_v32 = vpop.f32.mrf.mxu0  ;;  %v9309_v22 = vpop.f32.mrf.mxu1 }
 0x1d2   : > { %10613 = vst [vmem:[#allocation57_spill] sm:$0xff] %v9305_v33  ;;  %10614 = vst [vmem:[#allocation58_spill] sm:$0xff] %v9307_v32 }
 0x1d3   : > { %10615 = vst [vmem:[#allocation59_spill] sm:$0xff] %v9309_v22  ;;  %v7331_v46 = vpop.f32.mrf.mxu0  ;;  %v9311_v44 = vpop.f32.mrf.mxu1 }
 0x1d4   : > { %10616 = vst [vmem:[#allocation60_spill] sm:$0xff] %v9311_v44  ;;  %v9314_v45 = vadd.f32 %v7331_v46, %v9215_v13 }
 0x1d5   : > { %v9316_v30 = vpop.f32.mrf.mxu0  ;;  %v9318_v19 = vpop.f32.mrf.mxu1 }
 0x1d6   : > { %10617 = vst [vmem:[#allocation61_spill] sm:$0xff] %v9314_v45  ;;  %10618 = vst [vmem:[#allocation62_spill] sm:$0xff] %v9316_v30 }
 0x1d7   : > { %10619 = vst [vmem:[#allocation63_spill] sm:$0xff] %v9318_v19  ;;  %v7334_v57 = vpop.f32.mrf.mxu0  ;;  %v9320_v55 = vpop.f32.mrf.mxu1 }
 0x1d8   : > { %10620 = vst [vmem:[#allocation64_spill] sm:$0xff] %v9320_v55  ;;  %v9323_v59 = vadd.f32 %v7334_v57, %v9222_v25 }
 0x1d9   : > { %v9325_v21 = vpop.f32.mrf.mxu0  ;;  %v9327_v33 = vpop.f32.mrf.mxu1 }
 0x1da   : > { %10621 = vst [vmem:[#allocation65_spill] sm:$0xff] %v9323_v59  ;;  %10622 = vst [vmem:[#allocation66_spill] sm:$0xff] %v9325_v21 }
 0x1db   : > { %10623 = vst [vmem:[#allocation67_spill] sm:$0xff] %v9327_v33  ;;  %v7337_v22 = vpop.f32.mrf.mxu0  ;;  %v9329_v32 = vpop.f32.mrf.mxu1 }
 0x1dc   : > { %10624 = vst [vmem:[#allocation68_spill] sm:$0xff] %v9329_v32  ;;  %v9332_v46 = vadd.f32 %v7337_v22, %v9231_v11 }
 0x1dd   : > { %v9334_v13 = vpop.f32.mrf.mxu0 }
 0x1de   : > { %10625 = vst [vmem:[#allocation69_spill] sm:$0xff] %v9332_v46  ;;  %10626 = vst [vmem:[#allocation70_spill] sm:$0xff] %v9334_v13  ;;  %v9336_v45 = vpop.f32.mrf.mxu1 }
 0x1df   : > { %10627 = vst [vmem:[#allocation71_spill] sm:$0xff] %v9336_v45 }
 0x1e0   : > { %v9338_v19 = vpop.f32.mrf.mxu1 }
 0x1e1   : > { %10628 = vst [vmem:[#allocation72_spill] sm:$0xff] %v9338_v19  ;;  %v7340_v55 = vpop.f32.mrf.mxu0 }
 0x1e2   : > { %v9341_v25 = vadd.f32 %v7340_v55, %v9240_v58 }
 0x1e3   : > { %v9343_v57 = vpop.f32.mrf.mxu0 }
 0x1e4   : > { %10629 = vst [vmem:[#allocation73_spill] sm:$0xff] %v9341_v25  ;;  %10630 = vst [vmem:[#allocation74_spill] sm:$0xff] %v9343_v57  ;;  %v9345_v59 = vpop.f32.mrf.mxu1 }
 0x1e5   : > { %10631 = vst [vmem:[#allocation75_spill] sm:$0xff] %v9345_v59 }
 0x1e6   : > { %v9347_v33 = vpop.f32.mrf.mxu1  ;;  %v9349_v32 = vpop.f32.mrf.mxu0 }
 0x1e7   : > { %10632 = vst [vmem:[#allocation76_spill] sm:$0xff] %v9347_v33 }
 0x1e8   : > { %v9351_v11 = vpop.f32.mrf.mxu0 }
 0x1e9   : > { %v9353_v22 = vpop.f32.mrf.mxu1 }
 0x1ea   : > { %10633 = vst [vmem:[#allocation77_spill] sm:$0xff] %v9353_v22 }
 0x1eb   : > { %v9355_v46 = vpop.f32.mrf.mxu1  ;;  %v9357_v45 = vpop.f32.mrf.mxu0 }
 0x1ec   : > { %10634 = vst [vmem:[#allocation78_spill] sm:$0xff] %v9355_v46 }
 0x1ed   : > { %v9359_v19 = vpop.f32.mrf.mxu0 }
 0x1ee   : > { %v9361_v58 = vpop.f32.mrf.mxu1 }
 0x1ef   : > { %10635 = vst [vmem:[#allocation79_spill] sm:$0xff] %v9361_v58 }
 0x1f0   : > { %v9363_v55 = vpop.f32.mrf.mxu1  ;;  %v9365_v25 = vpop.f32.mrf.mxu0 }
 0x1f1   : > { %10636 = vst [vmem:[#allocation80_spill] sm:$0xff] %v9363_v55 }
 0x1f2   : > { %v9367_v59 = vpop.f32.mrf.mxu0 }
 0x1f3   : > { %10637 = vst [vmem:[#allocation81_spill] sm:$0xff] %v9367_v59  ;;  %v9369_v33 = vpop.f32.mrf.mxu1 }
 0x1f5   : > { %v9371_v57 = vpop.f32.mrf.mxu0  ;;  %v9373_v13 = vpop.f32.mrf.mxu1 }
 0x1f6   : > { %10638 = vst [vmem:[#allocation82_spill] sm:$0xff] %v9371_v57 }
 0x1f7   : > { %v9375_v22 = vpop.f32.mrf.mxu0  ;;  %v9377_v46 = vpop.f32.mrf.mxu1 }
 0x1f8   : > { %10639 = vst [vmem:[#allocation83_spill] sm:$0xff] %v9375_v22 }
 0x1f9   : > { %v9379_v21 = vpop.f32.mrf.mxu0  ;;  %v9381_v30 = vpop.f32.mrf.mxu1 }
 0x1fa   : > { %10640 = vst [vmem:[#allocation84_spill] sm:$0xff] %v9379_v21  ;;  %10641 = vst [vmem:[#allocation85_spill] sm:$0xff] %v9381_v30 }
 0x1fb   : > { %v9383_v58 = vpop.f32.mrf.mxu0  ;;  %v9385_v55 = vpop.f32.mrf.mxu1 }
 0x1fc   : > { %10642 = vst [vmem:[#allocation86_spill] sm:$0xff] %v9383_v58  ;;  %10643 = vst [vmem:[#allocation87_spill] sm:$0xff] %v9385_v55 }
 0x1fd   : > { %v9387_v44 = vpop.f32.mrf.mxu0  ;;  %v9389_v63 = vpop.f32.mrf.mxu1 }
 0x1fe   : > { %10644 = vst [vmem:[#allocation88_spill] sm:$0xff] %v9387_v44  ;;  %10645 = vst [vmem:[#allocation89_spill] sm:$0xff] %v9389_v63  ;;  %v9411_v63 = vpop.permute.xlu1 %3266 }
 0x1ff   : > { %v9391_v52 = vpop.f32.mrf.mxu0  ;;  %v9393_v57 = vpop.f32.mrf.mxu1  ;;  %10655 = vst [vmem:[#allocation99_spill] sm:$0xff] %v9411_v63 }
 0x200   : > { %10646 = vst [vmem:[#allocation90_spill] sm:$0xff] %v9391_v52 }
 0x201   : > { %v9395_v5 = vpop.f32.mrf.mxu0  ;;  %v9397_v22 = vpop.f32.mrf.mxu1 }
 0x202   : > { %10647 = vst [vmem:[#allocation91_spill] sm:$0xff] %v9395_v5  ;;  %10648 = vst [vmem:[#allocation92_spill] sm:$0xff] %v9397_v22  ;;  %v865_v5 = vadd.f32 %v8992_v17, %v8974_v2  ;;  %v9417_v22 = vpop.permute.xlu0 %3256  ;;  %v869_v17 = vadd.f32 %v9018_v38, %v8996_v20  ;;  %v881_v38 = vadd.f32 %v9088_v50, %v9072_v29 }
 0x203   : > { %v9399_v59 = vpop.f32.mrf.mxu0  ;;  %v9403_v30 = vpop.f32.mrf.mxu1 }
 0x204   : > { %10649 = vst [vmem:[#allocation93_spill] sm:$0xff] %v9399_v59  ;;  %10651 = vst [vmem:[#allocation95_spill] sm:$0xff] %v9403_v30 }
 0x205   : > { %v9401_v21 = vpop.f32.mrf.mxu0  ;;  %v9409_v44 = vpop.f32.mrf.mxu1 }
 0x206   : > { %10650 = vst [vmem:[#allocation94_spill] sm:$0xff] %v9401_v21  ;;  %10654 = vst [vmem:[#allocation98_spill] sm:$0xff] %v9409_v44  ;;  %v1183_v21 = vadd.f32 %v9121_v36, %v865_v5  ;;  %v9428_v44 = vpop.permute.xlu1 %3271  ;;  %v871_v36 = vadd.f32 %v9031_v49, %v9011_v31  ;;  %v879_v31 = vadd.f32 %v9078_v37, %v9060_v14 }
 0x207   : > { %v9405_v58 = vpop.f32.mrf.mxu0  ;;  %v9422_v30 = vpop.f32.mrf.mxu1  ;;  %v883_v49 = vadd.f32 %v9098_v62, %v9082_v41 }
 0x208   : > { %10652 = vst [vmem:[#allocation96_spill] sm:$0xff] %v9405_v58 }
 0x209   : > { %v9407_v55 = vpop.f32.mrf.mxu0  ;;  %v9433_v2 = vpop.f32.mrf.mxu1 }
 0x20a   : > { %10653 = vst [vmem:[#allocation97_spill] sm:$0xff] %v9407_v55  ;;  %v867_v55 = vadd.f32 %v9007_v28, %v8985_v10  ;;  %v873_v10 = vadd.f32 %v9043_v60, %v9023_v42  ;;  %v875_v28 = vadd.f32 %v9055_v8, %v9036_v53  ;;  %v885_v53 = vadd.f32 %v9112_v18, %v9092_v54  ;;  %v9474_v50 = vpop.permute.xlu1 %3281 }
 0x20b   : > { %v9413_v52 = vpop.f32.mrf.mxu0  ;;  %v887_v60 = vadd.f32 %v9124_v40, %v9102_v3  ;;  %v2138_v8 = vadd.f32 %v9251_v48, %v9227_v27  ;;  %v9467_v14 = vpop.f32.mrf.mxu1  ;;  %v1197_v3 = vadd.f32 %v9185_v51, %v879_v31  ;;  %v10661_v27 = vld [vmem:[#allocation20_spill] sm:$0xff]  ;;  %v10662_v48 = vld [vmem:[#allocation26_spill] sm:$0xff] }
 0x20c   : > { %10656 = vst [vmem:[#allocation100_spill] sm:$0xff] %v9413_v52  ;;  %v1501_v52 = vadd.f32 %v9149_v26, %v1183_v21  ;;  %v1185_v5 = vadd.f32 %v9133_v56, %v867_v55  ;;  %v877_v26 = vadd.f32 %v9067_v23, %v9048_v0  ;;  %v1187_v56 = vadd.f32 %v9143_v9, %v869_v17  ;;  %v10659_v9 = vld [vmem:[#allocation24_spill] sm:$0xff]  ;;  %v10665_v55 = vld [vmem:[#allocation22_spill] sm:$0xff] }
 0x20d   : > { %v9419_v59 = vpop.f32.mrf.mxu0  ;;  %v1189_v0 = vadd.f32 %v9154_v39, %v871_v36  ;;  %v889_v23 = vadd.f32 %v9139_v6, %v9110_v16  ;;  %v1191_v37 = vadd.f32 %v9163_v61, %v873_v10  ;;  %v1193_v41 = vadd.f32 %v9171_v12, %v875_v28  ;;  %v10666_v36 = vld [vmem:[#allocation28_spill] sm:$0xff]  ;;  %v10667_v10 = vld [vmem:[#allocation37_spill] sm:$0xff] }
 0x20e   : > { %10657 = vst [vmem:[#allocation101_spill] sm:$0xff] %v9419_v59  ;;  %v1819_v20 = vadd.f32 %v9229_v35, %v1501_v52  ;;  %v1503_v29 = vadd.f32 %v9158_v47, %v1185_v5  ;;  %v1195_v62 = vadd.f32 %v9178_v43, %v877_v26  ;;  %v2456_v40 = vadd.f32 %v9349_v32, %v2138_v8  ;;  %v10660_v47 = vld [vmem:[#allocation34_spill] sm:$0xff]  ;;  %v10663_v52 = vld [vmem:[#allocation33_spill] sm:$0xff] }
 0x20f   : > { %v9424_v58 = vpop.f32.mrf.mxu0  ;;  %v1505_v16 = vadd.f32 %v9167_v1, %v1187_v56  ;;  %v1199_v6 = vadd.f32 %v9192_v24, %v881_v38  ;;  %v1201_v39 = vadd.f32 %v10659_v9, %v883_v49  ;;  %v1507_v43 = vadd.f32 %v10661_v27, %v1189_v0  ;;  %v9495_v1 = vpop.f32.mrf.mxu1  ;;  %v10664_v24 = vld [vmem:[#allocation21_spill] sm:$0xff]  ;;  %v10670_v56 = vld [vmem:[#allocation27_spill] sm:$0xff]  ;;  %v10678_v27 = vld [vmem:[#allocation44_spill] sm:$0xff] }
 0x210   : > { %10658 = vst [vmem:[#allocation102_spill] sm:$0xff] %v9424_v58  ;;  %v9440_v58 = vpop.permute.xlu0 %3261  ;;  %v2137_v18 = vadd.f32 %v9254_v4, %v1819_v20  ;;  %v1821_v61 = vadd.f32 %v10660_v47, %v1503_v29  ;;  %v1203_v51 = vadd.f32 %v10662_v48, %v885_v53  ;;  %v2140_v4 = vadd.f32 %v9261_v15, %v10663_v52  ;;  %v10668_v20 = vld [vmem:[#allocation23_spill] sm:$0xff]  ;;  %v10669_v38 = vld [vmem:[#allocation25_spill] sm:$0xff]  ;;  %v10672_v29 = vld [vmem:[#allocation30_spill] sm:$0xff] }
 0x211   : > { %v9430_v63 = vpop.f32.mrf.mxu0  ;;  %v1509_v21 = vadd.f32 %v10664_v24, %v1191_v37  ;;  %v1511_v17 = vadd.f32 %v10665_v55, %v1193_v41  ;;  %v1205_v5 = vadd.f32 %v10666_v36, %v887_v60  ;;  %v1823_v28 = vadd.f32 %v10667_v10, %v1505_v16  ;;  %v10671_v0 = vld [vmem:[#allocation29_spill] sm:$0xff]  ;;  %v9515_v41 = vpop.permute.xlu1 %3291  ;;  %v10677_v47 = vld [vmem:[#allocation40_spill] sm:$0xff]  ;;  %v10679_v36 = vld [vmem:[#allocation35_spill] sm:$0xff] }
 0x212   : > { %v2455_v32 = vadd.f32 %v9351_v11, %v2137_v18  ;;  %v1513_v31 = vadd.f32 %v10668_v20, %v1195_v62  ;;  %v1515_v49 = vadd.f32 %v10669_v38, %v1197_v3  ;;  %v2458_v15 = vadd.f32 %v9357_v45, %v2140_v4  ;;  %v9520_v62 = vld [vmem:[%s10537_s2] ss:$0 sm:$0xff]  ;;  %v10673_v45 = vld [vmem:[#allocation31_spill] sm:$0xff]  ;;  %v10674_v3 = vld [vmem:[#allocation36_spill] sm:$0xff]  ;;  %v9528_v9 = vpop.f32.mrf.mxu1 }
 0x213   : > { %v9442_v59 = vpop.f32.mrf.mxu0  ;;  %v2774_v11 = vadd.f32 %v9369_v33, %v2456_v40  ;;  %v9508_v53 = vadd.f32 %v10670_v56, %v1199_v6  ;;  %v9511_v8 = vadd.f32 %v10671_v0, %v1201_v39  ;;  %v1207_v60 = vadd.f32 %v10672_v29, %v889_v23  ;;  %v10675_v40 = vld [vmem:[#allocation43_spill] sm:$0xff]  ;;  %v10683_v56 = vld [vmem:[#allocation81_spill] sm:$0xff] }
 0x214   : > { %v9486_v12 = vpop.permute.xlu0 %3276  ;;  %v2139_v37 = vadd.f32 %v9263_v7, %v1821_v61  ;;  %v9523_v33 = vadd.f32 %v10673_v45, %v1203_v51  ;;  %v2142_v16 = vadd.f32 %v10675_v40, %v10674_v3  ;;  %v2773_v6 = vadd.f32 %v9373_v13, %v2455_v32  ;;  %v10676_v7 = vld [vmem:[#allocation32_spill] sm:$0xff]  ;;  %v10682_v38 = vld [vmem:[#allocation47_spill] sm:$0xff]  ;;  %v9549_v29 = vpop.f32.mrf.mxu1  ;;  %v10686_v3 = vld [vmem:[#allocation82_spill] sm:$0xff] }
 0x215   : > { %v9458_v42 = vpop.f32.mrf.mxu0  ;;  %v9531_v39 = vadd.f32 %v10676_v7, %v1205_v5  ;;  %v1825_v61 = vadd.f32 %v10677_v47, %v1507_v43  ;;  %v2141_v48 = vadd.f32 %v10678_v27, %v1823_v28  ;;  %v2776_v55 = vadd.f32 %v9377_v46, %v2458_v15  ;;  %v10680_v5 = vld [vmem:[#allocation42_spill] sm:$0xff]  ;;  %v10681_v28 = vld [vmem:[#allocation39_spill] sm:$0xff]  ;;  %v10687_v40 = vld [vmem:[#allocation85_spill] sm:$0xff] }
 0x216   : > { %v2457_v52 = vadd.f32 %v9359_v19, %v2139_v37  ;;  %v2460_v24 = vadd.f32 %v9365_v25, %v2142_v16  ;;  %v9542_v10 = vadd.f32 %v10679_v36, %v1207_v60  ;;  %v1827_v20 = vadd.f32 %v10680_v5, %v1509_v21  ;;  %v10684_v37 = vld [vmem:[#allocation48_spill] sm:$0xff]  ;;  %v10685_v60 = vld [vmem:[#allocation50_spill] sm:$0xff] }
 0x217   : > { %v9476_v54 = vpop.f32.mrf.mxu0  ;;  %v1829_v43 = vadd.f32 %v9280_v34, %v1511_v17  ;;  %v2144_v19 = vadd.f32 %v10682_v38, %v10681_v28  ;;  %v2459_v0 = vadd.f32 %v10683_v56, %v2141_v48  ;;  %v1831_v45 = vadd.f32 %v10685_v60, %v1513_v31  ;;  %v9556_v17 = vpop.permute.xlu1 %3301  ;;  %v10689_v48 = vld [vmem:[#allocation41_spill] sm:$0xff]  ;;  %v10692_v31 = vld [vmem:[#allocation83_spill] sm:$0xff]  ;;  %v10694_v56 = vld [vmem:[#allocation54_spill] sm:$0xff] }
 0x218   : > { %v9536_v4 = vpop.permute.xlu0 %3286  ;;  %v2775_v34 = vadd.f32 %v10687_v40, %v2457_v52  ;;  %v10693_v28 = vld [vmem:[#allocation89_spill] sm:$0xff] }
 0x219   : > { %v9488_v35 = vpop.f32.mrf.mxu0  ;;  %v2462_v21 = vadd.f32 %v10686_v3, %v2144_v19  ;;  %v2777_v38 = vadd.f32 %v10693_v28, %v2459_v0  ;;  %v9568_v19 = vpop.f32.mrf.mxu1  ;;  %v10703_v28 = vld [vmem:[#allocation49_spill] sm:$0xff] }
 0x21b   : > { %v9501_v26 = vpop.f32.mrf.mxu0  ;;  %v2780_v0 = vadd.f32 %v9393_v57, %v2462_v21  ;;  %v10701_v21 = vld [vmem:[#allocation92_spill] sm:$0xff] }
 0x21c   : > { %v9565_v36 = vpop.permute.xlu0 %3296 }
 0x21d   : > { %v7588_v18 = vpop.f32.mrf.mxu0 }
 0x21e   : > { %v3092_v23 = vadd.f32 %v7588_v18, %v2774_v11  ;;  %v2143_v18 = vadd.f32 %v10684_v37, %v1825_v61  ;;  %v10691_v61 = vld [vmem:[#allocation52_spill] sm:$0xff] }
 0x21f   : > { %v2962_v51 = vpop.f32.mrf.mxu0  ;;  %v10697_v37 = vld [vmem:[#allocation84_spill] sm:$0xff] }
 0x220   : > { %v3177_v13 = vadd.f32 %v9520_v62, %v3092_v23  ;;  %v3091_v32 = vadd.f32 %v2962_v51, %v2773_v6  ;;  %v10688_v6 = vld [vmem:[#allocation87_spill] sm:$0xff] }
 0x221   : > { %v7591_v11 = vpop.f32.mrf.mxu0  ;;  %v2778_v23 = vadd.f32 %v10688_v6, %v2460_v24  ;;  %v10690_v51 = vld [vmem:[#allocation51_spill] sm:$0xff] }
 0x222   : > { %v3203_v25 = vmax.f32 %v3177_v13, 0.0  ;;  %v3176_v46 = vadd.f32 %v9520_v62, %v3091_v32  ;;  %v3094_v15 = vadd.f32 %v7591_v11, %v2776_v55  ;;  %v2146_v55 = vadd.f32 %v10690_v51, %v10689_v48  ;;  %v9587_v51 = vpop.permute.xlu1 %3311 }
 0x223   : > { %v2972_v16 = vpop.f32.mrf.mxu0  ;;  %v2145_v13 = vadd.f32 %v10691_v61, %v1827_v20  ;;  %v2461_v32 = vadd.f32 %v10692_v31, %v2143_v18  ;;  %v10696_v20 = vld [vmem:[#allocation55_spill] sm:$0xff]  ;;  %v9590_v61 = vpop.f32.mrf.mxu1 }
 0x224   : > { %v3385_v7 = vmul.f32 %v9440_v58, %v3203_v25  ;;  %v3202_v47 = vmax.f32 %v3176_v46, 0.0  ;;  %v3179_v27 = vadd.f32 %v9520_v62, %v3094_v15  ;;  %v3093_v52 = vadd.f32 %v2972_v16, %v2775_v34  ;;  %v10695_v46 = vld [vmem:[#allocation46_spill] sm:$0xff] }
 0x225   : > { %v7594_v5 = vpop.f32.mrf.mxu0  ;;  %v9572_v25 = vadd.f32 %v10694_v56, %v1515_v49  ;;  %v2148_v15 = vadd.f32 %v10696_v20, %v10695_v46  ;;  %v2464_v18 = vadd.f32 %v10697_v37, %v2146_v55  ;;  %v3712_v16 = vld [vmem:[#allocation9 + $0xf0] sm:$0xff]  ;;  %v10698_v49 = vld [vmem:[#allocation56_spill] sm:$0xff] }
 0x226   : > { %3411 = vst [vmem:[#allocation2 + $0x8] sm:$0xff] %v3385_v7  ;;  %v3384_v58 = vmul.f32 %v9417_v22, %v3202_v47  ;;  %v3205_v24 = vmax.f32 %v3179_v27, 0.0  ;;  %v3096_v11 = vadd.f32 %v7594_v5, %v2778_v23  ;;  %v3178_v60 = vadd.f32 %v9520_v62, %v3093_v52  ;;  %v10699_v23 = vld [vmem:[#allocation58_spill] sm:$0xff] }
 0x227   : > { %v2982_v3 = vpop.f32.mrf.mxu0  ;;  %v2147_v6 = vadd.f32 %v10698_v49, %v1829_v43  ;;  %v9584_v47 = vadd.f32 %v10699_v23, %v9508_v53  ;;  %v10700_v27 = vld [vmem:[#allocation86_spill] sm:$0xff]  ;;  %v3711_v53 = vld [vmem:[#allocation9 + $0xe8] sm:$0xff] }
 0x228   : > { %3410 = vst [vmem:[#allocation2] sm:$0xff] %v3384_v58  ;;  %v3387_v40 = vmul.f32 %v9428_v44, %v3205_v24  ;;  %v3181_v22 = vadd.f32 %v9520_v62, %v3096_v11  ;;  %v3095_v34 = vadd.f32 %v2982_v3, %v2777_v38  ;;  %7657 = vmatprep.mubr.f32.mxu1 %v3384_v58  ;;  %v3204_v55 = vmax.f32 %v3178_v60, 0.0  ;;  %v10702_v5 = vld [vmem:[#allocation38_spill] sm:$0xff]  ;;  %v10704_v38 = vld [vmem:[#allocation59_spill] sm:$0xff]  ;;  %v10705_v58 = vld [vmem:[#allocation88_spill] sm:$0xff] }
 0x229   : > { %v2463_v48 = vadd.f32 %v10700_v27, %v2145_v13  ;;  %v7597_v57 = vpop.f32.mrf.mxu0  ;;  %7658 = vmatmul.mubr.f32.vlgmr.msra.gmra.mxu1 %v3385_v7  ;;  %v2779_v44 = vadd.f32 %v10701_v21, %v2461_v32  ;;  %v2150_v13 = vadd.f32 %v10704_v38, %v10703_v28  ;;  %v2466_v24 = vadd.f32 %v10705_v58, %v2148_v15  ;;  %v10706_v11 = vld [vmem:[#allocation95_spill] sm:$0xff]  ;;  %v9598_v7 = vpop.permute.xlu0 %3306  ;;  %v10709_v49 = vld [vmem:[#allocation90_spill] sm:$0xff] }
 0x22a   : > { %3413 = vst [vmem:[#allocation2 + $0x18] sm:$0xff] %v3387_v40  ;;  %v3207_v31 = vmax.f32 %v3181_v22, 0.0  ;;  %v3180_v52 = vadd.f32 %v9520_v62, %v3095_v34  ;;  %v3098_v43 = vadd.f32 %v7597_v57, %v2780_v0  ;;  %7688 = vmatpush3.msra.mxu1 %v10702_v5  ;;  %v2782_v56 = vadd.f32 %v10706_v11, %v2464_v18  ;;  %v10707_v32 = vld [vmem:[#allocation99_spill] sm:$0xff]  ;;  %v10708_v22 = vld [vmem:[#allocation60_spill] sm:$0xff]  ;;  %v10710_v15 = vld [vmem:[#allocation98_spill] sm:$0xff]  ;;  %v9618_v38 = vpop.permute.xlu1 %3321 }
 0x22b   : > { %v3386_v46 = vmul.f32 %v10707_v32, %v3204_v55  ;;  %v2992_v20 = vpop.f32.mrf.mxu0  ;;  %7689 = vmatprep.subr.mxu1 %v3712_v16  ;;  %v2149_v34 = vadd.f32 %v10708_v22, %v1831_v45  ;;  %v2465_v23 = vadd.f32 %v10709_v49, %v2147_v6  ;;  %v2781_v27 = vadd.f32 %v10710_v15, %v2463_v48  ;;  %v9606_v55 = vpop.f32.mrf.mxu1  ;;  %v10711_v45 = vld [vmem:[#allocation62_spill] sm:$0xff]  ;;  %v10712_v48 = vld [vmem:[#allocation53_spill] sm:$0xff]  ;;  %v10715_v32 = vld [vmem:[#allocation64_spill] sm:$0xff] }
 0x22c   : > { %v3389_v37 = vmul.f32 %v9474_v50, %v3207_v31  ;;  %v3206_v60 = vmax.f32 %v3180_v52, 0.0  ;;  %v3183_v3 = vadd.f32 %v9520_v62, %v3098_v43  ;;  %v3097_v0 = vadd.f32 %v2992_v20, %v2779_v44  ;;  %7690 = vmatpush3.msra.mxu1 %v3712_v16  ;;  %v3710_v16 = vld [vmem:[#allocation9 + $0xe0] sm:$0xff]  ;;  %v10713_v31 = vld [vmem:[#allocation63_spill] sm:$0xff] }
 0x22d   : > { %3412 = vst [vmem:[#allocation2 + $0x10] sm:$0xff] %v3386_v46  ;;  %v7600_v18 = vpop.f32.mrf.mxu0  ;;  %7660 = vmatprep.mubr.f32.mxu1 %v3386_v46  ;;  %7691 = vmatprep.subr.mxu1 %v3711_v53  ;;  %v9612_v6 = vadd.f32 %v10711_v45, %v9511_v8  ;;  %v2152_v52 = vadd.f32 %v10713_v31, %v10712_v48  ;;  %v10714_v43 = vld [vmem:[#allocation91_spill] sm:$0xff] }
 0x22e   : > { %3415 = vst [vmem:[#allocation2 + $0x28] sm:$0xff] %v3389_v37  ;;  %v3388_v50 = vmul.f32 %v9486_v12, %v3206_v60  ;;  %v3209_v57 = vmax.f32 %v3183_v3, 0.0  ;;  %v3182_v21 = vadd.f32 %v9520_v62, %v3097_v0  ;;  %v3100_v44 = vadd.f32 %v7600_v18, %v2782_v56  ;;  %7661 = vmatmul.mubr.f32.gmra.mxu1 %v3387_v40  ;;  %v9630_v60 = vpop.permute.xlu0 %3316  ;;  %v3709_v3 = vld [vmem:[#allocation9 + $0xd8] sm:$0xff]  ;;  %v9632_v0 = vpop.f32.mrf.mxu1  ;;  %v10721_v18 = vld [vmem:[#allocation94_spill] sm:$0xff] }
 0x22f   : > { %v2468_v5 = vadd.f32 %v10714_v43, %v2150_v13  ;;  %v2784_v28 = vadd.f32 %v9422_v30, %v2466_v24  ;;  %v3002_v12 = vpop.f32.mrf.mxu0  ;;  %v3939_v58 = vld [vmem:[#allocation2 + $0x2] sm:$0xff]  ;;  %7692 = vmatpush3.msra.mxu1 %v3711_v53  ;;  %v2151_v46 = vadd.f32 %v10715_v32, %v9572_v25  ;;  %v10717_v24 = vld [vmem:[#allocation93_spill] sm:$0xff]  ;;  %v2783_v53 = vadd.f32 %v9433_v2, %v2465_v23  ;;  %v10720_v2 = vld [vmem:[#allocation68_spill] sm:$0xff] }
 0x230   : > { %3414 = vst [vmem:[#allocation2 + $0x20] sm:$0xff] %v3388_v50  ;;  %v3391_v40 = vmul.f32 %v9515_v41, %v3209_v57  ;;  %v3208_v11 = vmax.f32 %v3182_v21, 0.0  ;;  %v3185_v56 = vadd.f32 %v9520_v62, %v3100_v44  ;;  %v3099_v8 = vadd.f32 %v3002_v12, %v2781_v27  ;;  %7781 = vmatprep.mubr.f32.mxu0 %v3939_v58  ;;  %v10716_v13 = vld [vmem:[#allocation66_spill] sm:$0xff]  ;;  %v10719_v27 = vld [vmem:[#allocation67_spill] sm:$0xff]  ;;  %v9654_v58 = vpop.f32.mrf.mxu1  ;;  %v10724_v32 = vld [vmem:[#allocation61_spill] sm:$0xff] }
 0x231   : > { %7663 = vmatprep.mubr.f32.mxu1 %v3388_v50  ;;  %v9626_v30 = vadd.f32 %v10716_v13, %v9523_v33  ;;  %v2467_v20 = vadd.f32 %v10717_v24, %v2149_v34  ;;  %v7603_v41 = vpop.f32.mrf.mxu0  ;;  %7693 = vmatprep.subr.mxu1 %v3710_v16  ;;  %v10718_v33 = vld [vmem:[#allocation57_spill] sm:$0xff]  ;;  %v2153_v23 = vadd.f32 %v10720_v2, %v9584_v47  ;;  %v3708_v43 = vld [vmem:[#allocation9 + $0xd0] sm:$0xff]  ;;  %v10729_v2 = vld [vmem:[#allocation100_spill] sm:$0xff] }
 0x232   : > { %3417 = vst [vmem:[#allocation2 + $0x38] sm:$0xff] %v3391_v40  ;;  %v3390_v22 = vmul.f32 %v9536_v4, %v3208_v11  ;;  %v3211_v49 = vmax.f32 %v3185_v56, 0.0  ;;  %v3184_v25 = vadd.f32 %v9520_v62, %v3099_v8  ;;  %v3102_v15 = vadd.f32 %v7603_v41, %v2784_v28  ;;  %7664 = vmatmul.mubr.f32.gmra.mxu1 %v3389_v37  ;;  %v10722_v47 = vld [vmem:[#allocation70_spill] sm:$0xff]  ;;  %v9652_v28 = vpop.permute.xlu1 %3331  ;;  %v10726_v13 = vld [vmem:[#allocation97_spill] sm:$0xff] }
 0x233   : > { %v2154_v34 = vadd.f32 %v10719_v27, %v10718_v33  ;;  %v2470_v50 = vadd.f32 %v10721_v18, %v2152_v52  ;;  %v2786_v57 = vadd.f32 %v9467_v14, %v2468_v5  ;;  %v3012_v21 = vpop.f32.mrf.mxu0  ;;  %7694 = vmatpush3.msra.mxu1 %v3710_v16  ;;  %v9648_v52 = vadd.f32 %v10722_v47, %v9531_v39  ;;  %v10723_v14 = vld [vmem:[#allocation96_spill] sm:$0xff]  ;;  %v4498_v12 = vld [vmem:[#allocation9 + $0x270] sm:$0xff]  ;;  %v3707_v33 = vld [vmem:[#allocation9 + $0xc8] sm:$0xff] }
 0x234   : > { %3416 = vst [vmem:[#allocation2 + $0x30] sm:$0xff] %v3390_v22  ;;  %v9643_v4 = vmul.f32 %v9556_v17, %v3211_v49  ;;  %v3210_v44 = vmax.f32 %v3184_v25, 0.0  ;;  %v3187_v45 = vadd.f32 %v9520_v62, %v3102_v15  ;;  %v3101_v37 = vadd.f32 %v3012_v21, %v2783_v53  ;;  %v3940_v48 = vld [vmem:[#allocation2 + $0xa] sm:$0xff]  ;;  %v3941_v31 = vld [vmem:[#allocation2 + $0x12] sm:$0xff]  ;;  %7695 = vmatprep.subr.mxu1 %v3709_v3  ;;  %v9663_v53 = vpop.permute.xlu0 %3326 }
 0x235   : > { %7666 = vmatprep.mubr.f32.mxu1 %v3390_v22  ;;  %v2469_v5 = vadd.f32 %v10723_v14, %v2151_v46  ;;  %v2785_v16 = vadd.f32 %v9495_v1, %v2467_v20  ;;  %v7606_v17 = vpop.f32.mrf.mxu0  ;;  %7782 = vmatmul.mubr.f32.vlgmr.msra.gmra.mxu0 %v3940_v48  ;;  %v10725_v1 = vld [vmem:[#allocation71_spill] sm:$0xff]  ;;  %v2472_v24 = vadd.f32 %v10726_v13, %v2154_v34  ;;  %v10727_v49 = vld [vmem:[#allocation45_spill] sm:$0xff]  ;;  %v10728_v27 = vld [vmem:[#allocation72_spill] sm:$0xff] }
 0x236   : > { %7696 = vmatpush3.msra.mxu1 %v3709_v3  ;;  %3419 = vst [vmem:[#allocation2 + $0x48] sm:$0xff] %v9643_v4  ;;  %v3392_v11 = vmul.f32 %v9565_v36, %v3210_v44  ;;  %v3213_v56 = vmax.f32 %v3187_v45, 0.0  ;;  %v3186_v39 = vadd.f32 %v9520_v62, %v3101_v37  ;;  %v3104_v8 = vadd.f32 %v7606_v17, %v2786_v57 }
 0x237   : > { %7784 = vmatprep.mubr.f32.mxu0 %v3941_v31  ;;  %7667 = vmatmul.mubr.f32.gmra.mxu1 %v3391_v40  ;;  %v2156_v46 = vadd.f32 %v10725_v1, %v10724_v32  ;;  %v2788_v20 = vadd.f32 %v9528_v9, %v2470_v50  ;;  %v3022_v41 = vpop.f32.mrf.mxu0  ;;  %v3942_v3 = vld [vmem:[#allocation2 + $0x1a] sm:$0xff]  ;;  %v3943_v22 = vld [vmem:[#allocation2 + $0x22] sm:$0xff]  ;;  %v2155_v34 = vadd.f32 %v10728_v27, %v9612_v6 }
 0x238   : > { %7874 = vmatpush3.msra.mxu0 %v10727_v49  ;;  %7697 = vmatprep.subr.mxu1 %v3708_v43  ;;  %3418 = vst [vmem:[#allocation2 + $0x40] sm:$0xff] %v3392_v11  ;;  %v9667_v36 = vmul.f32 %v9587_v51, %v3213_v56  ;;  %v3212_v40 = vmax.f32 %v3186_v39, 0.0  ;;  %v3189_v25 = vadd.f32 %v9520_v62, %v3104_v8  ;;  %v4497_v9 = vld [vmem:[#allocation9 + $0x268] sm:$0xff]  ;;  %v9674_v51 = vpop.f32.mrf.mxu1  ;;  %v10730_v6 = vld [vmem:[#allocation74_spill] sm:$0xff]  ;;  %v10733_v56 = vld [vmem:[#allocation75_spill] sm:$0xff] }
 0x239   : > { %v3103_v15 = vadd.f32 %v3022_v41, %v2785_v16  ;;  %7875 = vmatprep.subr.mxu0 %v4498_v12  ;;  %7698 = vmatpush3.msra.mxu1 %v3708_v43  ;;  %v2471_v18 = vadd.f32 %v10729_v2, %v2153_v23  ;;  %v2787_v50 = vadd.f32 %v9549_v29, %v2469_v5  ;;  %v7609_v57 = vpop.f32.mrf.mxu0  ;;  %v10731_v29 = vld [vmem:[#allocation101_spill] sm:$0xff]  ;;  %v9685_v43 = vpop.permute.xlu1 %3341  ;;  %v10734_v8 = vld [vmem:[#allocation102_spill] sm:$0xff] }
 0x23a   : > { %7785 = vmatmul.mubr.f32.gmra.mxu0 %v3942_v3  ;;  %7669 = vmatprep.mubr.f32.mxu1 %v3392_v11  ;;  %3421 = vst [vmem:[#allocation2 + $0x58] sm:$0xff] %v9667_v36  ;;  %v3394_v21 = vmul.f32 %v9598_v7, %v3212_v40  ;;  %v3215_v44 = vmax.f32 %v3189_v25, 0.0  ;;  %v3106_v37 = vadd.f32 %v7609_v57, %v2788_v20  ;;  %v4496_v7 = vld [vmem:[#allocation9 + $0x260] sm:$0xff]  ;;  %v10732_v11 = vld [vmem:[#allocation65_spill] sm:$0xff]  ;;  %v4495_v3 = vld [vmem:[#allocation9 + $0x258] sm:$0xff] }
 0x23b   : > { %v3188_v45 = vadd.f32 %v9520_v62, %v3103_v15  ;;  %7787 = vmatprep.mubr.f32.mxu0 %v3943_v22  ;;  %7876 = vmatpush3.msra.mxu0 %v4498_v12  ;;  %v9681_v23 = vadd.f32 %v10730_v6, %v9542_v10  ;;  %v2474_v48 = vadd.f32 %v10731_v29, %v2156_v46  ;;  %v3032_v47 = vpop.f32.mrf.mxu0  ;;  %v3944_v14 = vld [vmem:[#allocation2 + $0x2a] sm:$0xff]  ;;  %v3945_v5 = vld [vmem:[#allocation2 + $0x32] sm:$0xff]  ;;  %v9696_v46 = vpop.permute.xlu0 %3336 }
 0x23c   : > { %v2790_v31 = vadd.f32 %v9568_v19, %v2472_v24  ;;  %7699 = vmatprep.subr.mxu1 %v3707_v33  ;;  %7877 = vmatprep.subr.mxu0 %v4497_v9  ;;  %3420 = vst [vmem:[#allocation2 + $0x50] sm:$0xff] %v3394_v21  ;;  %v9688_v16 = vmul.f32 %v9618_v38, %v3215_v44  ;;  %v3706_v19 = vld [vmem:[#allocation9 + $0xc0] sm:$0xff]  ;;  %v9698_v38 = vpop.f32.mrf.mxu1  ;;  %v10736_v2 = vld [vmem:[#allocation69_spill] sm:$0xff] }
 0x23d   : > { %v3214_v17 = vmax.f32 %v3188_v45, 0.0  ;;  %v3191_v10 = vadd.f32 %v9520_v62, %v3106_v37  ;;  %v3105_v12 = vadd.f32 %v3032_v47, %v2787_v50  ;;  %7670 = vmatmul.mubr.f32.gmra.mxu1 %v9643_v4  ;;  %7878 = vmatpush3.msra.mxu0 %v4497_v9  ;;  %v2158_v39 = vadd.f32 %v10733_v56, %v10732_v11  ;;  %v7612_v13 = vpop.f32.mrf.mxu0  ;;  %v3352_v57 = vpop.permute.xlu1 %3351 }
 0x23e   : > { %v2473_v32 = vadd.f32 %v10734_v8, %v2155_v34  ;;  %v2789_v1 = vadd.f32 %v9590_v61, %v2471_v18  ;;  %7788 = vmatmul.mubr.f32.gmra.mxu0 %v3944_v14  ;;  %7700 = vmatpush3.msra.mxu1 %v3707_v33  ;;  %3423 = vst [vmem:[#allocation2 + $0x68] sm:$0xff] %v9688_v16  ;;  %v10735_v61 = vld [vmem:[#allocation76_spill] sm:$0xff]  ;;  %v2754_v45 = vpop.f32.mrf.mxu1 }
 0x23f   : > { %v3396_v4 = vmul.f32 %v9630_v60, %v3214_v17  ;;  %v3217_v24 = vmax.f32 %v3191_v10, 0.0  ;;  %v3190_v20 = vadd.f32 %v9520_v62, %v3105_v12  ;;  %v3108_v41 = vadd.f32 %v7612_v13, %v2790_v31  ;;  %7790 = vmatprep.mubr.f32.mxu0 %v3945_v5  ;;  %7879 = vmatprep.subr.mxu0 %v4496_v7  ;;  %v3042_v25 = vpop.f32.mrf.mxu0  ;;  %v3946_v15 = vld [vmem:[#allocation2 + $0x3a] sm:$0xff]  ;;  %v3947_v33 = vld [vmem:[#allocation2 + $0x42] sm:$0xff]  ;;  %v3347_v47 = vpop.permute.xlu0 %3346 }
 0x240   : > { %v2157_v22 = vadd.f32 %v10735_v61, %v9626_v30  ;;  %v2476_v49 = vadd.f32 %v9430_v63, %v2158_v39  ;;  %v2792_v40 = vadd.f32 %v9606_v55, %v2474_v48  ;;  %7701 = vmatprep.subr.mxu1 %v3706_v19  ;;  %7880 = vmatpush3.msra.mxu0 %v4496_v7  ;;  %v3705_v30 = vld [vmem:[#allocation9 + $0xb8] sm:$0xff]  ;;  %v10737_v63 = vld [vmem:[#allocation77_spill] sm:$0xff] }
 0x241   : > { %3422 = vst [vmem:[#allocation2 + $0x60] sm:$0xff] %v3396_v4  ;;  %v9708_v60 = vmul.f32 %v9652_v28, %v3217_v24  ;;  %v3216_v9 = vmax.f32 %v3190_v20, 0.0  ;;  %v3193_v27 = vadd.f32 %v9520_v62, %v3108_v41  ;;  %v3107_v34 = vadd.f32 %v3042_v25, %v2789_v1  ;;  %7672 = vmatprep.mubr.f32.mxu1 %v3394_v21  ;;  %v7615_v44 = vpop.f32.mrf.mxu0  ;;  %v4494_v28 = vld [vmem:[#allocation9 + $0x250] sm:$0xff]  ;;  %v10740_v12 = vld [vmem:[#allocation79_spill] sm:$0xff]  ;;  %v10741_v24 = vld [vmem:[#allocation80_spill] sm:$0xff] }
 0x242   : > { %7702 = vmatpush3.msra.mxu1 %v3706_v19  ;;  %v2160_v18 = vadd.f32 %v10737_v63, %v10736_v2  ;;  %v2475_v55 = vadd.f32 %v9442_v59, %v2157_v22  ;;  %v2791_v50 = vadd.f32 %v9632_v0, %v2473_v32  ;;  %7791 = vmatmul.mubr.f32.gmra.mxu0 %v3946_v15  ;;  %v10738_v59 = vld [vmem:[#allocation78_spill] sm:$0xff]  ;;  %v3703_v61 = vld [vmem:[#allocation9 + $0xa8] sm:$0xff] }
 0x243   : > { %7881 = vmatprep.subr.mxu0 %v4495_v3  ;;  %3425 = vst [vmem:[#allocation2 + $0x78] sm:$0xff] %v9708_v60  ;;  %v9717_v37 = vmul.f32 %v9663_v53, %v3216_v9  ;;  %v3219_v21 = vmax.f32 %v3193_v27, 0.0  ;;  %v3192_v6 = vadd.f32 %v9520_v62, %v3107_v34  ;;  %v3110_v29 = vadd.f32 %v7615_v44, %v2792_v40  ;;  %v3052_v14 = vpop.f32.mrf.mxu0  ;;  %v3948_v5 = vld [vmem:[#allocation2 + $0x4a] sm:$0xff]  ;;  %v3949_v53 = vld [vmem:[#allocation2 + $0x52] sm:$0xff]  ;;  %v3357_v15 = vpop.permute.xlu0 %3356 }
 0x244   : > { %7793 = vmatprep.mubr.f32.mxu0 %v3947_v33  ;;  %7673 = vmatmul.mubr.f32.gmra.mxu1 %v9667_v36  ;;  %v2159_v0 = vadd.f32 %v10738_v59, %v9648_v52  ;;  %v2478_v48 = vadd.f32 %v9458_v42, %v2160_v18  ;;  %v2794_v31 = vadd.f32 %v9654_v58, %v2476_v49  ;;  %v3704_v42 = vld [vmem:[#allocation9 + $0xb0] sm:$0xff]  ;;  %v4493_v52 = vld [vmem:[#allocation9 + $0x248] sm:$0xff] }
 0x245   : > { %7703 = vmatprep.subr.mxu1 %v3705_v30  ;;  %7882 = vmatpush3.msra.mxu0 %v4495_v3  ;;  %3424 = vst [vmem:[#allocation2 + $0x70] sm:$0xff] %v9717_v37  ;;  %v9727_v7 = vmul.f32 %v9685_v43, %v3219_v21  ;;  %v3218_v17 = vmax.f32 %v3192_v6, 0.0  ;;  %v3195_v36 = vadd.f32 %v9520_v62, %v3110_v29  ;;  %v10739_v58 = vld [vmem:[#allocation73_spill] sm:$0xff]  ;;  %v7618_v39 = vpop.f32.mrf.mxu0  ;;  %v7553_v43 = vpop.f32.mrf.mxu1  ;;  %v4490_v59 = vld [vmem:[#allocation9 + $0x230] sm:$0xff] }
 0x246   : > { %v3109_v10 = vadd.f32 %v3052_v14, %v2791_v50  ;;  %7704 = vmatpush3.msra.mxu1 %v3705_v30  ;;  %7883 = vmatprep.subr.mxu0 %v4494_v28  ;;  %v2162_v19 = vadd.f32 %v10740_v12, %v10739_v58  ;;  %v2477_v11 = vadd.f32 %v9476_v54, %v2159_v0  ;;  %v3701_v14 = vld [vmem:[#allocation9 + $0x98] sm:$0xff] }
 0x247   : > { %v2793_v56 = vadd.f32 %v9674_v51, %v2475_v55  ;;  %7794 = vmatmul.mubr.f32.gmra.mxu0 %v3948_v5  ;;  %7675 = vmatprep.mubr.f32.mxu1 %v3396_v4  ;;  %3427 = vst [vmem:[#allocation2 + $0x88] sm:$0xff] %v9727_v7  ;;  %v9736_v8 = vmul.f32 %v9696_v46, %v3218_v17  ;;  %v3221_v32 = vmax.f32 %v3195_v36, 0.0  ;;  %v3362_v4 = vpop.permute.xlu1 %3361  ;;  %v3062_v41 = vpop.f32.mrf.mxu0  ;;  %v3702_v55 = vld [vmem:[#allocation9 + $0xa0] sm:$0xff] }
 0x248   : > { %v3194_v1 = vadd.f32 %v9520_v62, %v3109_v10  ;;  %v3112_v13 = vadd.f32 %v7618_v39, %v2794_v31  ;;  %7796 = vmatprep.mubr.f32.mxu0 %v3949_v53  ;;  %7884 = vmatpush3.msra.mxu0 %v4494_v28  ;;  %v2161_v54 = vadd.f32 %v10741_v24, %v9681_v23  ;;  %v9743_v3 = vld [vmem:[#allocation2 + $0x5a] sm:$0xff]  ;;  %v3951_v46 = vld [vmem:[#allocation2 + $0x62] sm:$0xff]  ;;  %v2764_v9 = vpop.f32.mrf.mxu1  ;;  %v3367_v5 = vpop.permute.xlu0 %3366 }
 0x249   : > { %v2480_v51 = vadd.f32 %v9488_v35, %v2162_v19  ;;  %v2796_v20 = vadd.f32 %v9698_v38, %v2478_v48  ;;  %7705 = vmatprep.subr.mxu1 %v3704_v42  ;;  %7885 = vmatprep.subr.mxu0 %v4493_v52  ;;  %3426 = vst [vmem:[#allocation2 + $0x80] sm:$0xff] %v9736_v8  ;;  %v4492_v35 = vld [vmem:[#allocation9 + $0x240] sm:$0xff]  ;;  %v7621_v33 = vpop.f32.mrf.mxu0 }
 0x24a   : > { %v9746_v22 = vmul.f32 %v3352_v57, %v3221_v32  ;;  %v3220_v49 = vmax.f32 %v3194_v1, 0.0  ;;  %v3197_v40 = vadd.f32 %v9520_v62, %v3112_v13  ;;  %v3111_v23 = vadd.f32 %v3062_v41, %v2793_v56  ;;  %7676 = vmatmul.mubr.f32.gmra.mxu1 %v9688_v16  ;;  %7886 = vmatpush3.msra.mxu0 %v4493_v52  ;;  %v4491_v16 = vld [vmem:[#allocation9 + $0x238] sm:$0xff]  ;;  %v3700_v56 = vld [vmem:[#allocation9 + $0x90] sm:$0xff] }
 0x24b   : > { %v2479_v38 = vadd.f32 %v9501_v26, %v2161_v54  ;;  %v2795_v25 = vadd.f32 %v2754_v45, %v2477_v11  ;;  %7797 = vmatmul.mubr.f32.gmra.mxu0 %v9743_v3  ;;  %7706 = vmatpush3.msra.mxu1 %v3704_v42  ;;  %v3114_v2 = vadd.f32 %v7621_v33, %v2796_v20  ;;  %v3072_v26 = vpop.f32.mrf.mxu0  ;;  %v3372_v6 = vpop.permute.xlu1 %3371  ;;  %v3677_v41 = vld [vmem:[#allocation2 + $0x1] sm:$0xff] }
 0x24c   : > { %3429 = vst [vmem:[#allocation2 + $0x98] sm:$0xff] %v9746_v22  ;;  %v9753_v27 = vmul.f32 %v3347_v47, %v3220_v49  ;;  %v3223_v34 = vmax.f32 %v3197_v40, 0.0  ;;  %v3196_v30 = vadd.f32 %v9520_v62, %v3111_v23  ;;  %7799 = vmatprep.mubr.f32.mxu0 %v3951_v46  ;;  %7707 = vmatprep.subr.mxu1 %v3703_v61  ;;  %v9756_v18 = vld [vmem:[#allocation2 + $0x6a] sm:$0xff]  ;;  %v9763_v45 = vld [vmem:[#allocation2 + $0x72] sm:$0xff]  ;;  %v3377_v13 = vpop.permute.xlu0 %3376  ;;  %v4464_v33 = vld [vmem:[#allocation2 + $0x1d] sm:$0xff] }
 0x24d   : > { %v2798_v63 = vadd.f32 %v7553_v43, %v2480_v51  ;;  %7887 = vmatprep.subr.mxu0 %v4492_v35  ;;  %7708 = vmatpush3.msra.mxu1 %v3703_v61  ;;  %v3199_v44 = vadd.f32 %v9520_v62, %v3114_v2  ;;  %v3113_v28 = vadd.f32 %v3072_v26, %v2795_v25  ;;  %v7624_v29 = vpop.f32.mrf.mxu0  ;;  %v4488_v43 = vld [vmem:[#allocation9 + $0x220] sm:$0xff]  ;;  %v4487_v51 = vld [vmem:[#allocation9 + $0x218] sm:$0xff]  ;;  %v4485_v61 = vld [vmem:[#allocation9 + $0x208] sm:$0xff] }
 0x24e   : > { %3428 = vst [vmem:[#allocation2 + $0x90] sm:$0xff] %v9753_v27  ;;  %v9759_v50 = vmul.f32 %v3362_v4, %v3223_v34  ;;  %v3222_v57 = vmax.f32 %v3196_v30, 0.0  ;;  %7888 = vmatpush3.msra.mxu0 %v4492_v35  ;;  %7678 = vmatprep.mubr.f32.mxu1 %v9717_v37  ;;  %v2797_v21 = vadd.f32 %v2764_v9, %v2479_v38  ;;  %v3698_v4 = vld [vmem:[#allocation9 + $0x80] sm:$0xff]  ;;  %v4237_v49 = vld [vmem:[#allocation9 + $0x1f8] sm:$0xff]  ;;  %v4236_v38 = vld [vmem:[#allocation9 + $0x1f0] sm:$0xff] }
 0x24f   : > { %7800 = vmatmul.mubr.f32.gmra.mxu0 %v9756_v18  ;;  %7889 = vmatprep.subr.mxu0 %v4491_v16  ;;  %v3225_v48 = vmax.f32 %v3199_v44, 0.0  ;;  %v3198_v31 = vadd.f32 %v9520_v62, %v3113_v28  ;;  %v3116_v47 = vadd.f32 %v7624_v29, %v2798_v63  ;;  %v3082_v53 = vpop.f32.mrf.mxu0  ;;  %v3382_v39 = vpop.permute.xlu1 %3381  ;;  %v3678_v40 = vld [vmem:[#allocation2 + $0x9] sm:$0xff]  ;;  %v4463_v23 = vld [vmem:[#allocation2 + $0x15] sm:$0xff]  ;;  %v3681_v2 = vld [vmem:[#allocation2 + $0x21] sm:$0xff] }
 0x250   : > { %3431 = vst [vmem:[#allocation2 + $0xa8] sm:$0xff] %v9759_v50  ;;  %v9767_v0 = vmul.f32 %v3357_v15, %v3222_v57  ;;  %7679 = vmatmul.mubr.f32.gmra.mxu1 %v9708_v60  ;;  %7709 = vmatprep.subr.mxu1 %v3702_v55  ;;  %v3115_v42 = vadd.f32 %v3082_v53, %v2797_v21  ;;  %v9776_v52 = vld [vmem:[#allocation2 + $0x7a] sm:$0xff]  ;;  %v9778_v58 = vld [vmem:[#allocation2 + $0x82] sm:$0xff]  ;;  %v4484_v35 = vld [vmem:[#allocation9 + $0x200] sm:$0xff] }
 0x251   : > { %7802 = vmatprep.mubr.f32.mxu0 %v9763_v45  ;;  %7890 = vmatpush3.msra.mxu0 %v4491_v16  ;;  %v9773_v17 = vmul.f32 %v3372_v6, %v3225_v48  ;;  %v3224_v36 = vmax.f32 %v3198_v31, 0.0  ;;  %v3201_v10 = vadd.f32 %v9520_v62, %v3116_v47  ;;  %v4489_v60 = vld [vmem:[#allocation9 + $0x228] sm:$0xff]  ;;  %v5023_v34 = vld [vmem:[#allocation9 + $0x378] sm:$0xff]  ;;  %v4234_v16 = vld [vmem:[#allocation9 + $0x1e0] sm:$0xff] }
 0x252   : > { %3430 = vst [vmem:[#allocation2 + $0xa0] sm:$0xff] %v9767_v0  ;;  %7710 = vmatpush3.msra.mxu1 %v3702_v55  ;;  %7891 = vmatprep.subr.mxu0 %v4490_v59  ;;  %v3200_v11 = vadd.f32 %v9520_v62, %v3115_v42  ;;  %v3699_v62 = vld [vmem:[#allocation9 + $0x88] sm:$0xff]  ;;  %v4465_v30 = vld [vmem:[#allocation2 + $0x25] sm:$0xff]  ;;  %v4466_v63 = vld [vmem:[#allocation2 + $0x2d] sm:$0xff] }
 0x253   : > { %7711 = vmatprep.subr.mxu1 %v3701_v14  ;;  %7892 = vmatpush3.msra.mxu0 %v4490_v59  ;;  %3433 = vst [vmem:[#allocation2 + $0xb8] sm:$0xff] %v9773_v17  ;;  %v9781_v12 = vmul.f32 %v3367_v5, %v3224_v36  ;;  %v3227_v19 = vmax.f32 %v3201_v10, 0.0  ;;  %v3679_v25 = vld [vmem:[#allocation2 + $0x11] sm:$0xff]  ;;  %v3680_v15 = vld [vmem:[#allocation2 + $0x19] sm:$0xff]  ;;  %v9803_v26 = vld [vmem:[#allocation2 + $0x29] sm:$0xff] }
 0x254   : > { %7681 = vmatprep.mubr.f32.mxu1 %v9736_v8  ;;  %7712 = vmatpush3.msra.mxu1 %v3701_v14  ;;  %v3226_v1 = vmax.f32 %v3200_v11, 0.0  ;;  %v4235_v9 = vld [vmem:[#allocation9 + $0x1e8] sm:$0xff]  ;;  %v4233_v57 = vld [vmem:[#allocation9 + $0x1d8] sm:$0xff]  ;;  %v5022_v44 = vld [vmem:[#allocation9 + $0x370] sm:$0xff] }
 0x255   : > { %7803 = vmatmul.mubr.f32.gmra.mxu0 %v9776_v52  ;;  %7893 = vmatprep.subr.mxu0 %v4489_v60  ;;  %3432 = vst [vmem:[#allocation2 + $0xb0] sm:$0xff] %v9781_v12  ;;  %v3409_v32 = vmul.f32 %v3382_v39, %v3227_v19  ;;  %v9789_v24 = vld [vmem:[#allocation2 + $0x8a] sm:$0xff]  ;;  %v9794_v20 = vld [vmem:[#allocation2 + $0x92] sm:$0xff]  ;;  %v4468_v21 = vld [vmem:[#allocation2 + $0x3d] sm:$0xff] }
 0x256   : > { %7682 = vmatmul.mubr.f32.gmra.mxu1 %v9727_v7  ;;  %7805 = vmatprep.mubr.f32.mxu0 %v9778_v58  ;;  %v9791_v54 = vmul.f32 %v3377_v13, %v3226_v1  ;;  %v4486_v7 = vld [vmem:[#allocation9 + $0x210] sm:$0xff]  ;;  %v4467_v55 = vld [vmem:[#allocation2 + $0x35] sm:$0xff]  ;;  %v4470_v14 = vld [vmem:[#allocation2 + $0x4d] sm:$0xff] }
 0x257   : > { %7894 = vmatpush3.msra.mxu0 %v4489_v60  ;;  %7713 = vmatprep.subr.mxu1 %v3700_v56  ;;  %3435 = vst [vmem:[#allocation2 + $0xc8] sm:$0xff] %v3409_v32  ;;  %v9806_v28 = vld [vmem:[#allocation2 + $0x31] sm:$0xff]  ;;  %v4232_v6 = vld [vmem:[#allocation9 + $0x1d0] sm:$0xff]  ;;  %v9815_v5 = vld [vmem:[#allocation2 + $0x49] sm:$0xff] }
 0x258   : > { %7895 = vmatprep.subr.mxu0 %v4488_v43  ;;  %7714 = vmatpush3.msra.mxu1 %v3700_v56  ;;  %3434 = vst [vmem:[#allocation2 + $0xc0] sm:$0xff] %v9791_v54  ;;  %v9809_v29 = vld [vmem:[#allocation2 + $0x39] sm:$0xff]  ;;  %v4469_v59 = vld [vmem:[#allocation2 + $0x45] sm:$0xff]  ;;  %v5020_v36 = vld [vmem:[#allocation9 + $0x360] sm:$0xff] }
 0x259   : > { %7896 = vmatpush3.msra.mxu0 %v4488_v43  ;;  %7684 = vmatprep.mubr.f32.mxu1 %v9753_v27  ;;  %v9800_v46 = vld [vmem:[#allocation2 + $0x9a] sm:$0xff]  ;;  %v4230_v10 = vld [vmem:[#allocation9 + $0x1c0] sm:$0xff]  ;;  %v5019_v60 = vld [vmem:[#allocation9 + $0x358] sm:$0xff] }
 0x25a   : > { %7715 = vmatprep.subr.mxu1 %v3699_v62  ;;  %7806 = vmatmul.mubr.f32.gmra.mxu0 %v9789_v24  ;;  %v9812_v48 = vld [vmem:[#allocation2 + $0x41] sm:$0xff]  ;;  %v4231_v31 = vld [vmem:[#allocation9 + $0x1c8] sm:$0xff] }
 0x25b   : > { %7897 = vmatprep.subr.mxu0 %v4487_v51  ;;  %7685 = vmatmul.mubr.f32.gmra.mxu1 %v9746_v22  ;;  %v5021_v47 = vld [vmem:[#allocation9 + $0x368] sm:$0xff]  ;;  %v4229_v19 = vld [vmem:[#allocation9 + $0x1b8] sm:$0xff]  ;;  %v5018_v43 = vld [vmem:[#allocation9 + $0x350] sm:$0xff] }
 0x25c   : > { %7716 = vmatpush3.msra.mxu1 %v3699_v62  ;;  %7808 = vmatprep.mubr.f32.mxu0 %v9794_v20  ;;  %v4471_v53 = vld [vmem:[#allocation2 + $0x55] sm:$0xff]  ;;  %v4472_v11 = vld [vmem:[#allocation2 + $0x5d] sm:$0xff]  ;;  %v4473_v39 = vld [vmem:[#allocation2 + $0x65] sm:$0xff] }
 0x25d   : > { %7898 = vmatpush3.msra.mxu0 %v4487_v51  ;;  %7719 = vmatprep.mubr.f32.mxu1 %v3677_v41  ;;  %v9818_v42 = vld [vmem:[#allocation2 + $0x51] sm:$0xff]  ;;  %v9821_v56 = vld [vmem:[#allocation2 + $0x59] sm:$0xff]  ;;  %v9824_v1 = vld [vmem:[#allocation2 + $0x61] sm:$0xff] }
 0x25e   : > { %7899 = vmatprep.subr.mxu0 %v4486_v7  ;;  %7717 = vmatprep.subr.mxu1 %v3698_v4  ;;  %v4228_v32 = vld [vmem:[#allocation9 + $0x1b0] sm:$0xff]  ;;  %v5017_v13 = vld [vmem:[#allocation9 + $0x348] sm:$0xff]  ;;  %v9827_v62 = vld [vmem:[#allocation2 + $0x69] sm:$0xff] }
 0x25f   : > { %7900 = vmatpush3.msra.mxu0 %v4486_v7  ;;  %7718 = vmatpush3.msra.mxu1 %v3698_v4  ;;  %v4474_v51 = vld [vmem:[#allocation2 + $0x6d] sm:$0xff]  ;;  %v4475_v7 = vld [vmem:[#allocation2 + $0x75] sm:$0xff] }
 0x260   : > { %7809 = vmatmul.mubr.f32.gmra.mxu0 %v9800_v46  ;;  %7901 = vmatprep.subr.mxu0 %v4485_v61  ;;  %v4227_v4 = vld [vmem:[#allocation9 + $0x1a8] sm:$0xff]  ;;  %v5016_v41 = vld [vmem:[#allocation9 + $0x340] sm:$0xff] }
 0x261   : > { %7720 = vmatmul.mubr.f32.vlgmr.msra.gmra.mxu1 %v3678_v40  ;;  %7811 = vmatprep.subr.mxu1 %v4237_v49  ;;  %v4226_v40 = vld [vmem:[#allocation9 + $0x1a0] sm:$0xff] }
 0x262   : > { %7902 = vmatpush3.msra.mxu0 %v4485_v61  ;;  %7905 = vmatprep.mubr.f32.mxu0 %v4463_v23  ;;  %v9830_v61 = vld [vmem:[#allocation2 + $0x71] sm:$0xff]  ;;  %v4476_v23 = vld [vmem:[#allocation2 + $0x7d] sm:$0xff] }
 0x263   : > { %7722 = vmatprep.mubr.f32.mxu1 %v3679_v25  ;;  %7812 = vmatpush3.msra.mxu1 %v4237_v49  ;;  %v5015_v49 = vld [vmem:[#allocation9 + $0x338] sm:$0xff]  ;;  %v5014_v25 = vld [vmem:[#allocation9 + $0x330] sm:$0xff] }
 0x264   : > { %7903 = vmatprep.subr.mxu0 %v4484_v35  ;;  %7813 = vmatprep.subr.mxu1 %v4236_v38 }
 0x265   : > { %7904 = vmatpush3.msra.mxu0 %v4484_v35  ;;  %7723 = vmatmul.mubr.f32.gmra.mxu1 %v3680_v15  ;;  %v9833_v35 = vld [vmem:[#allocation2 + $0x79] sm:$0xff]  ;;  %v4225_v15 = vld [vmem:[#allocation9 + $0x198] sm:$0xff] }
 0x266   : > { %7906 = vmatmul.mubr.f32.vlgmr.msra.gmra.mxu0 %v4464_v33  ;;  %7814 = vmatpush3.msra.mxu1 %v4236_v38  ;;  %v4477_v38 = vld [vmem:[#allocation2 + $0x85] sm:$0xff] }
 0x267   : > { %7908 = vmatprep.mubr.f32.mxu0 %v4465_v30  ;;  %7725 = vmatprep.mubr.f32.mxu1 %v3681_v2  ;;  %v9836_v33 = vld [vmem:[#allocation2 + $0x81] sm:$0xff]  ;;  %v9839_v2 = vld [vmem:[#allocation2 + $0x89] sm:$0xff] }
 0x268   : > { %7815 = vmatprep.subr.mxu1 %v4235_v9  ;;  %7997 = vmatprep.subr.mxu0 %v5023_v34  ;;  %v4224_v30 = vld [vmem:[#allocation9 + $0x190] sm:$0xff] }
 0x269   : > { %7816 = vmatpush3.msra.mxu1 %v4235_v9  ;;  %7998 = vmatpush3.msra.mxu0 %v5023_v34  ;;  %v5013_v9 = vld [vmem:[#allocation9 + $0x328] sm:$0xff]  ;;  %v4478_v34 = vld [vmem:[#allocation2 + $0x8d] sm:$0xff] }
 0x26a   : > { %7909 = vmatmul.mubr.f32.gmra.mxu0 %v4466_v63  ;;  %7726 = vmatmul.mubr.f32.gmra.mxu1 %v9803_v26  ;;  %v5012_v63 = vld [vmem:[#allocation9 + $0x320] sm:$0xff] }
 0x26b   : > { %7817 = vmatprep.subr.mxu1 %v4234_v16  ;;  %7911 = vmatprep.mubr.f32.mxu0 %v4467_v55  ;;  %v9842_v55 = vld [vmem:[#allocation2 + $0x91] sm:$0xff] }
 0x26c   : > { %7728 = vmatprep.mubr.f32.mxu1 %v9806_v28  ;;  %7818 = vmatpush3.msra.mxu1 %v4234_v16  ;;  %v4479_v16 = vld [vmem:[#allocation2 + $0x95] sm:$0xff] }
 0x26d   : > { %7819 = vmatprep.subr.mxu1 %v4233_v57  ;;  %7999 = vmatprep.subr.mxu0 %v5022_v44 }
 0x26e   : > { %7820 = vmatpush3.msra.mxu1 %v4233_v57  ;;  %7912 = vmatmul.mubr.f32.gmra.mxu0 %v4468_v21  ;;  %v4223_v57 = vld [vmem:[#allocation9 + $0x188] sm:$0xff] }
 0x26f   : > { %7729 = vmatmul.mubr.f32.gmra.mxu1 %v9809_v29  ;;  %7914 = vmatprep.mubr.f32.mxu0 %v4469_v59  ;;  %v4480_v21 = vld [vmem:[#allocation2 + $0x9d] sm:$0xff]  ;;  %v4481_v59 = vld [vmem:[#allocation2 + $0xa5] sm:$0xff] }
 0x270   : > { %7731 = vmatprep.mubr.f32.mxu1 %v9812_v48  ;;  %7821 = vmatprep.subr.mxu1 %v4232_v6 }
 0x271   : > { %7822 = vmatpush3.msra.mxu1 %v4232_v6  ;;  %8000 = vmatpush3.msra.mxu0 %v5022_v44  ;;  %v5011_v44 = vld [vmem:[#allocation9 + $0x318] sm:$0xff]  ;;  %v9845_v6 = vld [vmem:[#allocation2 + $0x99] sm:$0xff] }
 0x272   : > { %7823 = vmatprep.subr.mxu1 %v4231_v31  ;;  %7915 = vmatmul.mubr.f32.gmra.mxu0 %v4470_v14  ;;  %v4201_v14 = vld [vmem:[#allocation2 + $0x14] sm:$0xff] }
 0x273   : > { %8001 = vmatprep.subr.mxu0 %v5021_v47  ;;  %7732 = vmatmul.mubr.f32.gmra.mxu1 %v9815_v5 }
 0x274   : > { %7824 = vmatpush3.msra.mxu1 %v4231_v31  ;;  %7917 = vmatprep.mubr.f32.mxu0 %v4471_v53  ;;  %v5010_v31 = vld [vmem:[#allocation9 + $0x310] sm:$0xff]  ;;  %v5009_v53 = vld [vmem:[#allocation9 + $0x308] sm:$0xff] }
 0x275   : > { %8002 = vmatpush3.msra.mxu0 %v5021_v47  ;;  %7734 = vmatprep.mubr.f32.mxu1 %v9818_v42  ;;  %v4222_v47 = vld [vmem:[#allocation9 + $0x180] sm:$0xff] }
 0x276   : > { %8003 = vmatprep.subr.mxu0 %v5020_v36  ;;  %7825 = vmatprep.subr.mxu1 %v4230_v10 }
 0x277   : > { %8004 = vmatpush3.msra.mxu0 %v5020_v36  ;;  %7826 = vmatpush3.msra.mxu1 %v4230_v10  ;;  %v4761_v36 = vld [vmem:[#allocation9 + $0x2f8] sm:$0xff] }
 0x278   : > { %7918 = vmatmul.mubr.f32.gmra.mxu0 %v4472_v11  ;;  %8005 = vmatprep.subr.mxu0 %v5019_v60  ;;  %v4482_v10 = vld [vmem:[#allocation2 + $0xad] sm:$0xff] }
 0x279   : > { %7735 = vmatmul.mubr.f32.gmra.mxu1 %v9821_v56  ;;  %7827 = vmatprep.subr.mxu1 %v4229_v19  ;;  %v5008_v11 = vld [vmem:[#allocation9 + $0x300] sm:$0xff] }
 0x27a   : > { %7920 = vmatprep.mubr.f32.mxu0 %v4473_v39  ;;  %8006 = vmatpush3.msra.mxu0 %v5019_v60  ;;  %v4202_v60 = vld [vmem:[#allocation2 + $0x1c] sm:$0xff] }
 0x27b   : > { %7737 = vmatprep.mubr.f32.mxu1 %v9824_v1  ;;  %7828 = vmatpush3.msra.mxu1 %v4229_v19  ;;  %v4987_v19 = vld [vmem:[#allocation2 + $0x28] sm:$0xff]  ;;  %v4760_v39 = vld [vmem:[#allocation9 + $0x2f0] sm:$0xff] }
 0x27c   : > { %8007 = vmatprep.subr.mxu0 %v5018_v43  ;;  %7829 = vmatprep.subr.mxu1 %v4228_v32 }
 0x27d   : > { %8008 = vmatpush3.msra.mxu0 %v5018_v43  ;;  %7738 = vmatmul.mubr.f32.gmra.mxu1 %v9827_v62  ;;  %v4203_v43 = vld [vmem:[#allocation2 + $0x24] sm:$0xff] }
 0x27e   : > { %7921 = vmatmul.mubr.f32.gmra.mxu0 %v4474_v51  ;;  %8009 = vmatprep.subr.mxu0 %v5017_v13  ;;  %v4759_v51 = vld [vmem:[#allocation9 + $0x2e8] sm:$0xff] }
 0x27f   : > { %7830 = vmatpush3.msra.mxu1 %v4228_v32  ;;  %7923 = vmatprep.mubr.f32.mxu0 %v4475_v7  ;;  %v4204_v32 = vld [vmem:[#allocation2 + $0x2c] sm:$0xff] }
 0x280   : > { %8010 = vmatpush3.msra.mxu0 %v5017_v13  ;;  %7740 = vmatprep.mubr.f32.mxu1 %v9830_v61  ;;  %v4988_v13 = vld [vmem:[#allocation2 + $0x30] sm:$0xff]  ;;  %v9848_v7 = vld [vmem:[#allocation9 + $0x478] sm:$0xff] }
 0x281   : > { %7831 = vmatprep.subr.mxu1 %v4227_v4  ;;  %8011 = vmatprep.subr.mxu0 %v5016_v41 }
 0x282   : > { %7832 = vmatpush3.msra.mxu1 %v4227_v4  ;;  %8012 = vmatpush3.msra.mxu0 %v5016_v41  ;;  %v4989_v4 = vld [vmem:[#allocation2 + $0x38] sm:$0xff] }
 0x283   : > { %7924 = vmatmul.mubr.f32.gmra.mxu0 %v4476_v23  ;;  %8013 = vmatprep.subr.mxu0 %v5015_v49  ;;  %v4205_v41 = vld [vmem:[#allocation2 + $0x34] sm:$0xff]  ;;  %v4206_v23 = vld [vmem:[#allocation2 + $0x3c] sm:$0xff] }
 0x284   : > { %7741 = vmatmul.mubr.f32.gmra.mxu1 %v9833_v35  ;;  %7833 = vmatprep.subr.mxu1 %v4226_v40 }
 0x285   : > { %7926 = vmatprep.mubr.f32.mxu0 %v4477_v38  ;;  %8014 = vmatpush3.msra.mxu0 %v5015_v49  ;;  %v4758_v49 = vld [vmem:[#allocation9 + $0x2e0] sm:$0xff]  ;;  %v4991_v38 = vld [vmem:[#allocation2 + $0x48] sm:$0xff] }
 0x286   : > { %7743 = vmatprep.mubr.f32.mxu1 %v9836_v33  ;;  %7834 = vmatpush3.msra.mxu1 %v4226_v40  ;;  %v4990_v40 = vld [vmem:[#allocation2 + $0x40] sm:$0xff] }
 0x287   : > { %8015 = vmatprep.subr.mxu0 %v5014_v25  ;;  %7835 = vmatprep.subr.mxu1 %v4225_v15 }
 0x288   : > { %8016 = vmatpush3.msra.mxu0 %v5014_v25  ;;  %7836 = vmatpush3.msra.mxu1 %v4225_v15  ;;  %v4757_v25 = vld [vmem:[#allocation9 + $0x2d8] sm:$0xff]  ;;  %v9852_v15 = vld [vmem:[#allocation9 + $0x470] sm:$0xff] }
 0x289   : > { %7927 = vmatmul.mubr.f32.gmra.mxu0 %v4478_v34  ;;  %8017 = vmatprep.subr.mxu0 %v5013_v9  ;;  %v4992_v34 = vld [vmem:[#allocation2 + $0x50] sm:$0xff] }
 0x28a   : > { %7744 = vmatmul.mubr.f32.gmra.mxu1 %v9839_v2  ;;  %7929 = vmatprep.mubr.f32.mxu0 %v4479_v16  ;;  %v4208_v16 = vld [vmem:[#allocation2 + $0x4c] sm:$0xff] }
 0x28b   : > { %8018 = vmatpush3.msra.mxu0 %v5013_v9  ;;  %7746 = vmatprep.mubr.f32.mxu1 %v9842_v55  ;;  %v4207_v9 = vld [vmem:[#allocation2 + $0x44] sm:$0xff] }
 0x28c   : > { %7837 = vmatprep.subr.mxu1 %v4224_v30  ;;  %8019 = vmatprep.subr.mxu0 %v5012_v63 }
 0x28d   : > { %7838 = vmatpush3.msra.mxu1 %v4224_v30  ;;  %8020 = vmatpush3.msra.mxu0 %v5012_v63  ;;  %v4756_v30 = vld [vmem:[#allocation9 + $0x2d0] sm:$0xff]  ;;  %v4993_v63 = vld [vmem:[#allocation2 + $0x58] sm:$0xff] }
 0x28e   : > { %7839 = vmatprep.subr.mxu1 %v4223_v57  ;;  %7930 = vmatmul.mubr.f32.gmra.mxu0 %v4480_v21  ;;  %v9855_v21 = vld [vmem:[#allocation9 + $0x468] sm:$0xff] }
 0x28f   : > { %8021 = vmatprep.subr.mxu0 %v5011_v44  ;;  %7747 = vmatmul.mubr.f32.gmra.mxu1 %v9845_v6 }
 0x290   : > { %7840 = vmatpush3.msra.mxu1 %v4223_v57  ;;  %7932 = vmatprep.mubr.f32.mxu0 %v4481_v59  ;;  %v4209_v57 = vld [vmem:[#allocation2 + $0x54] sm:$0xff]  ;;  %v4994_v59 = vld [vmem:[#allocation2 + $0x60] sm:$0xff] }
 0x291   : > { %8022 = vmatpush3.msra.mxu0 %v5011_v44  ;;  %7843 = vmatprep.mubr.f32.mxu1 %v4201_v14  ;;  %v4755_v44 = vld [vmem:[#allocation9 + $0x2c8] sm:$0xff]  ;;  %v9859_v14 = vld [vmem:[#allocation9 + $0x460] sm:$0xff] }
 0x292   : > { %8023 = vmatprep.subr.mxu0 %v5010_v31  ;;  %7841 = vmatprep.subr.mxu1 %v4222_v47 }
 0x293   : > { %8024 = vmatpush3.msra.mxu0 %v5010_v31  ;;  %7842 = vmatpush3.msra.mxu1 %v4222_v47  ;;  %v4210_v31 = vld [vmem:[#allocation2 + $0x5c] sm:$0xff]  ;;  %v4995_v47 = vld [vmem:[#allocation2 + $0x68] sm:$0xff] }
 0x294   : > { %7933 = vmatmul.mubr.f32.gmra.mxu0 %v4482_v10  ;;  %8025 = vmatprep.subr.mxu0 %v5009_v53  ;;  %v9862_v10 = vld [vmem:[#allocation9 + $0x458] sm:$0xff] }
 0x295   : > { %7844 = vmatmul.mubr.f32.vlgmr.msra.gmra.mxu1 %v4202_v60  ;;  %7935 = vmatprep.subr.mxu1 %v4761_v36  ;;  %v4753_v60 = vld [vmem:[#allocation9 + $0x2b8] sm:$0xff] }
 0x296   : > { %8026 = vmatpush3.msra.mxu0 %v5009_v53  ;;  %8029 = vmatprep.mubr.f32.mxu0 %v4987_v19  ;;  %v4754_v53 = vld [vmem:[#allocation9 + $0x2c0] sm:$0xff] }
 0x297   : > { %7846 = vmatprep.mubr.f32.mxu1 %v4203_v43  ;;  %7936 = vmatpush3.msra.mxu1 %v4761_v36  ;;  %v4211_v36 = vld [vmem:[#allocation2 + $0x64] sm:$0xff]  ;;  %v4212_v19 = vld [vmem:[#allocation2 + $0x6c] sm:$0xff] }
 0x298   : > { %8027 = vmatprep.subr.mxu0 %v5008_v11  ;;  %7937 = vmatprep.subr.mxu1 %v4760_v39  ;;  %v4752_v43 = vld [vmem:[#allocation9 + $0x2b0] sm:$0xff] }
 0x299   : > { %8028 = vmatpush3.msra.mxu0 %v5008_v11  ;;  %7847 = vmatmul.mubr.f32.gmra.mxu1 %v4204_v32  ;;  %v4997_v11 = vld [vmem:[#allocation2 + $0x78] sm:$0xff] }
 0x29a   : > { %8030 = vmatmul.mubr.f32.vlgmr.msra.gmra.mxu0 %v4988_v13  ;;  %7938 = vmatpush3.msra.mxu1 %v4760_v39  ;;  %v9868_v39 = vld [vmem:[#allocation9 + $0x450] sm:$0xff]  ;;  %v4213_v32 = vld [vmem:[#allocation2 + $0x74] sm:$0xff] }
 0x29b   : > { %8032 = vmatprep.mubr.f32.mxu0 %v4989_v4  ;;  %7849 = vmatprep.mubr.f32.mxu1 %v4205_v41  ;;  %v9871_v13 = vld [vmem:[#allocation9 + $0x448] sm:$0xff]  ;;  %v9877_v41 = vld [vmem:[#allocation9 + $0x440] sm:$0xff] }
 0x29c   : > { %7939 = vmatprep.subr.mxu1 %v4759_v51  ;;  %8121 = vmatprep.subr.mxu0 %v9848_v7  ;;  %v4751_v4 = vld [vmem:[#allocation9 + $0x2a8] sm:$0xff] }
 0x29d   : > { %7940 = vmatpush3.msra.mxu1 %v4759_v51  ;;  %8122 = vmatpush3.msra.mxu0 %v9848_v7  ;;  %v4999_v51 = vld [vmem:[#allocation2 + $0x88] sm:$0xff] }
 0x29e   : > { %8033 = vmatmul.mubr.f32.gmra.mxu0 %v4990_v40  ;;  %7850 = vmatmul.mubr.f32.gmra.mxu1 %v4206_v23  ;;  %v9880_v40 = vld [vmem:[#allocation9 + $0x438] sm:$0xff]  ;;  %v4750_v23 = vld [vmem:[#allocation9 + $0x2a0] sm:$0xff] }
 0x29f   : > { %7941 = vmatprep.subr.mxu1 %v4758_v49  ;;  %8035 = vmatprep.mubr.f32.mxu0 %v4991_v38  ;;  %v9886_v38 = vld [vmem:[#allocation9 + $0x430] sm:$0xff] }
 0x2a0   : > { %7852 = vmatprep.mubr.f32.mxu1 %v4207_v9  ;;  %7942 = vmatpush3.msra.mxu1 %v4758_v49  ;;  %v4215_v49 = vld [vmem:[#allocation2 + $0x84] sm:$0xff]  ;;  %v4217_v9 = vld [vmem:[#allocation2 + $0x94] sm:$0xff] }
 0x2a1   : > { %7943 = vmatprep.subr.mxu1 %v4757_v25  ;;  %8123 = vmatprep.subr.mxu0 %v9852_v15 }
 0x2a2   : > { %7944 = vmatpush3.msra.mxu1 %v4757_v25  ;;  %8036 = vmatmul.mubr.f32.gmra.mxu0 %v4992_v34  ;;  %v4749_v25 = vld [vmem:[#allocation9 + $0x298] sm:$0xff]  ;;  %v9890_v34 = vld [vmem:[#allocation9 + $0x428] sm:$0xff] }
 0x2a3   : > { %7853 = vmatmul.mubr.f32.gmra.mxu1 %v4208_v16  ;;  %8038 = vmatprep.mubr.f32.mxu0 %v4993_v63  ;;  %v4219_v16 = vld [vmem:[#allocation2 + $0xa4] sm:$0xff]  ;;  %v4747_v63 = vld [vmem:[#allocation9 + $0x288] sm:$0xff] }
 0x2a4   : > { %7855 = vmatprep.mubr.f32.mxu1 %v4209_v57  ;;  %7945 = vmatprep.subr.mxu1 %v4756_v30  ;;  %v9901_v57 = vld [vmem:[#allocation9 + $0x418] sm:$0xff] }
 0x2a5   : > { %7946 = vmatpush3.msra.mxu1 %v4756_v30  ;;  %8124 = vmatpush3.msra.mxu0 %v9852_v15  ;;  %v4748_v30 = vld [vmem:[#allocation9 + $0x290] sm:$0xff] }
 0x2a6   : > { %7947 = vmatprep.subr.mxu1 %v4755_v44  ;;  %8039 = vmatmul.mubr.f32.gmra.mxu0 %v4994_v59  ;;  %v4725_v59 = vld [vmem:[#allocation2 + $0x16] sm:$0xff] }
 0x2a7   : > { %8125 = vmatprep.subr.mxu0 %v9855_v21  ;;  %7856 = vmatmul.mubr.f32.gmra.mxu1 %v4210_v31  ;;  %v9910_v31 = vld [vmem:[#allocation9 + $0x408] sm:$0xff] }
 0x2a8   : > { %7948 = vmatpush3.msra.mxu1 %v4755_v44  ;;  %8041 = vmatprep.mubr.f32.mxu0 %v4995_v47  ;;  %v4746_v44 = vld [vmem:[#allocation9 + $0x280] sm:$0xff]  ;;  %v4726_v47 = vld [vmem:[#allocation2 + $0x1e] sm:$0xff] }
 0x2a9   : > { %8126 = vmatpush3.msra.mxu0 %v9855_v21  ;;  %7858 = vmatprep.mubr.f32.mxu1 %v4211_v36  ;;  %v5284_v36 = vld [vmem:[#allocation9 + $0x3f0] sm:$0xff] }
 0x2aa   : > { %8127 = vmatprep.subr.mxu0 %v9859_v14  ;;  %7949 = vmatprep.subr.mxu1 %v4754_v53 }
 0x2ab   : > { %8128 = vmatpush3.msra.mxu0 %v9859_v14  ;;  %7950 = vmatpush3.msra.mxu1 %v4754_v53  ;;  %v9916_v53 = vld [vmem:[#allocation9 + $0x400] sm:$0xff] }
 0x2ac   : > { %8042 = vmatmul.mubr.f32.gmra.mxu0 %v9717_v37  ;;  %8129 = vmatprep.subr.mxu0 %v9862_v10  ;;  %v4214_v37 = vld [vmem:[#allocation2 + $0x7c] sm:$0xff] }
 0x2ad   : > { %7859 = vmatmul.mubr.f32.gmra.mxu1 %v4212_v19  ;;  %7951 = vmatprep.subr.mxu1 %v4753_v60  ;;  %v4728_v19 = vld [vmem:[#allocation2 + $0x2e] sm:$0xff] }
 0x2ae   : > { %8044 = vmatprep.mubr.f32.mxu0 %v4997_v11  ;;  %8130 = vmatpush3.msra.mxu0 %v9862_v10  ;;  %v5283_v11 = vld [vmem:[#allocation9 + $0x3e8] sm:$0xff] }
 0x2af   : > { %7861 = vmatprep.mubr.f32.mxu1 %v4213_v32  ;;  %7952 = vmatpush3.msra.mxu1 %v4753_v60  ;;  %v4727_v60 = vld [vmem:[#allocation2 + $0x26] sm:$0xff]  ;;  %v4729_v32 = vld [vmem:[#allocation2 + $0x36] sm:$0xff] }
 0x2b0   : > { %8131 = vmatprep.subr.mxu0 %v9868_v39  ;;  %7953 = vmatprep.subr.mxu1 %v4752_v43 }
 0x2b1   : > { %8132 = vmatpush3.msra.mxu0 %v9868_v39  ;;  %7862 = vmatmul.mubr.f32.gmra.mxu1 %v4214_v37  ;;  %v5282_v37 = vld [vmem:[#allocation9 + $0x3e0] sm:$0xff] }
 0x2b2   : > { %8045 = vmatmul.mubr.f32.gmra.mxu0 %v9736_v8  ;;  %8133 = vmatprep.subr.mxu0 %v9871_v13  ;;  %v4216_v8 = vld [vmem:[#allocation2 + $0x8c] sm:$0xff] }
 0x2b3   : > { %7954 = vmatpush3.msra.mxu1 %v4752_v43  ;;  %8047 = vmatprep.mubr.f32.mxu0 %v4999_v51  ;;  %v5513_v43 = vld [vmem:[#allocation2 + $0x3a] sm:$0xff]  ;;  %v5514_v51 = vld [vmem:[#allocation2 + $0x42] sm:$0xff] }
 0x2b4   : > { %8134 = vmatpush3.msra.mxu0 %v9871_v13  ;;  %7864 = vmatprep.mubr.f32.mxu1 %v4215_v49  ;;  %v5281_v49 = vld [vmem:[#allocation9 + $0x3d8] sm:$0xff] }
 0x2b5   : > { %7955 = vmatprep.subr.mxu1 %v4751_v4  ;;  %8135 = vmatprep.subr.mxu0 %v9877_v41 }
 0x2b6   : > { %7956 = vmatpush3.msra.mxu1 %v4751_v4  ;;  %8136 = vmatpush3.msra.mxu0 %v9877_v41  ;;  %v4730_v4 = vld [vmem:[#allocation2 + $0x3e] sm:$0xff] }
 0x2b7   : > { %8048 = vmatmul.mubr.f32.gmra.mxu0 %v9753_v27  ;;  %8137 = vmatprep.subr.mxu0 %v9880_v40  ;;  %v4218_v27 = vld [vmem:[#allocation2 + $0x9c] sm:$0xff] }
 0x2b8   : > { %7865 = vmatmul.mubr.f32.gmra.mxu1 %v4216_v8  ;;  %7957 = vmatprep.subr.mxu1 %v4750_v23  ;;  %v4731_v8 = vld [vmem:[#allocation2 + $0x46] sm:$0xff] }
 0x2b9   : > { %8050 = vmatprep.mubr.f32.mxu0 %v9746_v22  ;;  %8138 = vmatpush3.msra.mxu0 %v9880_v40  ;;  %v9896_v22 = vld [vmem:[#allocation9 + $0x420] sm:$0xff] }
 0x2ba   : > { %7867 = vmatprep.mubr.f32.mxu1 %v4217_v9  ;;  %7958 = vmatpush3.msra.mxu1 %v4750_v23  ;;  %v8351_v23 = vld [vmem:[#allocation2 + $0x4a] sm:$0xff]  ;;  %v8352_v9 = vld [vmem:[#allocation2 + $0x52] sm:$0xff] }
 0x2bb   : > { %8139 = vmatprep.subr.mxu0 %v9886_v38  ;;  %7959 = vmatprep.subr.mxu1 %v4749_v25 }
 0x2bc   : > { %8140 = vmatpush3.msra.mxu0 %v9886_v38  ;;  %7960 = vmatpush3.msra.mxu1 %v4749_v25  ;;  %v5280_v25 = vld [vmem:[#allocation9 + $0x3d0] sm:$0xff] }
 0x2bd   : > { %8051 = vmatmul.mubr.f32.gmra.mxu0 %v9767_v0  ;;  %8141 = vmatprep.subr.mxu0 %v9890_v34  ;;  %v4220_v0 = vld [vmem:[#allocation2 + $0xac] sm:$0xff] }
 0x2be   : > { %7868 = vmatmul.mubr.f32.gmra.mxu1 %v4218_v27  ;;  %8053 = vmatprep.mubr.f32.mxu0 %v9759_v50  ;;  %v9906_v50 = vld [vmem:[#allocation9 + $0x410] sm:$0xff]  ;;  %v4732_v27 = vld [vmem:[#allocation2 + $0x4e] sm:$0xff] }
 0x2bf   : > { %8142 = vmatpush3.msra.mxu0 %v9890_v34  ;;  %7870 = vmatprep.mubr.f32.mxu1 %v4219_v16  ;;  %v5279_v16 = vld [vmem:[#allocation9 + $0x3c8] sm:$0xff] }
 0x2c0   : > { %7961 = vmatprep.subr.mxu1 %v4748_v30  ;;  %8143 = vmatprep.subr.mxu0 %v9896_v22 }
 0x2c1   : > { %7962 = vmatpush3.msra.mxu1 %v4748_v30  ;;  %8144 = vmatpush3.msra.mxu0 %v9896_v22  ;;  %v4733_v30 = vld [vmem:[#allocation2 + $0x56] sm:$0xff] }
 0x2c2   : > { %7963 = vmatprep.subr.mxu1 %v4747_v63  ;;  %8054 = vmatmul.mubr.f32.gmra.mxu0 %v9781_v12  ;;  %v5285_v12 = vld [vmem:[#allocation9 + $0x3f8] sm:$0xff] }
 0x2c3   : > { %8145 = vmatprep.subr.mxu0 %v9901_v57  ;;  %7871 = vmatmul.mubr.f32.gmra.mxu1 %v4220_v0  ;;  %v4734_v0 = vld [vmem:[#allocation2 + $0x5e] sm:$0xff] }
 0x2c4   : > { %7964 = vmatpush3.msra.mxu1 %v4747_v63  ;;  %8056 = vmatprep.mubr.f32.mxu0 %v9773_v17  ;;  %v5511_v17 = vld [vmem:[#allocation2 + $0x2a] sm:$0xff]  ;;  %v8353_v63 = vld [vmem:[#allocation2 + $0x62] sm:$0xff] }
 0x2c5   : > { %8146 = vmatpush3.msra.mxu0 %v9901_v57  ;;  %7967 = vmatprep.mubr.f32.mxu1 %v4725_v59  ;;  %v4735_v59 = vld [vmem:[#allocation2 + $0x66] sm:$0xff] }
 0x2c6   : > { %8147 = vmatprep.subr.mxu0 %v9906_v50  ;;  %7965 = vmatprep.subr.mxu1 %v4746_v44 }
 0x2c7   : > { %8148 = vmatpush3.msra.mxu0 %v9906_v50  ;;  %7966 = vmatpush3.msra.mxu1 %v4746_v44  ;;  %v5278_v44 = vld [vmem:[#allocation9 + $0x3c0] sm:$0xff] }
 0x2c8   : > { %8057 = vmatmul.mubr.f32.gmra.mxu0 %v9791_v54  ;;  %8149 = vmatprep.subr.mxu0 %v9910_v31  ;;  %v5512_v54 = vld [vmem:[#allocation2 + $0x32] sm:$0xff] }
 0x2c9   : > { %7968 = vmatmul.mubr.f32.vlgmr.msra.gmra.mxu1 %v4726_v47  ;;  %8059 = vmatprep.subr.mxu1 %v5285_v12  ;;  %v4737_v47 = vld [vmem:[#allocation2 + $0x76] sm:$0xff] }
 0x2ca   : > { %8150 = vmatpush3.msra.mxu0 %v9910_v31  ;;  %8153 = vmatprep.mubr.f32.mxu0 %v5511_v17  ;;  %v5276_v17 = vld [vmem:[#allocation9 + $0x3b0] sm:$0xff] }
 0x2cb   : > { %7970 = vmatprep.mubr.f32.mxu1 %v4727_v60  ;;  %8060 = vmatpush3.msra.mxu1 %v5285_v12  ;;  %v5277_v12 = vld [vmem:[#allocation9 + $0x3b8] sm:$0xff] }
 0x2cc   : > { %8151 = vmatprep.subr.mxu0 %v9916_v53  ;;  %8061 = vmatprep.subr.mxu1 %v5284_v36  ;;  %v4739_v60 = vld [vmem:[#allocation2 + $0x86] sm:$0xff] }
 0x2cd   : > { %8152 = vmatpush3.msra.mxu0 %v9916_v53  ;;  %7971 = vmatmul.mubr.f32.gmra.mxu1 %v4728_v19  ;;  %v4740_v19 = vld [vmem:[#allocation2 + $0x8e] sm:$0xff] }
 0x2ce   : > { %8154 = vmatmul.mubr.f32.vlgmr.msra.gmra.mxu0 %v5512_v54  ;;  %8062 = vmatpush3.msra.mxu1 %v5284_v36  ;;  %v5275_v36 = vld [vmem:[#allocation9 + $0x3a8] sm:$0xff]  ;;  %v5273_v54 = vld [vmem:[#allocation9 + $0x398] sm:$0xff] }
 0x2cf   : > { %8156 = vmatprep.mubr.f32.mxu0 %v5513_v43  ;;  %7973 = vmatprep.mubr.f32.mxu1 %v4729_v32  ;;  %v4742_v43 = vld [vmem:[#allocation2 + $0x9e] sm:$0xff] }
 0x2d0   : > { %8063 = vmatprep.subr.mxu1 %v5283_v11  ;;  %v5271_v32 = vld [vmem:[#allocation9 + $0x388] sm:$0xff] }
 0x2d1   : > { %8064 = vmatpush3.msra.mxu1 %v5283_v11  ;;  %v5272_v11 = vld [vmem:[#allocation9 + $0x390] sm:$0xff] }
 0x2d2   : > { %8157 = vmatmul.mubr.f32.gmra.mxu0 %v5514_v51  ;;  %7974 = vmatmul.mubr.f32.gmra.mxu1 %v4730_v4  ;;  %v5528_v51 = vld [vmem:[#allocation2 + $0xb2] sm:$0xff] }
 0x2d3   : > { %8065 = vmatprep.subr.mxu1 %v5282_v37  ;;  %8159 = vmatprep.mubr.f32.mxu0 %v8351_v23 }
 0x2d4   : > { %7976 = vmatprep.mubr.f32.mxu1 %v4731_v8  ;;  %8066 = vmatpush3.msra.mxu1 %v5282_v37 }
 0x2d5   : > { %8067 = vmatprep.subr.mxu1 %v5281_v49 }
 0x2d6   : > { %8068 = vmatpush3.msra.mxu1 %v5281_v49  ;;  %8160 = vmatmul.mubr.f32.gmra.mxu0 %v8352_v9  ;;  %v4744_v49 = vld [vmem:[#allocation2 + $0xae] sm:$0xff] }
 0x2d7   : > { %7977 = vmatmul.mubr.f32.gmra.mxu1 %v4732_v27  ;;  %8162 = vmatprep.mubr.f32.mxu0 %v9743_v3  ;;  %v4736_v3 = vld [vmem:[#allocation2 + $0x6e] sm:$0xff] }
 0x2d8   : > { %7979 = vmatprep.mubr.f32.mxu1 %v4733_v30  ;;  %8069 = vmatprep.subr.mxu1 %v5280_v25  ;;  %v5268_v30 = vld [vmem:[#allocation2 + $0xc1] sm:$0xff] }
 0x2d9   : > { %8070 = vmatpush3.msra.mxu1 %v5280_v25 }
 0x2da   : > { %8071 = vmatprep.subr.mxu1 %v5279_v16  ;;  %8163 = vmatmul.mubr.f32.gmra.mxu0 %v8353_v63 }
 0x2db   : > { %7980 = vmatmul.mubr.f32.gmra.mxu1 %v4734_v0  ;;  %8165 = vmatprep.mubr.f32.mxu0 %v9756_v18  ;;  %v4738_v18 = vld [vmem:[#allocation2 + $0x7e] sm:$0xff] }
 0x2dc   : > { %8072 = vmatpush3.msra.mxu1 %v5279_v16  ;;  %7982 = vmatprep.mubr.f32.mxu1 %v4735_v59 }
 0x2dd   : > { %8073 = vmatprep.subr.mxu1 %v5278_v44 }
 0x2de   : > { %8074 = vmatpush3.msra.mxu1 %v5278_v44  ;;  %8166 = vmatmul.mubr.f32.gmra.mxu0 %v9763_v45  ;;  %v5274_v45 = vld [vmem:[#allocation9 + $0x3a0] sm:$0xff]  ;;  %v5530_v44 = vld [vmem:[#allocation2 + $0xc2] sm:$0xff] }
 0x2df   : > { %7983 = vmatmul.mubr.f32.gmra.mxu1 %v4736_v3  ;;  %8075 = vmatprep.subr.mxu1 %v5277_v12 }
 0x2e0   : > { %8168 = vmatprep.mubr.f32.mxu0 %v9776_v52  ;;  %7985 = vmatprep.mubr.f32.mxu1 %v4737_v47  ;;  %v4741_v52 = vld [vmem:[#allocation2 + $0x96] sm:$0xff] }
 0x2e1   : > { %8076 = vmatpush3.msra.mxu1 %v5277_v12 }
 0x2e2   : > { %8077 = vmatprep.subr.mxu1 %v5276_v17  ;;  %8169 = vmatmul.mubr.f32.gmra.mxu0 %v9778_v58  ;;  %v5526_v58 = vld [vmem:[#allocation2 + $0xa2] sm:$0xff] }
 0x2e3   : > { %7986 = vmatmul.mubr.f32.gmra.mxu1 %v4738_v18  ;;  %8171 = vmatprep.mubr.f32.mxu0 %v9789_v24  ;;  %v5527_v24 = vld [vmem:[#allocation2 + $0xaa] sm:$0xff] }
 0x2e4   : > { %8078 = vmatpush3.msra.mxu1 %v5276_v17  ;;  %7988 = vmatprep.mubr.f32.mxu1 %v4739_v60 }
 0x2e5   : > { %8079 = vmatprep.subr.mxu1 %v5275_v36 }
 0x2e6   : > { %8080 = vmatpush3.msra.mxu1 %v5275_v36  ;;  %8172 = vmatmul.mubr.f32.gmra.mxu0 %v9794_v20  ;;  %v4743_v20 = vld [vmem:[#allocation2 + $0xa6] sm:$0xff] }
 0x2e7   : > { %7989 = vmatmul.mubr.f32.gmra.mxu1 %v4740_v19  ;;  %8081 = vmatprep.subr.mxu1 %v5274_v45 }
 0x2e8   : > { %8174 = vmatprep.mubr.f32.mxu0 %v9800_v46  ;;  %7991 = vmatprep.mubr.f32.mxu1 %v4741_v52  ;;  %v5270_v46 = vld [vmem:[#allocation9 + $0x380] sm:$0xff] }
 0x2e9   : > { %8082 = vmatpush3.msra.mxu1 %v5274_v45  ;;  %v9929_v37 = vpop.f32.mrf.mxu1 }
 0x2ea   : > { %8083 = vmatprep.subr.mxu1 %v5273_v54  ;;  %8175 = vmatmul.mubr.f32.gmra.mxu0 %v5526_v58 }
 0x2eb   : > { %8084 = vmatpush3.msra.mxu1 %v5273_v54  ;;  %8177 = vmatprep.mubr.f32.mxu0 %v5527_v24  ;;  %v9931_v4 = vpop.f32.mrf.mxu1 }
 0x2ec   : > { %7992 = vmatmul.mubr.f32.gmra.mxu1 %v4742_v43  ;;  %8085 = vmatprep.subr.mxu1 %v5272_v11 }
 0x2ed   : > { %7994 = vmatprep.mubr.f32.mxu1 %v4743_v20  ;;  %8086 = vmatpush3.msra.mxu1 %v5272_v11 }
 0x2ee   : > { %8087 = vmatprep.subr.mxu1 %v5271_v32  ;;  %8178 = vmatmul.mubr.f32.gmra.mxu0 %v5528_v51  ;;  %v9933_v23 = vpop.f32.mrf.mxu1 }
 0x2ef   : > { %8088 = vmatpush3.msra.mxu1 %v5271_v32 }
 0x2f0   : > { %7995 = vmatmul.mubr.f32.gmra.mxu1 %v4744_v49  ;;  %8089 = vmatprep.subr.mxu1 %v5270_v46  ;;  %v9937_v8 = vpop.f32.mrf.mxu1 }
 0x2f1   : > { %8091 = vmatprep.mubr.f32.mxu1 %v9803_v26  ;;  %8090 = vmatpush3.msra.mxu1 %v5270_v46 }
 0x2f2   : > { %8183 = vmatprep.subr.mxu1 %v9848_v7  ;;  %v9940_v25 = vpop.f32.mrf.mxu1 }
 0x2f4   : > { %8092 = vmatmul.mubr.f32.vlgmr.msra.gmra.mxu1 %v9806_v28  ;;  %v9945_v9 = vpop.f32.mrf.mxu1 }
 0x2f5   : > { %8094 = vmatprep.mubr.f32.mxu1 %v9809_v29  ;;  %8199 = vmatpush3.msra.mxu1 %v9848_v7  ;;  %v9948_v26 = vpop.f32.mrf.mxu0 }
 0x2f6   : > { %8184 = vmatprep.subr.mxu1 %v9852_v15 }
 0x2f7   : > { %8200 = vmatpush3.msra.mxu1 %v9852_v15  ;;  %v9952_v27 = vpop.f32.mrf.mxu1  ;;  %v9956_v28 = vpop.f32.mrf.mxu0 }
 0x2f8   : > { %8095 = vmatmul.mubr.f32.gmra.mxu1 %v9812_v48  ;;  %8185 = vmatprep.subr.mxu1 %v9855_v21 }
 0x2f9   : > { %8097 = vmatprep.mubr.f32.mxu1 %v9815_v5  ;;  %8201 = vmatpush3.msra.mxu1 %v9855_v21  ;;  %v9959_v29 = vpop.f32.mrf.mxu1 }
 0x2fa   : > { %8186 = vmatprep.subr.mxu1 %v9859_v14  ;;  %v9962_v7 = vpop.f32.mrf.mxu0 }
 0x2fb   : > { %8202 = vmatpush3.msra.mxu1 %v9859_v14 }
 0x2fc   : > { %8098 = vmatmul.mubr.f32.gmra.mxu1 %v9818_v42  ;;  %8187 = vmatprep.subr.mxu1 %v9862_v10  ;;  %v9968_v48 = vpop.f32.mrf.mxu0 }
 0x2fd   : > { %8100 = vmatprep.mubr.f32.mxu1 %v9821_v56  ;;  %8203 = vmatpush3.msra.mxu1 %v9862_v10  ;;  %v9971_v5 = vpop.f32.mrf.mxu1 }
 0x2fe   : > { %8188 = vmatprep.subr.mxu1 %v9868_v39  ;;  %v9974_v15 = vpop.f32.mrf.mxu0 }
 0x2ff   : > { %8204 = vmatpush3.msra.mxu1 %v9868_v39  ;;  %v9978_v42 = vpop.f32.mrf.mxu1 }
 0x300   : > { %8101 = vmatmul.mubr.f32.gmra.mxu1 %v9824_v1  ;;  %8189 = vmatprep.subr.mxu1 %v9871_v13  ;;  %v9982_v56 = vpop.f32.mrf.mxu0 }
 0x301   : > { %8103 = vmatprep.mubr.f32.mxu1 %v9827_v62  ;;  %8205 = vmatpush3.msra.mxu1 %v9871_v13  ;;  %v5264_v13 = vld [vmem:[#allocation2 + $0xa1] sm:$0xff] }
 0x302   : > { %8190 = vmatprep.subr.mxu1 %v9877_v41  ;;  %v9986_v21 = vpop.f32.mrf.mxu0 }
 0x303   : > { %8206 = vmatpush3.msra.mxu1 %v9877_v41 }
 0x304   : > { %8104 = vmatmul.mubr.f32.gmra.mxu1 %v9830_v61  ;;  %8191 = vmatprep.subr.mxu1 %v9880_v40  ;;  %v9990_v1 = vpop.f32.mrf.mxu1  ;;  %v9994_v62 = vpop.f32.mrf.mxu0 }
 0x305   : > { %8106 = vmatprep.mubr.f32.mxu1 %v9833_v35  ;;  %8207 = vmatpush3.msra.mxu1 %v9880_v40  ;;  %v5265_v40 = vld [vmem:[#allocation2 + $0xa9] sm:$0xff] }
 0x306   : > { %8192 = vmatprep.subr.mxu1 %v9886_v38  ;;  %v9997_v14 = vpop.f32.mrf.mxu1 }
 0x307   : > { %8208 = vmatpush3.msra.mxu1 %v9886_v38  ;;  %v10000_v10 = vpop.f32.mrf.mxu0 }
 0x308   : > { %8107 = vmatmul.mubr.f32.gmra.mxu1 %v9836_v33  ;;  %8193 = vmatprep.subr.mxu1 %v9890_v34 }
 0x309   : > { %8109 = vmatprep.mubr.f32.mxu1 %v9839_v2  ;;  %8209 = vmatpush3.msra.mxu1 %v9890_v34  ;;  %v10006_v61 = vpop.f32.mrf.mxu0  ;;  %v5266_v34 = vld [vmem:[#allocation2 + $0xb1] sm:$0xff] }
 0x30a   : > { %8194 = vmatprep.subr.mxu1 %v9896_v22  ;;  %v10009_v35 = vpop.f32.mrf.mxu1 }
 0x30b   : > { %8210 = vmatpush3.msra.mxu1 %v9896_v22  ;;  %v10012_v39 = vpop.f32.mrf.mxu0  ;;  %v5267_v22 = vld [vmem:[#allocation2 + $0xb9] sm:$0xff] }
 0x30c   : > { %8110 = vmatmul.mubr.f32.gmra.mxu1 %v9842_v55  ;;  %8195 = vmatprep.subr.mxu1 %v9901_v57  ;;  %v10016_v33 = vpop.f32.mrf.mxu1 }
 0x30d   : > { %8112 = vmatprep.mubr.f32.mxu1 %v9845_v6  ;;  %8211 = vmatpush3.msra.mxu1 %v9901_v57  ;;  %v10020_v2 = vpop.f32.mrf.mxu0 }
 0x30e   : > { %8196 = vmatprep.subr.mxu1 %v9906_v50 }
 0x30f   : > { %8212 = vmatpush3.msra.mxu1 %v9906_v50  ;;  %v10024_v41 = vpop.f32.mrf.mxu0 }
 0x310   : > { %8113 = vmatmul.mubr.f32.gmra.mxu1 %v5264_v13  ;;  %8197 = vmatprep.subr.mxu1 %v9910_v31  ;;  %v10027_v55 = vpop.f32.mrf.mxu1 }
 0x311   : > { %8115 = vmatprep.mubr.f32.mxu1 %v5265_v40  ;;  %8213 = vmatpush3.msra.mxu1 %v9910_v31  ;;  %v10030_v6 = vpop.f32.mrf.mxu0  ;;  %v5529_v31 = vld [vmem:[#allocation2 + $0xba] sm:$0xff] }
 0x312   : > { %8198 = vmatprep.subr.mxu1 %v9916_v53  ;;  %v10033_v38 = vpop.f32.mrf.mxu1 }
 0x313   : > { %8214 = vmatpush3.msra.mxu1 %v9916_v53 }
 0x314   : > { %8116 = vmatmul.mubr.f32.gmra.mxu1 %v5266_v34 }
 0x315   : > { %8118 = vmatprep.mubr.f32.mxu1 %v5267_v22  ;;  %v10036_v57 = vpop.f32.mrf.mxu0 }
 0x316   : > { %v10038_v50 = vpop.f32.mrf.mxu1 }
 0x317   : > { %v10040_v16 = vpop.f32.mrf.mxu0 }
 0x318   : > { %8119 = vmatmul.mubr.f32.gmra.mxu1 %v5268_v30  ;;  %v10042_v63 = vpop.f32.mrf.mxu1 }
 0x319   : > { %8180 = vmatprep.mubr.f32.mxu1 %v5529_v31 }
 0x31a   : > { %v10044_v0 = vpop.f32.mrf.mxu0 }
 0x31b   : > { %v10046_v59 = vpop.f32.mrf.mxu1 }
 0x31c   : > { %8181 = vmatmul.mubr.f32.vlgmr.msra.gmra.mxu1 %v5530_v44  ;;  %v10048_v53 = vpop.f32.mrf.mxu0 }
 0x31d   : > { %v10050_v12 = vpop.f32.mrf.mxu1 }
 0x320   : > { %v10052_v3 = vpop.f32.mrf.mxu0 }
 0x321   : > { %v7721_v47 = vpop.f32.mrf.mxu1 }
 0x322   : > { %v3880_v17 = vadd.f32 %v7721_v47, %v9929_v37  ;;  %v10055_v18 = vpop.f32.mrf.mxu0 }
 0x323   : > { %v3780_v36 = vpop.f32.mrf.mxu1 }
 0x324   : > { %v3879_v60 = vadd.f32 %v3780_v36, %v9931_v4  ;;  %v10059_v45 = vadd.f32 %v9948_v26, %v3880_v17 }
 0x325   : > { %v7724_v19 = vpop.f32.mrf.mxu1 }
 0x326   : > { %v10061_v52 = vpop.f32.mrf.mxu0  ;;  %v3882_v54 = vadd.f32 %v7724_v19, %v9933_v23  ;;  %v10065_v58 = vadd.f32 %v9956_v28, %v3879_v60 }
 0x327   : > { %v3790_v11 = vpop.f32.mrf.mxu1 }
 0x328   : > { %v10067_v24 = vpop.f32.mrf.mxu0  ;;  %v3881_v43 = vadd.f32 %v3790_v11, %v9937_v8  ;;  %v10071_v32 = vadd.f32 %v9962_v7, %v3882_v54 }
 0x32a   : > { %v10073_v37 = vpop.f32.mrf.mxu0  ;;  %v7727_v20 = vpop.f32.mrf.mxu1  ;;  %v10076_v51 = vadd.f32 %v9968_v48, %v3881_v43 }
 0x32b   : > { %v3884_v46 = vadd.f32 %v7727_v20, %v9940_v25 }
 0x32c   : > { %v10079_v4 = vpop.f32.mrf.mxu0  ;;  %v3800_v49 = vpop.f32.mrf.mxu1 }
 0x32d   : > { %v3883_v23 = vadd.f32 %v3800_v49, %v9945_v9  ;;  %v10083_v26 = vadd.f32 %v9974_v15, %v3884_v46 }
 0x32e   : > { %v10085_v8 = vpop.f32.mrf.mxu0 }
 0x32f   : > { %v7730_v28 = vpop.f32.mrf.mxu1  ;;  %v10088_v7 = vadd.f32 %v9982_v56, %v3883_v23 }
 0x330   : > { %v3886_v13 = vadd.f32 %v7730_v28, %v9952_v27  ;;  %v10091_v48 = vpop.f32.mrf.mxu0 }
 0x331   : > { %v3810_v40 = vpop.f32.mrf.mxu1 }
 0x332   : > { %v3885_v25 = vadd.f32 %v3810_v40, %v9959_v29  ;;  %v10094_v34 = vpop.f32.mrf.mxu0  ;;  %v10097_v9 = vadd.f32 %v9986_v21, %v3886_v13 }
 0x333   : > { %v7733_v15 = vpop.f32.mrf.mxu1 }
 0x334   : > { %v3888_v22 = vadd.f32 %v7733_v15, %v9971_v5  ;;  %v10100_v30 = vpop.f32.mrf.mxu0  ;;  %v10103_v56 = vadd.f32 %v9994_v62, %v3885_v25 }
 0x335   : > { %v3820_v31 = vpop.f32.mrf.mxu1 }
 0x336   : > { %v3887_v27 = vadd.f32 %v3820_v31, %v9978_v42  ;;  %v10107_v44 = vadd.f32 %v10000_v10, %v3888_v22 }
 0x338   : > { %v10109_v29 = vpop.f32.mrf.mxu0  ;;  %v10112_v47 = vadd.f32 %v10006_v61, %v3887_v27 }
 0x339   : > { %v7736_v21 = vpop.f32.mrf.mxu1 }
 0x33a   : > { %v3890_v17 = vadd.f32 %v7736_v21, %v9990_v1  ;;  %v10115_v5 = vpop.f32.mrf.mxu0 }
 0x33b   : > { %v3830_v36 = vpop.f32.mrf.mxu1 }
 0x33c   : > { %v3889_v62 = vadd.f32 %v3830_v36, %v9997_v14  ;;  %v10119_v60 = vadd.f32 %v10012_v39, %v3890_v17 }
 0x33d   : > { %v7739_v42 = vpop.f32.mrf.mxu1 }
 0x33e   : > { %v10121_v19 = vpop.f32.mrf.mxu0  ;;  %v3892_v10 = vadd.f32 %v7739_v42, %v10009_v35  ;;  %v10125_v54 = vadd.f32 %v10020_v2, %v3889_v62 }
 0x33f   : > { %v3840_v61 = vpop.f32.mrf.mxu1 }
 0x340   : > { %v10127_v11 = vpop.f32.mrf.mxu0  ;;  %v3891_v1 = vadd.f32 %v3840_v61, %v10016_v33  ;;  %v10131_v43 = vadd.f32 %v10024_v41, %v3892_v10 }
 0x342   : > { %v10134_v14 = vadd.f32 %v10030_v6, %v3891_v1 }
 0x343   : > { %v10136_v39 = vpop.f32.mrf.mxu0 }
 0x344   : > { %v7742_v20 = vpop.f32.mrf.mxu1 }
 0x345   : > { %v3894_v46 = vadd.f32 %v7742_v20, %v10027_v55  ;;  %v10139_v35 = vpop.f32.mrf.mxu0 }
 0x346   : > { %v3850_v2 = vpop.f32.mrf.mxu1 }
 0x347   : > { %v3893_v49 = vadd.f32 %v3850_v2, %v10033_v38  ;;  %v10143_v23 = vadd.f32 %v10036_v57, %v3894_v46 }
 0x349   : > { %v10145_v33 = vpop.f32.mrf.mxu0  ;;  %v10148_v41 = vadd.f32 %v10040_v16, %v3893_v49 }
 0x34a   : > { %v7745_v6 = vpop.f32.mrf.mxu1 }
 0x34b   : > { %v3896_v28 = vadd.f32 %v7745_v6, %v10038_v50  ;;  %v10151_v13 = vpop.f32.mrf.mxu0 }
 0x34c   : > { %v3860_v40 = vpop.f32.mrf.mxu1 }
 0x34d   : > { %v3895_v55 = vadd.f32 %v3860_v40, %v10042_v63  ;;  %v10155_v25 = vadd.f32 %v10044_v0, %v3896_v28 }
 0x34e   : > { %v10157_v38 = vpop.f32.mrf.mxu0 }
 0x34f   : > { %v7748_v57 = vpop.f32.mrf.mxu1  ;;  %v10160_v15 = vadd.f32 %v10048_v53, %v3895_v55 }
 0x350   : > { %v3898_v16 = vadd.f32 %v7748_v57, %v10046_v59  ;;  %v10163_v22 = vpop.f32.mrf.mxu0 }
 0x351   : > { %v3870_v31 = vpop.f32.mrf.mxu1 }
 0x352   : > { %v3897_v50 = vadd.f32 %v3870_v31, %v10050_v12  ;;  %v10167_v27 = vadd.f32 %v10052_v3, %v3898_v16 }
 0x354   : > { %v10169_v63 = vpop.f32.mrf.mxu0  ;;  %v10172_v0 = vadd.f32 %v10055_v18, %v3897_v50 }
 0x355   : > { %v7845_v21 = vpop.f32.mrf.mxu1 }
 0x356   : > { %v4404_v17 = vadd.f32 %v7845_v21, %v10059_v45  ;;  %v10175_v53 = vpop.f32.mrf.mxu0 }
 0x357   : > { %v4304_v36 = vpop.f32.mrf.mxu1 }
 0x358   : > { %v4403_v59 = vadd.f32 %v4304_v36, %v10065_v58  ;;  %v10179_v62 = vadd.f32 %v10061_v52, %v4404_v17 }
 0x359   : > { %v7848_v12 = vpop.f32.mrf.mxu1 }
 0x35a   : > { %v10181_v42 = vpop.f32.mrf.mxu0  ;;  %v4406_v3 = vadd.f32 %v7848_v12, %v10071_v32  ;;  %v10185_v10 = vadd.f32 %v10067_v24, %v4403_v59 }
 0x35b   : > { %v4314_v18 = vpop.f32.mrf.mxu1 }
 0x35c   : > { %v10187_v61 = vpop.f32.mrf.mxu0  ;;  %v4405_v45 = vadd.f32 %v4314_v18, %v10076_v51  ;;  %v10191_v1 = vadd.f32 %v10073_v37, %v4406_v3 }
 0x35e   : > { %v10193_v58 = vpop.f32.mrf.mxu0  ;;  %v7851_v52 = vpop.f32.mrf.mxu1  ;;  %v10196_v20 = vadd.f32 %v10079_v4, %v4405_v45 }
 0x35f   : > { %v4408_v46 = vadd.f32 %v7851_v52, %v10083_v26 }
 0x360   : > { %v10199_v32 = vpop.f32.mrf.mxu0  ;;  %v4324_v24 = vpop.f32.mrf.mxu1 }
 0x361   : > { %v4407_v2 = vadd.f32 %v4324_v24, %v10088_v7  ;;  %v10203_v49 = vadd.f32 %v10085_v8, %v4408_v46 }
 0x362   : > { %v10205_v51 = vpop.f32.mrf.mxu0 }
 0x363   : > { %v7854_v37 = vpop.f32.mrf.mxu1  ;;  %v10208_v6 = vadd.f32 %v10091_v48, %v4407_v2 }
 0x364   : > { %v4410_v28 = vadd.f32 %v7854_v37, %v10097_v9  ;;  %v10211_v4 = vpop.f32.mrf.mxu0 }
 0x365   : > { %v4334_v40 = vpop.f32.mrf.mxu1 }
 0x366   : > { %v4409_v26 = vadd.f32 %v4334_v40, %v10103_v56  ;;  %v10214_v55 = vpop.f32.mrf.mxu0  ;;  %v10217_v7 = vadd.f32 %v10094_v34, %v4410_v28 }
 0x367   : > { %v7857_v8 = vpop.f32.mrf.mxu1 }
 0x368   : > { %v4412_v57 = vadd.f32 %v7857_v8, %v10107_v44  ;;  %v10220_v16 = vpop.f32.mrf.mxu0  ;;  %v10223_v48 = vadd.f32 %v10100_v30, %v4409_v26 }
 0x369   : > { %v4344_v31 = vpop.f32.mrf.mxu1 }
 0x36a   : > { %v4411_v9 = vadd.f32 %v4344_v31, %v10112_v47  ;;  %v10227_v50 = vadd.f32 %v10109_v29, %v4412_v57 }
 0x36c   : > { %v10229_v56 = vpop.f32.mrf.mxu0  ;;  %v10232_v21 = vadd.f32 %v10115_v5, %v4411_v9 }
 0x36d   : > { %v7860_v34 = vpop.f32.mrf.mxu1 }
 0x36e   : > { %v4414_v17 = vadd.f32 %v7860_v34, %v10119_v60  ;;  %v10235_v44 = vpop.f32.mrf.mxu0 }
 0x36f   : > { %v4354_v36 = vpop.f32.mrf.mxu1 }
 0x370   : > { %v4413_v30 = vadd.f32 %v4354_v36, %v10125_v54  ;;  %v10239_v59 = vadd.f32 %v10121_v19, %v4414_v17 }
 0x371   : > { %v7863_v47 = vpop.f32.mrf.mxu1 }
 0x372   : > { %v10241_v12 = vpop.f32.mrf.mxu0  ;;  %v4416_v29 = vadd.f32 %v7863_v47, %v10131_v43  ;;  %v10245_v3 = vadd.f32 %v10127_v11, %v4413_v30 }
 0x373   : > { %v4364_v5 = vpop.f32.mrf.mxu1 }
 0x374   : > { %v10247_v18 = vpop.f32.mrf.mxu0  ;;  %v4415_v60 = vadd.f32 %v4364_v5, %v10134_v14  ;;  %v10251_v45 = vadd.f32 %v10136_v39, %v4416_v29 }
 0x376   : > { %v10254_v54 = vadd.f32 %v10139_v35, %v4415_v60 }
 0x377   : > { %v10256_v19 = vpop.f32.mrf.mxu0 }
 0x378   : > { %v7866_v52 = vpop.f32.mrf.mxu1 }
 0x379   : > { %v4418_v46 = vadd.f32 %v7866_v52, %v10143_v23  ;;  %v10259_v43 = vpop.f32.mrf.mxu0 }
 0x37a   : > { %v4374_v11 = vpop.f32.mrf.mxu1 }
 0x37b   : > { %v4417_v24 = vadd.f32 %v4374_v11, %v10148_v41  ;;  %v10263_v2 = vadd.f32 %v10145_v33, %v4418_v46 }
 0x37d   : > { %v10265_v14 = vpop.f32.mrf.mxu0  ;;  %v10268_v39 = vadd.f32 %v10151_v13, %v4417_v24 }
 0x37e   : > { %10742 = vst [vmem:[#allocation24_spill] sm:$0xff] %v10265_v14  ;;  %v7869_v35 = vpop.f32.mrf.mxu1 }
 0x37f   : > { %v4420_v37 = vadd.f32 %v7869_v35, %v10155_v25  ;;  %v10271_v28 = vpop.f32.mrf.mxu0 }
 0x380   : > { %10743 = vst [vmem:[#allocation34_spill] sm:$0xff] %v10271_v28  ;;  %v4384_v40 = vpop.f32.mrf.mxu1 }
 0x381   : > { %v4419_v23 = vadd.f32 %v4384_v40, %v10160_v15  ;;  %v10275_v26 = vadd.f32 %v10157_v38, %v4420_v37 }
 0x382   : > { %v10280_v8 = vpop.f32.mrf.mxu0 }
 0x383   : > { %v7872_v41 = vpop.f32.mrf.mxu1  ;;  %v10278_v33 = vadd.f32 %v10163_v22, %v4419_v23  ;;  %10745 = vst [vmem:[#allocation26_spill] sm:$0xff] %v10280_v8 }
 0x384   : > { %v4422_v13 = vadd.f32 %v7872_v41, %v10167_v27  ;;  %v10287_v9 = vpop.f32.mrf.mxu0 }
 0x385   : > { %10744 = vst [vmem:[#allocation20_spill] sm:$0xff] %v10278_v33  ;;  %v4394_v57 = vpop.f32.mrf.mxu1  ;;  %10747 = vst [vmem:[#allocation21_spill] sm:$0xff] %v10287_v9 }
 0x386   : > { %v4421_v31 = vadd.f32 %v4394_v57, %v10172_v0  ;;  %v10285_v25 = vadd.f32 %v10169_v63, %v4422_v13 }
 0x388   : > { %10746 = vst [vmem:[#allocation33_spill] sm:$0xff] %v10285_v25  ;;  %v10290_v15 = vadd.f32 %v10175_v53, %v4421_v31  ;;  %v10292_v17 = vpop.f32.mrf.mxu0 }
 0x389   : > { %v7969_v38 = vpop.f32.mrf.mxu1  ;;  %10749 = vst [vmem:[#allocation28_spill] sm:$0xff] %v10292_v17 }
 0x38a   : > { %10748 = vst [vmem:[#allocation22_spill] sm:$0xff] %v10290_v15  ;;  %v10294_v30 = vpop.f32.mrf.mxu0  ;;  %v4928_v17 = vadd.f32 %v7969_v38, %v10179_v62 }
 0x38b   : > { %v4828_v34 = vpop.f32.mrf.mxu1  ;;  %10750 = vst [vmem:[#allocation37_spill] sm:$0xff] %v10294_v30 }
 0x38c   : > { %v4927_v25 = vadd.f32 %v4828_v34, %v10185_v10  ;;  %v5190_v14 = vadd.f32 %v10181_v42, %v4928_v17  ;;  %v10338_v10 = vld [vmem:[%s10755_s13] ss:$0 sm:$0xff]  ;;  %s8438_s13 = sshll.u32 %s8566_s9, 4  ;;  %s8439_s13 = int_to_ptr.vmem [resolvable:$false] %s8438_s13 }
 0x38d   : > { %v7972_v22 = vpop.f32.mrf.mxu1  ;;  %s8440_s18 = scalar_lea.vmem %s8439_s13, 5120  ;;  %p8441_p5 = scmp.lt.s32.totalorder %s10469_s10, %s8439_s13 }
 0x38e   : > { %v8155_v47 = vpop.f32.mrf.mxu0  ;;  %v4930_v28 = vadd.f32 %v7972_v22, %v10191_v1  ;;  %v5189_v38 = vadd.f32 %v10187_v61, %v4927_v25  ;;  %v6261_v61 = vld [vmem:[%s8789_s4 + $0x32] sm:$0xff]  ;;  %p8442_p12 = scmp.lt.s32.totalorder %s8440_s18, %s8434_s29 }
 0x38f   : > { %v4838_v36 = vpop.f32.mrf.mxu1 }
 0x390   : > { %v5614_v5 = vpop.f32.mrf.mxu0  ;;  %v5192_v42 = vadd.f32 %v10193_v58, %v4930_v28  ;;  %v6260_v58 = vld [vmem:[%s8789_s4 + $0x2a] sm:$0xff]  ;;  %p8443_p0 = por %p8442_p12, %p8441_p5 }
 0x392   : > { %v7975_v27 = vpop.f32.mrf.mxu1  ;;  %v8158_v52 = vpop.f32.mrf.mxu0  ;;  %p8444_p2 = pnand %p8443_p0, %p8437_p11 }
 0x393   : > { %v4932_v17 = vadd.f32 %v7975_v27, %v10203_v49 }
 0x394   : > { %v4848_v29 = vpop.f32.mrf.mxu1  ;;  %v5624_v11 = vpop.f32.mrf.mxu0 }
 0x396   : > { %v10304_v37 = vpop.f32.mrf.mxu0 }
 0x397   : > { %v7978_v0 = vpop.f32.mrf.mxu1 }
 0x398   : > { %v10310_v41 = vpop.f32.mrf.mxu0 }
 0x399   : > { %v4858_v63 = vpop.f32.mrf.mxu1 }
 0x39a   : > { %v10314_v57 = vpop.f32.mrf.mxu0 }
 0x39b   : > { %v7981_v60 = vpop.f32.mrf.mxu1 }
 0x39c   : > { %v10321_v15 = vpop.f32.mrf.mxu0 }
 0x39d   : > { %v10296_v46 = vpop.f32.mrf.mxu1 }
 0x39e   : > { %v10330_v33 = vpop.f32.mrf.mxu0 }
 0x39f   : > { %v10298_v53 = vpop.f32.mrf.mxu1 }
 0x3a1   : > { %v10300_v24 = vpop.f32.mrf.mxu1 }
 0x3a3   : > { %v10302_v35 = vpop.f32.mrf.mxu1 }
 0x3a5   : > { %v10306_v40 = vpop.f32.mrf.mxu1 }
 0x3a7   : > { %v10308_v23 = vpop.f32.mrf.mxu1 }
 0x3a9   : > { %v10312_v13 = vpop.f32.mrf.mxu1 }
 0x3ac   : > { %v10316_v31 = vpop.f32.mrf.mxu1 }
 0x3ad   : > { %10751 = vst [vmem:[#allocation23_spill] sm:$0xff] %v10316_v31 }
 0x3ae   : > { %v10318_v30 = vpop.f32.mrf.mxu1 }
 0x3af   : > { %10752 = vst [vmem:[#allocation25_spill] sm:$0xff] %v10318_v30  ;;  %v4929_v30 = vadd.f32 %v4838_v36, %v10196_v20  ;;  %v10343_v20 = vpop.f32.mrf.mxu0 }
 0x3b0   : > { %v10323_v9 = vpop.f32.mrf.mxu1 }
 0x3b1   : > { %10753 = vst [vmem:[#allocation27_spill] sm:$0xff] %v10323_v9  ;;  %v6263_v9 = vld [vmem:[%s8789_s4 + $0x42] sm:$0xff] }
 0x3b2   : > { %v10326_v8 = vpop.f32.mrf.mxu1 }
 0x3b3   : > { %10754 = vst [vmem:[#allocation29_spill] sm:$0xff] %v10326_v8  ;;  %v4931_v8 = vadd.f32 %v4848_v29, %v10208_v6 }
 0x3b4   : > { %v8093_v31 = vpop.f32.mrf.mxu1 }
 0x3b5   : > { %v5452_v62 = vadd.f32 %v8093_v31, %v5190_v14 }
 0x3b6   : > { %v5352_v1 = vpop.f32.mrf.mxu1 }
 0x3b7   : > { %v5714_v34 = vadd.f32 %v8155_v47, %v5452_v62  ;;  %v5451_v22 = vadd.f32 %v5352_v1, %v5189_v38  ;;  %v5191_v47 = vadd.f32 %v10199_v32, %v4929_v30  ;;  %v4934_v62 = vadd.f32 %v7978_v0, %v10217_v7  ;;  %v10354_v1 = vpop.f32.mrf.mxu0 }
 0x3b8   : > { %v8096_v14 = vpop.f32.mrf.mxu1  ;;  %v4933_v38 = vadd.f32 %v4858_v63, %v10223_v48  ;;  %v5193_v32 = vadd.f32 %v10211_v4, %v4931_v8 }
 0x3b9   : > { %v5801_v25 = vadd.f32 %v10338_v10, %v5714_v34  ;;  %v5713_v36 = vadd.f32 %v5614_v5, %v5451_v22  ;;  %v5454_v31 = vadd.f32 %v8096_v14, %v5192_v42  ;;  %v5194_v5 = vadd.f32 %v10205_v51, %v4932_v17 }
 0x3ba   : > { %v5362_v28 = vpop.f32.mrf.mxu1  ;;  %v4936_v42 = vadd.f32 %v7981_v60, %v10227_v50  ;;  %v5196_v48 = vadd.f32 %v10214_v55, %v4934_v62  ;;  %v5195_v17 = vadd.f32 %v10220_v16, %v4933_v38  ;;  %v4938_v62 = vadd.f32 %v10298_v53, %v10239_v59  ;;  %v6267_v59 = vld [vmem:[%s8789_s4 + $0x62] sm:$0xff] }
 0x3bb   : > { %v5821_v49 = vadd.f32 %v6261_v61, %v5801_v25  ;;  %v5800_v6 = vadd.f32 %v10338_v10, %v5713_v36  ;;  %v5716_v27 = vadd.f32 %v8158_v52, %v5454_v31  ;;  %v5453_v29 = vadd.f32 %v5362_v28, %v5191_v47  ;;  %v6262_v61 = vld [vmem:[%s8789_s4 + $0x3a] sm:$0xff]  ;;  %v6265_v36 = vld [vmem:[%s8789_s4 + $0x52] sm:$0xff] }
 0x3bc   : > { %v8099_v34 = vpop.f32.mrf.mxu1  ;;  %v4935_v47 = vadd.f32 %v10296_v46, %v10232_v21  ;;  %v5198_v16 = vadd.f32 %v10229_v56, %v4936_v42  ;;  %v4937_v21 = vadd.f32 %v10300_v24, %v10245_v3 }
 0x3bd   : > { %v5841_v30 = vmax.f32 %v5821_v49, 0.0  ;;  %v5820_v7 = vadd.f32 %v6260_v58, %v5800_v6  ;;  %v5803_v0 = vadd.f32 %v10338_v10, %v5716_v27  ;;  %v5715_v22 = vadd.f32 %v5624_v11, %v5453_v29  ;;  %v10367_v11 = vpop.f32.mrf.mxu0  ;;  %v6264_v58 = vld [vmem:[%s8789_s4 + $0x4a] sm:$0xff] }
 0x3be   : > { %v5456_v52 = vadd.f32 %v8099_v34, %v5194_v5  ;;  %v5372_v14 = vpop.f32.mrf.mxu1  ;;  %v5197_v3 = vadd.f32 %v10235_v44, %v4935_v47  ;;  %v5199_v44 = vadd.f32 %v10247_v18, %v4937_v21  ;;  %v6273_v21 = vld [vmem:[%s8789_s4 + $0x92] sm:$0xff] }
 0x3bf   : > { %5861 = vst [vmem:[%s10363_s14 + $0x8] sm:$0xff] %v5841_v30  ;;  %v5840_v51 = vmax.f32 %v5820_v7, 0.0  ;;  %v5823_v4 = vadd.f32 %v6263_v9, %v5803_v0  ;;  %v5802_v8 = vadd.f32 %v10338_v10, %v5715_v22  ;;  %v5455_v63 = vadd.f32 %v5372_v14, %v5193_v32  ;;  %v8173_v46 = vpop.f32.mrf.mxu0  ;;  %v6266_v30 = vld [vmem:[%s8789_s4 + $0x5a] sm:$0xff] }
 0x3c0   : > { %v5718_v50 = vadd.f32 %v10304_v37, %v5456_v52  ;;  %v8102_v60 = vpop.f32.mrf.mxu1  ;;  %v5200_v7 = vadd.f32 %v10241_v12, %v4938_v62 }
 0x3c1   : > { %5860 = vst [vmem:[%s10363_s14] sm:$0xff] %v5840_v51  ;;  %v5843_v55 = vmax.f32 %v5823_v4, 0.0  ;;  %v5822_v25 = vadd.f32 %v6262_v61, %v5802_v8  ;;  %v5717_v31 = vadd.f32 %v10310_v41, %v5455_v63  ;;  %v5458_v9 = vadd.f32 %v8102_v60, %v5196_v48  ;;  %v5674_v52 = vpop.f32.mrf.mxu0 }
 0x3c2   : > { %v5805_v37 = vadd.f32 %v10338_v10, %v5718_v50  ;;  %v5382_v28 = vpop.f32.mrf.mxu1  ;;  %v6268_v50 = vld [vmem:[%s8789_s4 + $0x6a] sm:$0xff] }
 0x3c3   : > { %5863 = vst [vmem:[%s10363_s14 + $0x18] sm:$0xff] %v5843_v55  ;;  %v5842_v49 = vmax.f32 %v5822_v25, 0.0  ;;  %v5804_v41 = vadd.f32 %v10338_v10, %v5717_v31  ;;  %v5720_v6 = vadd.f32 %v10314_v57, %v5458_v9  ;;  %v5457_v27 = vadd.f32 %v5382_v28, %v5195_v17 }
 0x3c4   : > { %v5825_v29 = vadd.f32 %v6265_v36, %v5805_v37  ;;  %v8105_v53 = vpop.f32.mrf.mxu1  ;;  %v4940_v57 = vadd.f32 %v10302_v35, %v10251_v45  ;;  %v6269_v45 = vld [vmem:[%s8789_s4 + $0x72] sm:$0xff]  ;;  %v4942_v17 = vadd.f32 %v10308_v23, %v10263_v2  ;;  %v4941_v55 = vadd.f32 %v10312_v13, %v10268_v39  ;;  %v6271_v36 = vld [vmem:[%s8789_s4 + $0x82] sm:$0xff]  ;;  %v6270_v39 = vld [vmem:[%s8789_s4 + $0x7a] sm:$0xff] }
 0x3c5   : > { %5862 = vst [vmem:[%s10363_s14 + $0x10] sm:$0xff] %v5842_v49  ;;  %v5824_v38 = vadd.f32 %v6264_v58, %v5804_v41  ;;  %v5807_v56 = vadd.f32 %v10338_v10, %v5720_v6  ;;  %v5719_v5 = vadd.f32 %v10321_v15, %v5457_v27  ;;  %v5460_v34 = vadd.f32 %v8105_v53, %v5198_v16  ;;  %v10756_v2 = vld [vmem:[#allocation23_spill] sm:$0xff]  ;;  %v10757_v41 = vld [vmem:[#allocation20_spill] sm:$0xff]  ;;  %v10758_v6 = vld [vmem:[#allocation25_spill] sm:$0xff] }
 0x3c6   : > { %v5845_v32 = vmax.f32 %v5825_v29, 0.0  ;;  %v5392_v24 = vpop.f32.mrf.mxu1  ;;  %v4939_v15 = vadd.f32 %v10306_v40, %v10254_v54  ;;  %v5202_v54 = vadd.f32 %v10256_v19, %v4940_v57  ;;  %v4944_v23 = vadd.f32 %v10756_v2, %v10275_v26  ;;  %v10759_v29 = vld [vmem:[#allocation24_spill] sm:$0xff]  ;;  %v10760_v53 = vld [vmem:[#allocation34_spill] sm:$0xff] }
 0x3c7   : > { %v5844_v0 = vmax.f32 %v5824_v38, 0.0  ;;  %v5827_v22 = vadd.f32 %v6267_v59, %v5807_v56  ;;  %v5806_v42 = vadd.f32 %v10338_v10, %v5719_v5  ;;  %v5722_v61 = vadd.f32 %v10330_v33, %v5460_v34  ;;  %v10768_v2 = vld [vmem:[#allocation28_spill] sm:$0xff] }
 0x3c8   : > { %5865 = vst [vmem:[%s10363_s14 + $0x28] sm:$0xff] %v5845_v32  ;;  %v5459_v35 = vadd.f32 %v5392_v24, %v5197_v3  ;;  %v8108_v14 = vpop.f32.mrf.mxu1  ;;  %v5201_v31 = vadd.f32 %v10259_v43, %v4939_v15  ;;  %v5204_v26 = vadd.f32 %v10759_v29, %v4942_v17  ;;  %v5203_v38 = vadd.f32 %v10760_v53, %v4941_v55  ;;  %v10761_v3 = vld [vmem:[#allocation26_spill] sm:$0xff]  ;;  %v10762_v15 = vld [vmem:[#allocation33_spill] sm:$0xff] }
 0x3c9   : > { %5864 = vst [vmem:[%s10363_s14 + $0x20] sm:$0xff] %v5844_v0  ;;  %v5847_v12 = vmax.f32 %v5827_v22, 0.0  ;;  %v5826_v48 = vadd.f32 %v6266_v30, %v5806_v42  ;;  %v5809_v51 = vadd.f32 %v10338_v10, %v5722_v61  ;;  %v5462_v4 = vadd.f32 %v8108_v14, %v5200_v7 }
 0x3ca   : > { %v5721_v33 = vadd.f32 %v10343_v20, %v5459_v35  ;;  %v5402_v8 = vpop.f32.mrf.mxu1  ;;  %v8176_v20 = vpop.f32.mrf.mxu0  ;;  %v5206_v24 = vadd.f32 %v10761_v3, %v4944_v23 }
 0x3cb   : > { %5867 = vst [vmem:[%s10363_s14 + $0x38] sm:$0xff] %v5847_v12  ;;  %v5846_v40 = vmax.f32 %v5826_v48, 0.0  ;;  %v5829_v63 = vadd.f32 %v6269_v45, %v5809_v51  ;;  %v5724_v60 = vadd.f32 %v10354_v1, %v5462_v4  ;;  %v5461_v18 = vadd.f32 %v5402_v8, %v5199_v44  ;;  %v10763_v45 = vld [vmem:[#allocation27_spill] sm:$0xff]  ;;  %v10764_v44 = vld [vmem:[#allocation21_spill] sm:$0xff] }
 0x3cc   : > { %v5808_v25 = vadd.f32 %v10338_v10, %v5721_v33  ;;  %v8111_v19 = vpop.f32.mrf.mxu1  ;;  %v5684_v49 = vpop.f32.mrf.mxu0  ;;  %v6275_v4 = vld [vmem:[%s8789_s4 + $0xa2] sm:$0xff] }
 0x3cd   : > { %5866 = vst [vmem:[%s10363_s14 + $0x30] sm:$0xff] %v5846_v40  ;;  %v5849_v9 = vmax.f32 %v5829_v63, 0.0  ;;  %v5811_v1 = vadd.f32 %v10338_v10, %v5724_v60  ;;  %v5723_v47 = vadd.f32 %v10367_v11, %v5461_v18  ;;  %v5464_v62 = vadd.f32 %v8111_v19, %v5202_v54  ;;  %v10765_v54 = vld [vmem:[#allocation22_spill] sm:$0xff]  ;;  %v10766_v40 = vld [vmem:[#allocation29_spill] sm:$0xff] }
 0x3ce   : > { %v5828_v37 = vadd.f32 %v6268_v50, %v5808_v25  ;;  %v5412_v13 = vpop.f32.mrf.mxu1  ;;  %v4943_v11 = vadd.f32 %v10758_v6, %v10757_v41  ;;  %v8179_v61 = vpop.f32.mrf.mxu0  ;;  %v4945_v63 = vadd.f32 %v10766_v40, %v10765_v54  ;;  %v6274_v60 = vld [vmem:[%s8789_s4 + $0x9a] sm:$0xff] }
 0x3cf   : > { %5869 = vst [vmem:[%s10363_s14 + $0x48] sm:$0xff] %v5849_v9  ;;  %v5831_v58 = vadd.f32 %v6271_v36, %v5811_v1  ;;  %v5810_v43 = vadd.f32 %v10338_v10, %v5723_v47  ;;  %v5726_v28 = vadd.f32 %v8173_v46, %v5464_v62  ;;  %v5463_v16 = vadd.f32 %v5412_v13, %v5201_v31  ;;  %v6272_v46 = vld [vmem:[%s8789_s4 + $0x8a] sm:$0xff]  ;;  %v6277_v31 = vld [vmem:[%s8789_s4 + $0xb2] sm:$0xff] }
 0x3d0   : > { %v5848_v27 = vmax.f32 %v5828_v37, 0.0  ;;  %v8114_v59 = vpop.f32.mrf.mxu1  ;;  %v5205_v12 = vadd.f32 %v10764_v44, %v4943_v11  ;;  %v5694_v36 = vpop.f32.mrf.mxu0  ;;  %v10769_v13 = vld [vmem:[#allocation37_spill] sm:$0xff] }
 0x3d1   : > { %v5851_v56 = vmax.f32 %v5831_v58, 0.0  ;;  %v5830_v5 = vadd.f32 %v6270_v39, %v5810_v43  ;;  %v5813_v34 = vadd.f32 %v10338_v10, %v5726_v28  ;;  %v5725_v57 = vadd.f32 %v5674_v52, %v5463_v16  ;;  %v6276_v39 = vld [vmem:[%s8789_s4 + $0xaa] sm:$0xff] }
 0x3d2   : > { %5868 = vst [vmem:[%s10363_s14 + $0x40] sm:$0xff] %v5848_v27  ;;  %v5466_v32 = vadd.f32 %v8114_v59, %v5204_v26  ;;  %v5422_v30 = vpop.f32.mrf.mxu1  ;;  %v4946_v52 = vadd.f32 %v10763_v45, %v10762_v15  ;;  %v5207_v58 = vadd.f32 %v10769_v13, %v4945_v63  ;;  %v6279_v26 = vld [vmem:[%s8789_s4 + $0xc2] sm:$0xff] }
 0x3d3   : > { %5871 = vst [vmem:[%s10363_s14 + $0x58] sm:$0xff] %v5851_v56  ;;  %v5850_v7 = vmax.f32 %v5830_v5, 0.0  ;;  %v5833_v0 = vadd.f32 %v6273_v21, %v5813_v34  ;;  %v5812_v22 = vadd.f32 %v10338_v10, %v5725_v57  ;;  %v5465_v42 = vadd.f32 %v5422_v30, %v5203_v38  ;;  %v6278_v5 = vld [vmem:[%s8789_s4 + $0xba] sm:$0xff]  ;;  %s10475_s4 = scalar_lea.sflag [#allocation6], %s325_s21 }
 0x3d4   : > { %v5728_v35 = vadd.f32 %v8176_v20, %v5466_v32  ;;  %v8117_v14 = vpop.f32.mrf.mxu1  ;;  %v5208_v23 = vadd.f32 %v10768_v2, %v4946_v52 }
 0x3d5   : > { %5870 = vst [vmem:[%s10363_s14 + $0x50] sm:$0xff] %v5850_v7  ;;  %v5853_v48 = vmax.f32 %v5833_v0, 0.0  ;;  %v5832_v51 = vadd.f32 %v6272_v46, %v5812_v22  ;;  %v5727_v33 = vadd.f32 %v5684_v49, %v5465_v42  ;;  %v5468_v8 = vadd.f32 %v8117_v14, %v5206_v24 }
 0x3d6   : > { %v5815_v50 = vadd.f32 %v10338_v10, %v5728_v35  ;;  %v5432_v18 = vpop.f32.mrf.mxu1 }
 0x3d7   : > { %5873 = vst [vmem:[%s10363_s14 + $0x68] sm:$0xff] %v5853_v48  ;;  %v5852_v17 = vmax.f32 %v5832_v51, 0.0  ;;  %v5814_v55 = vadd.f32 %v10338_v10, %v5727_v33  ;;  %v5730_v20 = vadd.f32 %v8179_v61, %v5468_v8  ;;  %v5467_v25 = vadd.f32 %v5432_v18, %v5205_v12 }
 0x3d8   : > { %v5835_v19 = vadd.f32 %v6275_v4, %v5815_v50  ;;  %v8120_v9 = vpop.f32.mrf.mxu1 }
 0x3d9   : > { %5872 = vst [vmem:[%s10363_s14 + $0x60] sm:$0xff] %v5852_v17  ;;  %v5834_v1 = vadd.f32 %v6274_v60, %v5814_v55  ;;  %v5817_v47 = vadd.f32 %v10338_v10, %v5730_v20  ;;  %v5729_v62 = vadd.f32 %v5694_v36, %v5467_v25  ;;  %v5470_v41 = vadd.f32 %v8120_v9, %v5208_v23 }
 0x3da   : > { %v5855_v37 = vmax.f32 %v5835_v19, 0.0  ;;  %v5442_v43 = vpop.f32.mrf.mxu1 }
 0x3db   : > { %v5854_v28 = vmax.f32 %v5834_v1, 0.0  ;;  %v5837_v16 = vadd.f32 %v6277_v31, %v5817_v47  ;;  %v5816_v49 = vadd.f32 %v10338_v10, %v5729_v62  ;;  %v5469_v21 = vadd.f32 %v5442_v43, %v5207_v58 }
 0x3dc   : > { %5875 = vst [vmem:[%s10363_s14 + $0x78] sm:$0xff] %v5855_v37  ;;  %v8182_v6 = vpop.f32.mrf.mxu1 }
 0x3dd   : > { %5874 = vst [vmem:[%s10363_s14 + $0x70] sm:$0xff] %v5854_v28  ;;  %v5857_v11 = vmax.f32 %v5837_v16, 0.0  ;;  %v5836_v27 = vadd.f32 %v6276_v39, %v5816_v49  ;;  %v5732_v29 = vadd.f32 %v8182_v6, %v5470_v41 }
 0x3de   : > { %v5704_v59 = vpop.f32.mrf.mxu1 }
 0x3df   : > { %5877 = vst [vmem:[%s10363_s14 + $0x88] sm:$0xff] %v5857_v11  ;;  %v5856_v53 = vmax.f32 %v5836_v27, 0.0  ;;  %v5819_v38 = vadd.f32 %v10338_v10, %v5732_v29  ;;  %v5731_v56 = vadd.f32 %v5704_v59, %v5469_v21 }
 0x3e1   : > { %5876 = vst [vmem:[%s10363_s14 + $0x80] sm:$0xff] %v5856_v53  ;;  %v5839_v34 = vadd.f32 %v6279_v26, %v5819_v38  ;;  %v5818_v57 = vadd.f32 %v10338_v10, %v5731_v56 }
 0x3e3   : > { %v5859_v46 = vmax.f32 %v5839_v34, 0.0  ;;  %v5838_v32 = vadd.f32 %v6278_v5, %v5818_v57 }
 0x3e5   : > { %5879 = vst [vmem:[%s10363_s14 + $0x98] sm:$0xff] %v5859_v46  ;;  %v5858_v30 = vmax.f32 %v5838_v32, 0.0 }
 0x3e7   : > { %5878 = vst [vmem:[%s10363_s14 + $0x90] sm:$0xff] %v5858_v30 }
 0x3e8   : > { %8447 = shalt.err (!%p8444_p2)
}
 0x3e9   : > { %s8448_s21 = scalar_lea.hbm %s10467_s8, 2560  ;;  %s8452_s20 = scalar_lea.hbm %s10772_s1, 10240 }
 0x3ea   : > { %p8449_p4 = scmp.ne.s32.totalorder %s10467_s8, %s8448_s21  ;;  %p8453_p10 = scmp.lt.s32.totalorder %s10467_s8, %s10772_s1 }
 0x3eb   : > { %p8454_p6 = scmp.lt.s32.totalorder %s8452_s20, %s8448_s21 }
 0x3ec   : > { %p8450_p13 = pnand %p8449_p4, %p8675_p7 }
 0x3ed   : > { %p8455_p1 = por %p8454_p6, %p8453_p10 }
 0x3ee   : > { %p8451_p8 = pneg %p8450_p13 }
 0x3f0   : > { %p8456_p3 = pnand %p8455_p1, %p8451_p8 }
 0x3f2   : > { %8459 = shalt.err (!%p8456_p3)
}
 0x3f3   : > { %s8567_s28 = smov 128   ;;  %s8568_s12 = smov 8  }
 0x3f4   : > { %8231 = dma.vmem_to_hbm [thread:$0]  (%p8675_p7), %s10469_s10, 2560, %s10467_s8, %s10475_s4, %s8567_s28, %s8567_s28, %s8568_s12  }
 0x3f5 PF: > { %s10773_s15 = sld [smem:[#allocation14_spill]]  ;;  %p8253_p9 = scmp.ge.s32.totalorder %s8558_s7, 2 }
 0x3f6   : > { %s10774_s24 = sld [smem:[#allocation18_spill]] }
 0x3fb   : > { %s5911_s29 = sand.u32 1, %s10773_s15  }
 0x3fc   : > { %p10775_p11 = scmp.ne.s32.totalorder %s10774_s24, 0  ;;  %s5912_s9 = scalar_lea.sflag [#allocation6], %s5911_s29 }
 0x3fe   : > { %p8245_p5 = pnand %p8253_p9, %p10775_p11 }
 0x400   : > { %p8246_p12 = pneg %p8245_p5 }
 0x402   : > { %8513 = dma.done.wait (%p8246_p12), %s5912_s9, 2560  }
 0x403   : > { %8515 = vsyncadd (%p8246_p12), %s5912_s9, 4294964736  ;;  %s23_s7 = sadd.s32 1, %s8558_s7   ;;  %s10776_s27 = sld [smem:[#allocation16_spill]] }
 0x404   : > { %p20_p0 = scmp.ge.s32.totalorder %s23_s7, 6   ;;  %s10777_s29 = sld [smem:[#allocation19_spill]] }
 0x405   : > { %s10778_s21 = smov %s8522_s22  ;;  %s10779_s22 = smov %s8526_s23 }
 0x406   : > { %s10780_s23 = smov %s8754_s6  ;;  %s10781_s24 = smov %s8534_s25 }
 0x407   : > { %s10782_s25 = smov %s8538_s26  ;;  %s10783_s26 = smov %s8749_s11 }
 0x408   : > { %s10784_s28 = smov %s8554_s30  ;;  %s10785_s30 = smov %s10791_s17 }
 0x409   :  { %22 = sbr.rel (!%p20_p0) target bundleno = 15 (0xf), region = 125 }
 0x40e   :  { %5917 = vsyncpa [#allocation5], 1 }
 0x40f   :  { %5919 = vsyncpa [#allocation5 + $0x1], 1 }
 0x410   :  { %5920 = vsyncpa [#allocation8], 1 }
 0x411   :  { %5921 = vsyncpa [#allocation6], 1 }
 0x412   :  { %5923 = vsyncpa [#allocation6 + $0x1], 1 }

</bundles_post_ra>
